<compile_context>
chip_gen: v6e
topology: v6e:2x2x1
jax: 0.10.0
libtpu: 0.0.40
codegen_flags: <defaults>
</compile_context>

<pallas_src>
import math
from functools import partial

import jax
import jax.numpy as jnp
from jax.experimental import pallas as pl
from jax.experimental.pallas import tpu as pltpu


# --------------------------- in-kernel helpers -----------------------------

def _layer_norm(z, g, b):
    # LayerNorm over the last dim, eps=1e-5 (PyTorch default)
    mean = jnp.mean(z, axis=-1, keepdims=True)
    zc = z - mean
    var = jnp.mean(zc * zc, axis=-1, keepdims=True)
    return zc * jax.lax.rsqrt(var + 1e-5) * g + b


def _mha_core(q_lin, k_lin, v_lin, w_o, b_o, nhead):
    """Multi-head scaled-dot-product attention + output projection.

    q_lin: (Lq, d), k_lin / v_lin: (Lk, d) -- already linearly projected.
    Per-head outputs are folded straight into the output projection
    (acc += (P_h @ V_h) @ W_o[h*dh:(h+1)*dh, :]) so no concat is needed.
    """
    Lq, d = q_lin.shape
    dh = d // nhead
    scale = 1.0 / math.sqrt(dh)
    acc = jnp.zeros((Lq, d), jnp.float32)
    for h in range(nhead):
        lo = h * dh
        qh = q_lin[:, lo:lo + dh] * scale
        kh = k_lin[:, lo:lo + dh]
        vh = v_lin[:, lo:lo + dh]
        s = jax.lax.dot_general(qh, kh, (((1,), (1,)), ((), ())),
                                preferred_element_type=jnp.float32)
        m = jnp.max(s, axis=-1, keepdims=True)
        p = jnp.exp(s - m)
        denom = jnp.sum(p, axis=-1, keepdims=True)
        p = p * pl.reciprocal(denom, approx=True)
        oh = jnp.dot(p, vh, preferred_element_type=jnp.float32)        # (Lq, dh)
        acc = acc + jnp.dot(oh, w_o[lo:lo + dh, :],
                            preferred_element_type=jnp.float32)
    return acc + b_o


def _conv3x3_same(x, w_flat_ref, b_ref):
    """Single-channel 3x3 'same' conv on one (t, d) plane.

    Row/column shifts with zero padding are expressed as tiny MXU matmuls
    (shift matrices built from iota), so no padded array is materialized
    and no unaligned sub-vreg slices are needed.
    """
    t, d = x.shape

    def row_shift(n, s):
        # (M @ x)[i, :] == x[i + s, :], zero outside bounds
        i = jax.lax.broadcasted_iota(jnp.int32, (n, n), 0)
        k = jax.lax.broadcasted_iota(jnp.int32, (n, n), 1)
        return (k == i + s).astype(jnp.float32)

    def col_shift(n, s):
        # (x @ M)[:, j] == x[:, j + s], zero outside bounds
        k = jax.lax.broadcasted_iota(jnp.int32, (n, n), 0)
        j = jax.lax.broadcasted_iota(jnp.int32, (n, n), 1)
        return (k == j + s).astype(jnp.float32)

    xr = {}
    for di in (-1, 0, 1):
        if di == 0:
            xr[di] = x
        else:
            xr[di] = jnp.dot(row_shift(t, di), x,
                             preferred_element_type=jnp.float32)

    acc = jnp.zeros((t, d), jnp.float32)
    for dj in (-1, 0, 1):
        # weighted sum over the row-offset for this column-offset
        s = (w_flat_ref[0 * 3 + (dj + 1)] * xr[-1]
             + w_flat_ref[1 * 3 + (dj + 1)] * xr[0]
             + w_flat_ref[2 * 3 + (dj + 1)] * xr[1])
        if dj == 0:
            acc = acc + s
        else:
            acc = acc + jnp.dot(s, col_shift(d, dj),
                                preferred_element_type=jnp.float32)
    return acc + b_ref[0]


# ------------------------------ fused kernel --------------------------------

def _decoder_kernel(src_ref, conv_w_ref, conv_b_ref, pe_ref, qe_ref,
                    sa_wqk_ref, sa_bqk_ref, sa_wv_ref, sa_bv_ref,
                    sa_wo_ref, sa_bo_ref,
                    ca_wq_ref, ca_bq_ref, ca_wkv_ref, ca_bkv_ref,
                    ca_wo_ref, ca_bo_ref,
                    w1_ref, b1_ref, w2_ref, b2_ref,
                    ln1_g_ref, ln1_b_ref, ln2_g_ref, ln2_b_ref,
                    ln3_g_ref, ln3_b_ref,
                    norm_g_ref, norm_b_ref,
                    out_ref, *, nhead, num_layers, with_conv):
    t, d = src_ref.shape
    nq = qe_ref.shape[0]

    x = src_ref[...]                                    # (t, d) current batch
    if with_conv:
        x = x + _conv3x3_same(x, conv_w_ref, conv_b_ref)

    mem_pos = x + pe_ref[...]                           # memory + pos (K and V input)
    qe = qe_ref[...]                                    # query_pos (nq, d)

    tgt = jnp.zeros((nq, d), jnp.float32)               # tgt_enc = zeros
    for l in range(num_layers):                         # unrolled, weights in VMEM
        # --- self attention: Q = K = tgt + query_pos, V = tgt ---
        qk_in = tgt + qe
        qk = jnp.dot(qk_in, sa_wqk_ref[l],
                     preferred_element_type=jnp.float32) + sa_bqk_ref[l]
        v = jnp.dot(tgt, sa_wv_ref[l],
                    preferred_element_type=jnp.float32) + sa_bv_ref[l]
        sa = _mha_core(qk[:, :d], qk[:, d:], v,
                       sa_wo_ref[l], sa_bo_ref[l], nhead)
        tgt = _layer_norm(tgt + sa, ln1_g_ref[l], ln1_b_ref[l])

        # --- cross attention: Q = tgt + query_pos, K = V = memory + pos ---
        q = jnp.dot(tgt + qe, ca_wq_ref[l],
                    preferred_element_type=jnp.float32) + ca_bq_ref[l]
        kv = jnp.dot(mem_pos, ca_wkv_ref[l],
                     preferred_element_type=jnp.float32) + ca_bkv_ref[l]
        ca = _mha_core(q, kv[:, :d], kv[:, d:],
                       ca_wo_ref[l], ca_bo_ref[l], nhead)
        tgt = _layer_norm(tgt + ca, ln2_g_ref[l], ln2_b_ref[l])

        # --- feed-forward (ReLU) ---
        h = jnp.maximum(
            jnp.dot(tgt, w1_ref[l],
                    preferred_element_type=jnp.float32) + b1_ref[l], 0.0)
        ff = jnp.dot(h, w2_ref[l],
                     preferred_element_type=jnp.float32) + b2_ref[l]
        tgt = _layer_norm(tgt + ff, ln3_g_ref[l], ln3_b_ref[l])

    # final encoder LayerNorm (TransformerDecoder.norm)
    out_ref[...] = _layer_norm(tgt, norm_g_ref[...], norm_b_ref[...])


# ------------------------------ model wrapper -------------------------------

_WEIGHT_NAMES = ("sa_wqk", "sa_bqk", "sa_wv", "sa_bv", "sa_wo", "sa_bo",
                 "ca_wq", "ca_bq", "ca_wkv", "ca_bkv", "ca_wo", "ca_bo",
                 "w1", "b1", "w2", "b2",
                 "ln1_g", "ln1_b", "ln2_g", "ln2_b", "ln3_g", "ln3_b",
                 "norm_g", "norm_b")


def decoder_forward(src, params, *, nhead, with_spatial_conv=True):
    """Decoder.forward. src: (bs, t, d_model) -> (bs, num_queries, d_model)."""
    bs, t, d = src.shape
    nq = params["query_embed"].shape[0]
    num_layers = params["sa_wqk"].shape[0]
    pe = params["pe"][:t]                               # (t, d)

    weights = [params[n] for n in _WEIGHT_NAMES]

    def vspec(arr):
        return pl.BlockSpec(arr.shape, lambda b, n=arr.ndim: (0,) * n)

    in_specs = ([pl.BlockSpec((None, t, d), lambda b: (b, 0, 0)),
                 pl.BlockSpec(memory_space=pltpu.MemorySpace.SMEM),   # conv_w (9,)
                 pl.BlockSpec(memory_space=pltpu.MemorySpace.SMEM),   # conv_b (1,)
                 vspec(pe),
                 vspec(params["query_embed"])]
                + [vspec(w) for w in weights])

    kernel = partial(_decoder_kernel, nhead=nhead, num_layers=num_layers,
                     with_conv=with_spatial_conv)

    return pl.pallas_call(
        kernel,
        out_shape=jax.ShapeDtypeStruct((bs, nq, d), jnp.float32),
        grid=(bs,),
        in_specs=in_specs,
        out_specs=pl.BlockSpec((None, nq, d), lambda b: (b, 0, 0)),
        compiler_params=pltpu.CompilerParams(
            dimension_semantics=("parallel",)),
    )(src,
      params["conv_w"].reshape(9).astype(jnp.float32),
      params["conv_b"].reshape(1).astype(jnp.float32),
      pe, params["query_embed"], *weights)


# --------------------------- parameter setup --------------------------------

def make_params(key, *, d_model, nhead, dff, num_queries, num_layers,
                max_len=4096):
    d, F, L = d_model, dff, num_layers

    def xavier(k, shape):
        fan_in, fan_out = shape[-2], shape[-1]
        limit = math.sqrt(6.0 / (fan_in + fan_out))
        return jax.random.uniform(k, shape, jnp.float32, -limit, limit)

    keys = iter(jax.random.split(key, 32))

    params = {
        # self-attention (Q/K fused since both come from tgt+query_pos)
        "sa_wqk": xavier(next(keys), (L, d, 2 * d)),
        "sa_bqk": jnp.zeros((L, 1, 2 * d), jnp.float32),
        "sa_wv": xavier(next(keys), (L, d, d)),
        "sa_bv": jnp.zeros((L, 1, d), jnp.float32),
        "sa_wo": xavier(next(keys), (L, d, d)),
        "sa_bo": jnp.zeros((L, 1, d), jnp.float32),
        # cross-attention (K/V fused since both come from memory+pos)
        "ca_wq": xavier(next(keys), (L, d, d)),
        "ca_bq": jnp.zeros((L, 1, d), jnp.float32),
        "ca_wkv": xavier(next(keys), (L, d, 2 * d)),
        "ca_bkv": jnp.zeros((L, 1, 2 * d), jnp.float32),
        "ca_wo": xavier(next(keys), (L, d, d)),
        "ca_bo": jnp.zeros((L, 1, d), jnp.float32),
        # feed-forward
        "w1": xavier(next(keys), (L, d, F)),
        "b1": jnp.zeros((L, 1, F), jnp.float32),
        "w2": xavier(next(keys), (L, F, d)),
        "b2": jnp.zeros((L, 1, d), jnp.float32),
        # per-layer LayerNorms
        "ln1_g": jnp.ones((L, 1, d), jnp.float32),
        "ln1_b": jnp.zeros((L, 1, d), jnp.float32),
        "ln2_g": jnp.ones((L, 1, d), jnp.float32),
        "ln2_b": jnp.zeros((L, 1, d), jnp.float32),
        "ln3_g": jnp.ones((L, 1, d), jnp.float32),
        "ln3_b": jnp.zeros((L, 1, d), jnp.float32),
        # final encoder LayerNorm
        "norm_g": jnp.ones((1, d), jnp.float32),
        "norm_b": jnp.zeros((1, d), jnp.float32),
        # query embedding + temporal conv
        "query_embed": xavier(next(keys), (num_queries, d)),
        "conv_w": xavier(next(keys), (3, 3)) * 0.1,      # Conv2d(1,1,3) kernel
        "conv_b": jnp.zeros((1,), jnp.float32),
    }

    # sinusoidal positional "pe" buffer (unusual base 8.0, matching the module)
    position = jnp.arange(max_len, dtype=jnp.float32)[:, None]
    div_term = jnp.exp(jnp.arange(0, d, 2, dtype=jnp.float32)
                       * (-math.log(8.0) / d))
    pe = jnp.zeros((max_len, d), jnp.float32)
    pe = pe.at[:, 0::2].set(jnp.sin(position * div_term))
    pe = pe.at[:, 1::2].set(jnp.cos(position * div_term))
    params["pe"] = pe
    # NOTE: wq / wkv / cls_token exist in Decoder.__init__ but are unused in
    # Decoder.forward, so they are omitted here.
    return params


# -------------------------------- main ---------------------------------------

if __name__ == "__main__":
    d_model, nhead, dff = 32, 4, 64
    num_queries, num_layers = 8, 2
    bs, t = 2, 16

    key = jax.random.PRNGKey(0)
    pkey, xkey = jax.random.split(key)
    params = make_params(pkey, d_model=d_model, nhead=nhead, dff=dff,
                         num_queries=num_queries, num_layers=num_layers)
    src = jax.random.normal(xkey, (bs, t, d_model), jnp.float32)

    fwd = jax.jit(partial(decoder_forward, nhead=nhead, with_spatial_conv=True))
    out = fwd(src, params)
    jax.block_until_ready(out)
    assert out.shape == (bs, num_queries, d_model)
    assert bool(jnp.all(jnp.isfinite(out)))
    print("KERNEL_OK")
</pallas_src>

<mosaic_0001>
module attributes {stable_mosaic.version = 11 : i64} {
  func.func @_decoder_kernel(%arg0: i32, %arg1: memref<1x16x32xf32, #tpu.memory_space<vmem>>, %arg2: memref<9xf32, #tpu.memory_space<smem>>, %arg3: memref<1xf32, #tpu.memory_space<smem>>, %arg4: memref<16x32xf32, #tpu.memory_space<vmem>>, %arg5: memref<8x32xf32, #tpu.memory_space<vmem>>, %arg6: memref<2x32x64xf32, #tpu.memory_space<vmem>>, %arg7: memref<2x1x64xf32, #tpu.memory_space<vmem>>, %arg8: memref<2x32x32xf32, #tpu.memory_space<vmem>>, %arg9: memref<2x1x32xf32, #tpu.memory_space<vmem>>, %arg10: memref<2x32x32xf32, #tpu.memory_space<vmem>>, %arg11: memref<2x1x32xf32, #tpu.memory_space<vmem>>, %arg12: memref<2x32x32xf32, #tpu.memory_space<vmem>>, %arg13: memref<2x1x32xf32, #tpu.memory_space<vmem>>, %arg14: memref<2x32x64xf32, #tpu.memory_space<vmem>>, %arg15: memref<2x1x64xf32, #tpu.memory_space<vmem>>, %arg16: memref<2x32x32xf32, #tpu.memory_space<vmem>>, %arg17: memref<2x1x32xf32, #tpu.memory_space<vmem>>, %arg18: memref<2x32x64xf32, #tpu.memory_space<vmem>>, %arg19: memref<2x1x64xf32, #tpu.memory_space<vmem>>, %arg20: memref<2x64x32xf32, #tpu.memory_space<vmem>>, %arg21: memref<2x1x32xf32, #tpu.memory_space<vmem>>, %arg22: memref<2x1x32xf32, #tpu.memory_space<vmem>>, %arg23: memref<2x1x32xf32, #tpu.memory_space<vmem>>, %arg24: memref<2x1x32xf32, #tpu.memory_space<vmem>>, %arg25: memref<2x1x32xf32, #tpu.memory_space<vmem>>, %arg26: memref<2x1x32xf32, #tpu.memory_space<vmem>>, %arg27: memref<2x1x32xf32, #tpu.memory_space<vmem>>, %arg28: memref<1x32xf32, #tpu.memory_space<vmem>>, %arg29: memref<1x32xf32, #tpu.memory_space<vmem>>, %arg30: memref<1x8x32xf32, #tpu.memory_space<vmem>>) attributes {dimension_semantics = [#tpu.dimension_semantics<parallel>], iteration_bounds = array<i64: 2>, scalar_prefetch = 0 : i64, scratch_operands = 0 : i64, tpu.core_type = #tpu.core_type<tc>, window_params = [{transform_indices = @transform_0, window_bounds = array<i64: 1, 16, 32>}, {transform_indices = @transform_1, window_bounds = array<i64: 9>}, {transform_indices = @transform_2, window_bounds = array<i64: 1>}, {pipeline_mode = #tpu.pipeline_mode<synchronous>, transform_indices = @transform_3, window_bounds = array<i64: 16, 32>}, {pipeline_mode = #tpu.pipeline_mode<synchronous>, transform_indices = @transform_4, window_bounds = array<i64: 8, 32>}, {pipeline_mode = #tpu.pipeline_mode<synchronous>, transform_indices = @transform_5, window_bounds = array<i64: 2, 32, 64>}, {pipeline_mode = #tpu.pipeline_mode<synchronous>, transform_indices = @transform_6, window_bounds = array<i64: 2, 1, 64>}, {pipeline_mode = #tpu.pipeline_mode<synchronous>, transform_indices = @transform_7, window_bounds = array<i64: 2, 32, 32>}, {pipeline_mode = #tpu.pipeline_mode<synchronous>, transform_indices = @transform_8, window_bounds = array<i64: 2, 1, 32>}, {pipeline_mode = #tpu.pipeline_mode<synchronous>, transform_indices = @transform_9, window_bounds = array<i64: 2, 32, 32>}, {pipeline_mode = #tpu.pipeline_mode<synchronous>, transform_indices = @transform_10, window_bounds = array<i64: 2, 1, 32>}, {pipeline_mode = #tpu.pipeline_mode<synchronous>, transform_indices = @transform_11, window_bounds = array<i64: 2, 32, 32>}, {pipeline_mode = #tpu.pipeline_mode<synchronous>, transform_indices = @transform_12, window_bounds = array<i64: 2, 1, 32>}, {pipeline_mode = #tpu.pipeline_mode<synchronous>, transform_indices = @transform_13, window_bounds = array<i64: 2, 32, 64>}, {pipeline_mode = #tpu.pipeline_mode<synchronous>, transform_indices = @transform_14, window_bounds = array<i64: 2, 1, 64>}, {pipeline_mode = #tpu.pipeline_mode<synchronous>, transform_indices = @transform_15, window_bounds = array<i64: 2, 32, 32>}, {pipeline_mode = #tpu.pipeline_mode<synchronous>, transform_indices = @transform_16, window_bounds = array<i64: 2, 1, 32>}, {pipeline_mode = #tpu.pipeline_mode<synchronous>, transform_indices = @transform_17, window_bounds = array<i64: 2, 32, 64>}, {pipeline_mode = #tpu.pipeline_mode<synchronous>, transform_indices = @transform_18, window_bounds = array<i64: 2, 1, 64>}, {pipeline_mode = #tpu.pipeline_mode<synchronous>, transform_indices = @transform_19, window_bounds = array<i64: 2, 64, 32>}, {pipeline_mode = #tpu.pipeline_mode<synchronous>, transform_indices = @transform_20, window_bounds = array<i64: 2, 1, 32>}, {pipeline_mode = #tpu.pipeline_mode<synchronous>, transform_indices = @transform_21, window_bounds = array<i64: 2, 1, 32>}, {pipeline_mode = #tpu.pipeline_mode<synchronous>, transform_indices = @transform_22, window_bounds = array<i64: 2, 1, 32>}, {pipeline_mode = #tpu.pipeline_mode<synchronous>, transform_indices = @transform_23, window_bounds = array<i64: 2, 1, 32>}, {pipeline_mode = #tpu.pipeline_mode<synchronous>, transform_indices = @transform_24, window_bounds = array<i64: 2, 1, 32>}, {pipeline_mode = #tpu.pipeline_mode<synchronous>, transform_indices = @transform_25, window_bounds = array<i64: 2, 1, 32>}, {pipeline_mode = #tpu.pipeline_mode<synchronous>, transform_indices = @transform_26, window_bounds = array<i64: 2, 1, 32>}, {pipeline_mode = #tpu.pipeline_mode<synchronous>, transform_indices = @transform_27, window_bounds = array<i64: 1, 32>}, {pipeline_mode = #tpu.pipeline_mode<synchronous>, transform_indices = @transform_28, window_bounds = array<i64: 1, 32>}, {transform_indices = @transform_29, window_bounds = array<i64: 1, 8, 32>}]} {
    %c0 = arith.constant 0 : index
    %c0_0 = arith.constant 0 : index
    %c0_1 = arith.constant 0 : index
    %0 = vector.load %arg1[%c0, %c0_0, %c0_1] : memref<1x16x32xf32, #tpu.memory_space<vmem>>, vector<1x16x32xf32>
    %1 = vector.shape_cast %0 : vector<1x16x32xf32> to vector<16x32xf32>
    %2 = tpu.iota {dimensions = array<i32: 0>} : vector<16x16xi32>
    %3 = tpu.iota {dimensions = array<i32: 1>} : vector<16x16xi32>
    %c-1_i32 = arith.constant -1 : i32
    %4 = vector.broadcast %c-1_i32 : i32 to vector<16x16xi32>
    %5 = arith.addi %2, %4 : vector<16x16xi32>
    %6 = arith.cmpi eq, %3, %5 : vector<16x16xi32>
    %7 = arith.extui %6 : vector<16x16xi1> to vector<16x16xi32>
    %8 = arith.sitofp %7 : vector<16x16xi32> to vector<16x16xf32>
    %cst = arith.constant dense<0.000000e+00> : vector<16x32xf32>
    %9 = tpu.matmul %8, %1, %cst {dimension_numbers = #tpu.dot_dimension_numbers<[1], [0], [0], [1], [0, 0, 1, 1], [], []>} : vector<16x16xf32>, vector<16x32xf32>, vector<16x32xf32> -> vector<16x32xf32>
    %10 = tpu.iota {dimensions = array<i32: 0>} : vector<16x16xi32>
    %11 = tpu.iota {dimensions = array<i32: 1>} : vector<16x16xi32>
    %c1_i32 = arith.constant 1 : i32
    %12 = vector.broadcast %c1_i32 : i32 to vector<16x16xi32>
    %13 = arith.addi %10, %12 : vector<16x16xi32>
    %14 = arith.cmpi eq, %11, %13 : vector<16x16xi32>
    %15 = arith.extui %14 : vector<16x16xi1> to vector<16x16xi32>
    %16 = arith.sitofp %15 : vector<16x16xi32> to vector<16x16xf32>
    %cst_2 = arith.constant dense<0.000000e+00> : vector<16x32xf32>
    %17 = tpu.matmul %16, %1, %cst_2 {dimension_numbers = #tpu.dot_dimension_numbers<[1], [0], [0], [1], [0, 0, 1, 1], [], []>} : vector<16x16xf32>, vector<16x32xf32>, vector<16x32xf32> -> vector<16x32xf32>
    %cst_3 = arith.constant 0.000000e+00 : f32
    %18 = vector.broadcast %cst_3 : f32 to vector<16x32xf32>
    %c0_4 = arith.constant 0 : index
    %19 = memref.load %arg2[%c0_4] : memref<9xf32, #tpu.memory_space<smem>>
    %20 = vector.broadcast %19 : f32 to vector<16x32xf32>
    %21 = arith.mulf %20, %9 : vector<16x32xf32>
    %c3 = arith.constant 3 : index
    %22 = memref.load %arg2[%c3] : memref<9xf32, #tpu.memory_space<smem>>
    %23 = vector.broadcast %22 : f32 to vector<16x32xf32>
    %24 = arith.mulf %23, %1 : vector<16x32xf32>
    %25 = arith.addf %21, %24 : vector<16x32xf32>
    %c6 = arith.constant 6 : index
    %26 = memref.load %arg2[%c6] : memref<9xf32, #tpu.memory_space<smem>>
    %27 = vector.broadcast %26 : f32 to vector<16x32xf32>
    %28 = arith.mulf %27, %17 : vector<16x32xf32>
    %29 = arith.addf %25, %28 : vector<16x32xf32>
    %30 = tpu.iota {dimensions = array<i32: 0>} : vector<32x32xi32>
    %31 = tpu.iota {dimensions = array<i32: 1>} : vector<32x32xi32>
    %c-1_i32_5 = arith.constant -1 : i32
    %32 = vector.broadcast %c-1_i32_5 : i32 to vector<32x32xi32>
    %33 = arith.addi %31, %32 : vector<32x32xi32>
    %34 = arith.cmpi eq, %30, %33 : vector<32x32xi32>
    %35 = arith.extui %34 : vector<32x32xi1> to vector<32x32xi32>
    %36 = arith.sitofp %35 : vector<32x32xi32> to vector<32x32xf32>
    %cst_6 = arith.constant dense<0.000000e+00> : vector<16x32xf32>
    %37 = tpu.matmul %29, %36, %cst_6 {dimension_numbers = #tpu.dot_dimension_numbers<[1], [0], [0], [1], [0, 0, 1, 1], [], []>} : vector<16x32xf32>, vector<32x32xf32>, vector<16x32xf32> -> vector<16x32xf32>
    %38 = arith.addf %18, %37 : vector<16x32xf32>
    %c1 = arith.constant 1 : index
    %39 = memref.load %arg2[%c1] : memref<9xf32, #tpu.memory_space<smem>>
    %40 = vector.broadcast %39 : f32 to vector<16x32xf32>
    %41 = arith.mulf %40, %9 : vector<16x32xf32>
    %c4 = arith.constant 4 : index
    %42 = memref.load %arg2[%c4] : memref<9xf32, #tpu.memory_space<smem>>
    %43 = vector.broadcast %42 : f32 to vector<16x32xf32>
    %44 = arith.mulf %43, %1 : vector<16x32xf32>
    %45 = arith.addf %41, %44 : vector<16x32xf32>
    %c7 = arith.constant 7 : index
    %46 = memref.load %arg2[%c7] : memref<9xf32, #tpu.memory_space<smem>>
    %47 = vector.broadcast %46 : f32 to vector<16x32xf32>
    %48 = arith.mulf %47, %17 : vector<16x32xf32>
    %49 = arith.addf %45, %48 : vector<16x32xf32>
    %50 = arith.addf %38, %49 : vector<16x32xf32>
    %c2 = arith.constant 2 : index
    %51 = memref.load %arg2[%c2] : memref<9xf32, #tpu.memory_space<smem>>
    %52 = vector.broadcast %51 : f32 to vector<16x32xf32>
    %53 = arith.mulf %52, %9 : vector<16x32xf32>
    %c5 = arith.constant 5 : index
    %54 = memref.load %arg2[%c5] : memref<9xf32, #tpu.memory_space<smem>>
    %55 = vector.broadcast %54 : f32 to vector<16x32xf32>
    %56 = arith.mulf %55, %1 : vector<16x32xf32>
    %57 = arith.addf %53, %56 : vector<16x32xf32>
    %c8 = arith.constant 8 : index
    %58 = memref.load %arg2[%c8] : memref<9xf32, #tpu.memory_space<smem>>
    %59 = vector.broadcast %58 : f32 to vector<16x32xf32>
    %60 = arith.mulf %59, %17 : vector<16x32xf32>
    %61 = arith.addf %57, %60 : vector<16x32xf32>
    %62 = tpu.iota {dimensions = array<i32: 0>} : vector<32x32xi32>
    %63 = tpu.iota {dimensions = array<i32: 1>} : vector<32x32xi32>
    %c1_i32_7 = arith.constant 1 : i32
    %64 = vector.broadcast %c1_i32_7 : i32 to vector<32x32xi32>
    %65 = arith.addi %63, %64 : vector<32x32xi32>
    %66 = arith.cmpi eq, %62, %65 : vector<32x32xi32>
    %67 = arith.extui %66 : vector<32x32xi1> to vector<32x32xi32>
    %68 = arith.sitofp %67 : vector<32x32xi32> to vector<32x32xf32>
    %cst_8 = arith.constant dense<0.000000e+00> : vector<16x32xf32>
    %69 = tpu.matmul %61, %68, %cst_8 {dimension_numbers = #tpu.dot_dimension_numbers<[1], [0], [0], [1], [0, 0, 1, 1], [], []>} : vector<16x32xf32>, vector<32x32xf32>, vector<16x32xf32> -> vector<16x32xf32>
    %70 = arith.addf %50, %69 : vector<16x32xf32>
    %c0_9 = arith.constant 0 : index
    %71 = memref.load %arg3[%c0_9] : memref<1xf32, #tpu.memory_space<smem>>
    %72 = vector.broadcast %71 : f32 to vector<16x32xf32>
    %73 = arith.addf %70, %72 : vector<16x32xf32>
    %74 = arith.addf %1, %73 : vector<16x32xf32>
    %c0_10 = arith.constant 0 : index
    %c0_11 = arith.constant 0 : index
    %75 = vector.load %arg4[%c0_10, %c0_11] : memref<16x32xf32, #tpu.memory_space<vmem>>, vector<16x32xf32>
    %76 = arith.addf %74, %75 : vector<16x32xf32>
    %c0_12 = arith.constant 0 : index
    %c0_13 = arith.constant 0 : index
    %77 = vector.load %arg5[%c0_12, %c0_13] : memref<8x32xf32, #tpu.memory_space<vmem>>, vector<8x32xf32>
    %cst_14 = arith.constant 0.000000e+00 : f32
    %78 = vector.broadcast %cst_14 : f32 to vector<8x32xf32>
    %79 = arith.addf %78, %77 : vector<8x32xf32>
    %c0_15 = arith.constant 0 : index
    %c0_16 = arith.constant 0 : index
    %c0_17 = arith.constant 0 : index
    %80 = vector.load %arg6[%c0_15, %c0_16, %c0_17] : memref<2x32x64xf32, #tpu.memory_space<vmem>>, vector<1x32x64xf32>
    %81 = vector.shape_cast %80 : vector<1x32x64xf32> to vector<32x64xf32>
    %cst_18 = arith.constant dense<0.000000e+00> : vector<8x64xf32>
    %82 = tpu.matmul %79, %81, %cst_18 {dimension_numbers = #tpu.dot_dimension_numbers<[1], [0], [0], [1], [0, 0, 1, 1], [], []>} : vector<8x32xf32>, vector<32x64xf32>, vector<8x64xf32> -> vector<8x64xf32>
    %c0_19 = arith.constant 0 : index
    %c0_20 = arith.constant 0 : index
    %c0_21 = arith.constant 0 : index
    %83 = vector.load %arg7[%c0_19, %c0_20, %c0_21] : memref<2x1x64xf32, #tpu.memory_space<vmem>>, vector<1x1x64xf32>
    %84 = vector.shape_cast %83 : vector<1x1x64xf32> to vector<1x64xf32>
    %85 = vector.broadcast %84 : vector<1x64xf32> to vector<8x64xf32>
    %86 = arith.addf %82, %85 : vector<8x64xf32>
    %c0_22 = arith.constant 0 : index
    %c0_23 = arith.constant 0 : index
    %c0_24 = arith.constant 0 : index
    %87 = vector.load %arg8[%c0_22, %c0_23, %c0_24] : memref<2x32x32xf32, #tpu.memory_space<vmem>>, vector<1x32x32xf32>
    %88 = vector.shape_cast %87 : vector<1x32x32xf32> to vector<32x32xf32>
    %cst_25 = arith.constant dense<0.000000e+00> : vector<8x32xf32>
    %89 = tpu.matmul %78, %88, %cst_25 {dimension_numbers = #tpu.dot_dimension_numbers<[1], [0], [0], [1], [0, 0, 1, 1], [], []>} : vector<8x32xf32>, vector<32x32xf32>, vector<8x32xf32> -> vector<8x32xf32>
    %c0_26 = arith.constant 0 : index
    %c0_27 = arith.constant 0 : index
    %c0_28 = arith.constant 0 : index
    %90 = vector.load %arg9[%c0_26, %c0_27, %c0_28] : memref<2x1x32xf32, #tpu.memory_space<vmem>>, vector<1x1x32xf32>
    %91 = vector.shape_cast %90 : vector<1x1x32xf32> to vector<1x32xf32>
    %92 = vector.broadcast %91 : vector<1x32xf32> to vector<8x32xf32>
    %93 = arith.addf %89, %92 : vector<8x32xf32>
    %94 = vector.extract_strided_slice %86 {offsets = [0, 0], sizes = [8, 32], strides = [1, 1]} : vector<8x64xf32> to vector<8x32xf32>
    %95 = vector.extract_strided_slice %86 {offsets = [0, 32], sizes = [8, 32], strides = [1, 1]} : vector<8x64xf32> to vector<8x32xf32>
    %c0_29 = arith.constant 0 : index
    %c0_30 = arith.constant 0 : index
    %c0_31 = arith.constant 0 : index
    %96 = vector.load %arg10[%c0_29, %c0_30, %c0_31] : memref<2x32x32xf32, #tpu.memory_space<vmem>>, vector<1x32x32xf32>
    %97 = vector.shape_cast %96 : vector<1x32x32xf32> to vector<32x32xf32>
    %c0_32 = arith.constant 0 : index
    %c0_33 = arith.constant 0 : index
    %c0_34 = arith.constant 0 : index
    %98 = vector.load %arg11[%c0_32, %c0_33, %c0_34] : memref<2x1x32xf32, #tpu.memory_space<vmem>>, vector<1x1x32xf32>
    %99 = vector.shape_cast %98 : vector<1x1x32xf32> to vector<1x32xf32>
    %cst_35 = arith.constant 0.000000e+00 : f32
    %100 = vector.broadcast %cst_35 : f32 to vector<8x32xf32>
    %101 = vector.extract_strided_slice %94 {offsets = [0, 0], sizes = [8, 8], strides = [1, 1]} : vector<8x32xf32> to vector<8x8xf32>
    %cst_36 = arith.constant 0.353553385 : f32
    %102 = vector.broadcast %cst_36 : f32 to vector<8x8xf32>
    %103 = arith.mulf %101, %102 : vector<8x8xf32>
    %104 = vector.extract_strided_slice %95 {offsets = [0, 0], sizes = [8, 8], strides = [1, 1]} : vector<8x32xf32> to vector<8x8xf32>
    %105 = vector.extract_strided_slice %93 {offsets = [0, 0], sizes = [8, 8], strides = [1, 1]} : vector<8x32xf32> to vector<8x8xf32>
    %cst_37 = arith.constant dense<0.000000e+00> : vector<8x8xf32>
    %106 = tpu.matmul %103, %104, %cst_37 {dimension_numbers = #tpu.dot_dimension_numbers<[1], [1], [0], [0], [0, 0, 1, 0], [], []>} : vector<8x8xf32>, vector<8x8xf32>, vector<8x8xf32> -> vector<8x8xf32>
    %cst_38 = arith.constant dense<0xFF800000> : vector<8xf32>
    %107 = vector.multi_reduction <maximumf>, %106, %cst_38 [1] : vector<8x8xf32> to vector<8xf32>
    %108 = vector.shape_cast %107 : vector<8xf32> to vector<8x1xf32>
    %109 = vector.broadcast %108 : vector<8x1xf32> to vector<8x8xf32>
    %110 = arith.subf %106, %109 : vector<8x8xf32>
    %111 = math.exp %110 : vector<8x8xf32>
    %cst_39 = arith.constant dense<0.000000e+00> : vector<8xf32>
    %112 = vector.multi_reduction <add>, %111, %cst_39 [1] : vector<8x8xf32> to vector<8xf32>
    %113 = vector.shape_cast %112 : vector<8xf32> to vector<8x1xf32>
    %114 = tpu.reciprocal %113 {approx = true} : vector<8x1xf32> -> vector<8x1xf32>
    %115 = vector.broadcast %114 : vector<8x1xf32> to vector<8x8xf32>
    %116 = arith.mulf %111, %115 : vector<8x8xf32>
    %cst_40 = arith.constant dense<0.000000e+00> : vector<8x8xf32>
    %117 = tpu.matmul %116, %105, %cst_40 {dimension_numbers = #tpu.dot_dimension_numbers<[1], [0], [0], [1], [0, 0, 1, 1], [], []>} : vector<8x8xf32>, vector<8x8xf32>, vector<8x8xf32> -> vector<8x8xf32>
    %118 = vector.extract_strided_slice %97 {offsets = [0, 0], sizes = [8, 32], strides = [1, 1]} : vector<32x32xf32> to vector<8x32xf32>
    %cst_41 = arith.constant dense<0.000000e+00> : vector<8x32xf32>
    %119 = tpu.matmul %117, %118, %cst_41 {dimension_numbers = #tpu.dot_dimension_numbers<[1], [0], [0], [1], [0, 0, 1, 1], [], []>} : vector<8x8xf32>, vector<8x32xf32>, vector<8x32xf32> -> vector<8x32xf32>
    %120 = arith.addf %100, %119 : vector<8x32xf32>
    %121 = vector.extract_strided_slice %94 {offsets = [0, 8], sizes = [8, 8], strides = [1, 1]} : vector<8x32xf32> to vector<8x8xf32>
    %cst_42 = arith.constant 0.353553385 : f32
    %122 = vector.broadcast %cst_42 : f32 to vector<8x8xf32>
    %123 = arith.mulf %121, %122 : vector<8x8xf32>
    %124 = vector.extract_strided_slice %95 {offsets = [0, 8], sizes = [8, 8], strides = [1, 1]} : vector<8x32xf32> to vector<8x8xf32>
    %125 = vector.extract_strided_slice %93 {offsets = [0, 8], sizes = [8, 8], strides = [1, 1]} : vector<8x32xf32> to vector<8x8xf32>
    %cst_43 = arith.constant dense<0.000000e+00> : vector<8x8xf32>
    %126 = tpu.matmul %123, %124, %cst_43 {dimension_numbers = #tpu.dot_dimension_numbers<[1], [1], [0], [0], [0, 0, 1, 0], [], []>} : vector<8x8xf32>, vector<8x8xf32>, vector<8x8xf32> -> vector<8x8xf32>
    %cst_44 = arith.constant dense<0xFF800000> : vector<8xf32>
    %127 = vector.multi_reduction <maximumf>, %126, %cst_44 [1] : vector<8x8xf32> to vector<8xf32>
    %128 = vector.shape_cast %127 : vector<8xf32> to vector<8x1xf32>
    %129 = vector.broadcast %128 : vector<8x1xf32> to vector<8x8xf32>
    %130 = arith.subf %126, %129 : vector<8x8xf32>
    %131 = math.exp %130 : vector<8x8xf32>
    %cst_45 = arith.constant dense<0.000000e+00> : vector<8xf32>
    %132 = vector.multi_reduction <add>, %131, %cst_45 [1] : vector<8x8xf32> to vector<8xf32>
    %133 = vector.shape_cast %132 : vector<8xf32> to vector<8x1xf32>
    %134 = tpu.reciprocal %133 {approx = true} : vector<8x1xf32> -> vector<8x1xf32>
    %135 = vector.broadcast %134 : vector<8x1xf32> to vector<8x8xf32>
    %136 = arith.mulf %131, %135 : vector<8x8xf32>
    %cst_46 = arith.constant dense<0.000000e+00> : vector<8x8xf32>
    %137 = tpu.matmul %136, %125, %cst_46 {dimension_numbers = #tpu.dot_dimension_numbers<[1], [0], [0], [1], [0, 0, 1, 1], [], []>} : vector<8x8xf32>, vector<8x8xf32>, vector<8x8xf32> -> vector<8x8xf32>
    %138 = vector.extract_strided_slice %97 {offsets = [8, 0], sizes = [8, 32], strides = [1, 1]} : vector<32x32xf32> to vector<8x32xf32>
    %cst_47 = arith.constant dense<0.000000e+00> : vector<8x32xf32>
    %139 = tpu.matmul %137, %138, %cst_47 {dimension_numbers = #tpu.dot_dimension_numbers<[1], [0], [0], [1], [0, 0, 1, 1], [], []>} : vector<8x8xf32>, vector<8x32xf32>, vector<8x32xf32> -> vector<8x32xf32>
    %140 = arith.addf %120, %139 : vector<8x32xf32>
    %141 = vector.extract_strided_slice %94 {offsets = [0, 16], sizes = [8, 8], strides = [1, 1]} : vector<8x32xf32> to vector<8x8xf32>
    %cst_48 = arith.constant 0.353553385 : f32
    %142 = vector.broadcast %cst_48 : f32 to vector<8x8xf32>
    %143 = arith.mulf %141, %142 : vector<8x8xf32>
    %144 = vector.extract_strided_slice %95 {offsets = [0, 16], sizes = [8, 8], strides = [1, 1]} : vector<8x32xf32> to vector<8x8xf32>
    %145 = vector.extract_strided_slice %93 {offsets = [0, 16], sizes = [8, 8], strides = [1, 1]} : vector<8x32xf32> to vector<8x8xf32>
    %cst_49 = arith.constant dense<0.000000e+00> : vector<8x8xf32>
    %146 = tpu.matmul %143, %144, %cst_49 {dimension_numbers = #tpu.dot_dimension_numbers<[1], [1], [0], [0], [0, 0, 1, 0], [], []>} : vector<8x8xf32>, vector<8x8xf32>, vector<8x8xf32> -> vector<8x8xf32>
    %cst_50 = arith.constant dense<0xFF800000> : vector<8xf32>
    %147 = vector.multi_reduction <maximumf>, %146, %cst_50 [1] : vector<8x8xf32> to vector<8xf32>
    %148 = vector.shape_cast %147 : vector<8xf32> to vector<8x1xf32>
    %149 = vector.broadcast %148 : vector<8x1xf32> to vector<8x8xf32>
    %150 = arith.subf %146, %149 : vector<8x8xf32>
    %151 = math.exp %150 : vector<8x8xf32>
    %cst_51 = arith.constant dense<0.000000e+00> : vector<8xf32>
    %152 = vector.multi_reduction <add>, %151, %cst_51 [1] : vector<8x8xf32> to vector<8xf32>
    %153 = vector.shape_cast %152 : vector<8xf32> to vector<8x1xf32>
    %154 = tpu.reciprocal %153 {approx = true} : vector<8x1xf32> -> vector<8x1xf32>
    %155 = vector.broadcast %154 : vector<8x1xf32> to vector<8x8xf32>
    %156 = arith.mulf %151, %155 : vector<8x8xf32>
    %cst_52 = arith.constant dense<0.000000e+00> : vector<8x8xf32>
    %157 = tpu.matmul %156, %145, %cst_52 {dimension_numbers = #tpu.dot_dimension_numbers<[1], [0], [0], [1], [0, 0, 1, 1], [], []>} : vector<8x8xf32>, vector<8x8xf32>, vector<8x8xf32> -> vector<8x8xf32>
    %158 = vector.extract_strided_slice %97 {offsets = [16, 0], sizes = [8, 32], strides = [1, 1]} : vector<32x32xf32> to vector<8x32xf32>
    %cst_53 = arith.constant dense<0.000000e+00> : vector<8x32xf32>
    %159 = tpu.matmul %157, %158, %cst_53 {dimension_numbers = #tpu.dot_dimension_numbers<[1], [0], [0], [1], [0, 0, 1, 1], [], []>} : vector<8x8xf32>, vector<8x32xf32>, vector<8x32xf32> -> vector<8x32xf32>
    %160 = arith.addf %140, %159 : vector<8x32xf32>
    %161 = vector.extract_strided_slice %94 {offsets = [0, 24], sizes = [8, 8], strides = [1, 1]} : vector<8x32xf32> to vector<8x8xf32>
    %cst_54 = arith.constant 0.353553385 : f32
    %162 = vector.broadcast %cst_54 : f32 to vector<8x8xf32>
    %163 = arith.mulf %161, %162 : vector<8x8xf32>
    %164 = vector.extract_strided_slice %95 {offsets = [0, 24], sizes = [8, 8], strides = [1, 1]} : vector<8x32xf32> to vector<8x8xf32>
    %165 = vector.extract_strided_slice %93 {offsets = [0, 24], sizes = [8, 8], strides = [1, 1]} : vector<8x32xf32> to vector<8x8xf32>
    %cst_55 = arith.constant dense<0.000000e+00> : vector<8x8xf32>
    %166 = tpu.matmul %163, %164, %cst_55 {dimension_numbers = #tpu.dot_dimension_numbers<[1], [1], [0], [0], [0, 0, 1, 0], [], []>} : vector<8x8xf32>, vector<8x8xf32>, vector<8x8xf32> -> vector<8x8xf32>
    %cst_56 = arith.constant dense<0xFF800000> : vector<8xf32>
    %167 = vector.multi_reduction <maximumf>, %166, %cst_56 [1] : vector<8x8xf32> to vector<8xf32>
    %168 = vector.shape_cast %167 : vector<8xf32> to vector<8x1xf32>
    %169 = vector.broadcast %168 : vector<8x1xf32> to vector<8x8xf32>
    %170 = arith.subf %166, %169 : vector<8x8xf32>
    %171 = math.exp %170 : vector<8x8xf32>
    %cst_57 = arith.constant dense<0.000000e+00> : vector<8xf32>
    %172 = vector.multi_reduction <add>, %171, %cst_57 [1] : vector<8x8xf32> to vector<8xf32>
    %173 = vector.shape_cast %172 : vector<8xf32> to vector<8x1xf32>
    %174 = tpu.reciprocal %173 {approx = true} : vector<8x1xf32> -> vector<8x1xf32>
    %175 = vector.broadcast %174 : vector<8x1xf32> to vector<8x8xf32>
    %176 = arith.mulf %171, %175 : vector<8x8xf32>
    %cst_58 = arith.constant dense<0.000000e+00> : vector<8x8xf32>
    %177 = tpu.matmul %176, %165, %cst_58 {dimension_numbers = #tpu.dot_dimension_numbers<[1], [0], [0], [1], [0, 0, 1, 1], [], []>} : vector<8x8xf32>, vector<8x8xf32>, vector<8x8xf32> -> vector<8x8xf32>
    %178 = vector.extract_strided_slice %97 {offsets = [24, 0], sizes = [8, 32], strides = [1, 1]} : vector<32x32xf32> to vector<8x32xf32>
    %cst_59 = arith.constant dense<0.000000e+00> : vector<8x32xf32>
    %179 = tpu.matmul %177, %178, %cst_59 {dimension_numbers = #tpu.dot_dimension_numbers<[1], [0], [0], [1], [0, 0, 1, 1], [], []>} : vector<8x8xf32>, vector<8x32xf32>, vector<8x32xf32> -> vector<8x32xf32>
    %180 = arith.addf %160, %179 : vector<8x32xf32>
    %181 = vector.broadcast %99 : vector<1x32xf32> to vector<8x32xf32>
    %182 = arith.addf %180, %181 : vector<8x32xf32>
    %183 = arith.addf %78, %182 : vector<8x32xf32>
    %c0_60 = arith.constant 0 : index
    %c0_61 = arith.constant 0 : index
    %c0_62 = arith.constant 0 : index
    %184 = vector.load %arg22[%c0_60, %c0_61, %c0_62] : memref<2x1x32xf32, #tpu.memory_space<vmem>>, vector<1x1x32xf32>
    %185 = vector.shape_cast %184 : vector<1x1x32xf32> to vector<1x32xf32>
    %c0_63 = arith.constant 0 : index
    %c0_64 = arith.constant 0 : index
    %c0_65 = arith.constant 0 : index
    %186 = vector.load %arg23[%c0_63, %c0_64, %c0_65] : memref<2x1x32xf32, #tpu.memory_space<vmem>>, vector<1x1x32xf32>
    %187 = vector.shape_cast %186 : vector<1x1x32xf32> to vector<1x32xf32>
    %cst_66 = arith.constant dense<0.000000e+00> : vector<8xf32>
    %188 = vector.multi_reduction <add>, %183, %cst_66 [1] : vector<8x32xf32> to vector<8xf32>
    %189 = vector.shape_cast %188 : vector<8xf32> to vector<8x1xf32>
    %cst_67 = arith.constant 3.200000e+01 : f32
    %190 = vector.broadcast %cst_67 : f32 to vector<8x1xf32>
    %191 = arith.divf %189, %190 : vector<8x1xf32>
    %192 = vector.broadcast %191 : vector<8x1xf32> to vector<8x32xf32>
    %193 = arith.subf %183, %192 : vector<8x32xf32>
    %194 = arith.mulf %193, %193 : vector<8x32xf32>
    %cst_68 = arith.constant dense<0.000000e+00> : vector<8xf32>
    %195 = vector.multi_reduction <add>, %194, %cst_68 [1] : vector<8x32xf32> to vector<8xf32>
    %196 = vector.shape_cast %195 : vector<8xf32> to vector<8x1xf32>
    %cst_69 = arith.constant 3.200000e+01 : f32
    %197 = vector.broadcast %cst_69 : f32 to vector<8x1xf32>
    %198 = arith.divf %196, %197 : vector<8x1xf32>
    %cst_70 = arith.constant 9.99999974E-6 : f32
    %199 = vector.broadcast %cst_70 : f32 to vector<8x1xf32>
    %200 = arith.addf %198, %199 : vector<8x1xf32>
    %201 = math.rsqrt %200 : vector<8x1xf32>
    %202 = vector.broadcast %201 : vector<8x1xf32> to vector<8x32xf32>
    %203 = arith.mulf %193, %202 : vector<8x32xf32>
    %204 = vector.broadcast %185 : vector<1x32xf32> to vector<8x32xf32>
    %205 = arith.mulf %203, %204 : vector<8x32xf32>
    %206 = vector.broadcast %187 : vector<1x32xf32> to vector<8x32xf32>
    %207 = arith.addf %205, %206 : vector<8x32xf32>
    %208 = arith.addf %207, %77 : vector<8x32xf32>
    %c0_71 = arith.constant 0 : index
    %c0_72 = arith.constant 0 : index
    %c0_73 = arith.constant 0 : index
    %209 = vector.load %arg12[%c0_71, %c0_72, %c0_73] : memref<2x32x32xf32, #tpu.memory_space<vmem>>, vector<1x32x32xf32>
    %210 = vector.shape_cast %209 : vector<1x32x32xf32> to vector<32x32xf32>
    %cst_74 = arith.constant dense<0.000000e+00> : vector<8x32xf32>
    %211 = tpu.matmul %208, %210, %cst_74 {dimension_numbers = #tpu.dot_dimension_numbers<[1], [0], [0], [1], [0, 0, 1, 1], [], []>} : vector<8x32xf32>, vector<32x32xf32>, vector<8x32xf32> -> vector<8x32xf32>
    %c0_75 = arith.constant 0 : index
    %c0_76 = arith.constant 0 : index
    %c0_77 = arith.constant 0 : index
    %212 = vector.load %arg13[%c0_75, %c0_76, %c0_77] : memref<2x1x32xf32, #tpu.memory_space<vmem>>, vector<1x1x32xf32>
    %213 = vector.shape_cast %212 : vector<1x1x32xf32> to vector<1x32xf32>
    %214 = vector.broadcast %213 : vector<1x32xf32> to vector<8x32xf32>
    %215 = arith.addf %211, %214 : vector<8x32xf32>
    %c0_78 = arith.constant 0 : index
    %c0_79 = arith.constant 0 : index
    %c0_80 = arith.constant 0 : index
    %216 = vector.load %arg14[%c0_78, %c0_79, %c0_80] : memref<2x32x64xf32, #tpu.memory_space<vmem>>, vector<1x32x64xf32>
    %217 = vector.shape_cast %216 : vector<1x32x64xf32> to vector<32x64xf32>
    %cst_81 = arith.constant dense<0.000000e+00> : vector<16x64xf32>
    %218 = tpu.matmul %76, %217, %cst_81 {dimension_numbers = #tpu.dot_dimension_numbers<[1], [0], [0], [1], [0, 0, 1, 1], [], []>} : vector<16x32xf32>, vector<32x64xf32>, vector<16x64xf32> -> vector<16x64xf32>
    %c0_82 = arith.constant 0 : index
    %c0_83 = arith.constant 0 : index
    %c0_84 = arith.constant 0 : index
    %219 = vector.load %arg15[%c0_82, %c0_83, %c0_84] : memref<2x1x64xf32, #tpu.memory_space<vmem>>, vector<1x1x64xf32>
    %220 = vector.shape_cast %219 : vector<1x1x64xf32> to vector<1x64xf32>
    %221 = vector.broadcast %220 : vector<1x64xf32> to vector<16x64xf32>
    %222 = arith.addf %218, %221 : vector<16x64xf32>
    %223 = vector.extract_strided_slice %222 {offsets = [0, 0], sizes = [16, 32], strides = [1, 1]} : vector<16x64xf32> to vector<16x32xf32>
    %224 = vector.extract_strided_slice %222 {offsets = [0, 32], sizes = [16, 32], strides = [1, 1]} : vector<16x64xf32> to vector<16x32xf32>
    %c0_85 = arith.constant 0 : index
    %c0_86 = arith.constant 0 : index
    %c0_87 = arith.constant 0 : index
    %225 = vector.load %arg16[%c0_85, %c0_86, %c0_87] : memref<2x32x32xf32, #tpu.memory_space<vmem>>, vector<1x32x32xf32>
    %226 = vector.shape_cast %225 : vector<1x32x32xf32> to vector<32x32xf32>
    %c0_88 = arith.constant 0 : index
    %c0_89 = arith.constant 0 : index
    %c0_90 = arith.constant 0 : index
    %227 = vector.load %arg17[%c0_88, %c0_89, %c0_90] : memref<2x1x32xf32, #tpu.memory_space<vmem>>, vector<1x1x32xf32>
    %228 = vector.shape_cast %227 : vector<1x1x32xf32> to vector<1x32xf32>
    %cst_91 = arith.constant 0.000000e+00 : f32
    %229 = vector.broadcast %cst_91 : f32 to vector<8x32xf32>
    %230 = vector.extract_strided_slice %215 {offsets = [0, 0], sizes = [8, 8], strides = [1, 1]} : vector<8x32xf32> to vector<8x8xf32>
    %cst_92 = arith.constant 0.353553385 : f32
    %231 = vector.broadcast %cst_92 : f32 to vector<8x8xf32>
    %232 = arith.mulf %230, %231 : vector<8x8xf32>
    %233 = vector.extract_strided_slice %223 {offsets = [0, 0], sizes = [16, 8], strides = [1, 1]} : vector<16x32xf32> to vector<16x8xf32>
    %234 = vector.extract_strided_slice %224 {offsets = [0, 0], sizes = [16, 8], strides = [1, 1]} : vector<16x32xf32> to vector<16x8xf32>
    %cst_93 = arith.constant dense<0.000000e+00> : vector<8x16xf32>
    %235 = tpu.matmul %232, %233, %cst_93 {dimension_numbers = #tpu.dot_dimension_numbers<[1], [1], [0], [0], [0, 0, 1, 0], [], []>} : vector<8x8xf32>, vector<16x8xf32>, vector<8x16xf32> -> vector<8x16xf32>
    %cst_94 = arith.constant dense<0xFF800000> : vector<8xf32>
    %236 = vector.multi_reduction <maximumf>, %235, %cst_94 [1] : vector<8x16xf32> to vector<8xf32>
    %237 = vector.shape_cast %236 : vector<8xf32> to vector<8x1xf32>
    %238 = vector.broadcast %237 : vector<8x1xf32> to vector<8x16xf32>
    %239 = arith.subf %235, %238 : vector<8x16xf32>
    %240 = math.exp %239 : vector<8x16xf32>
    %cst_95 = arith.constant dense<0.000000e+00> : vector<8xf32>
    %241 = vector.multi_reduction <add>, %240, %cst_95 [1] : vector<8x16xf32> to vector<8xf32>
    %242 = vector.shape_cast %241 : vector<8xf32> to vector<8x1xf32>
    %243 = tpu.reciprocal %242 {approx = true} : vector<8x1xf32> -> vector<8x1xf32>
    %244 = vector.broadcast %243 : vector<8x1xf32> to vector<8x16xf32>
    %245 = arith.mulf %240, %244 : vector<8x16xf32>
    %cst_96 = arith.constant dense<0.000000e+00> : vector<8x8xf32>
    %246 = tpu.matmul %245, %234, %cst_96 {dimension_numbers = #tpu.dot_dimension_numbers<[1], [0], [0], [1], [0, 0, 1, 1], [], []>} : vector<8x16xf32>, vector<16x8xf32>, vector<8x8xf32> -> vector<8x8xf32>
    %247 = vector.extract_strided_slice %226 {offsets = [0, 0], sizes = [8, 32], strides = [1, 1]} : vector<32x32xf32> to vector<8x32xf32>
    %cst_97 = arith.constant dense<0.000000e+00> : vector<8x32xf32>
    %248 = tpu.matmul %246, %247, %cst_97 {dimension_numbers = #tpu.dot_dimension_numbers<[1], [0], [0], [1], [0, 0, 1, 1], [], []>} : vector<8x8xf32>, vector<8x32xf32>, vector<8x32xf32> -> vector<8x32xf32>
    %249 = arith.addf %229, %248 : vector<8x32xf32>
    %250 = vector.extract_strided_slice %215 {offsets = [0, 8], sizes = [8, 8], strides = [1, 1]} : vector<8x32xf32> to vector<8x8xf32>
    %cst_98 = arith.constant 0.353553385 : f32
    %251 = vector.broadcast %cst_98 : f32 to vector<8x8xf32>
    %252 = arith.mulf %250, %251 : vector<8x8xf32>
    %253 = vector.extract_strided_slice %223 {offsets = [0, 8], sizes = [16, 8], strides = [1, 1]} : vector<16x32xf32> to vector<16x8xf32>
    %254 = vector.extract_strided_slice %224 {offsets = [0, 8], sizes = [16, 8], strides = [1, 1]} : vector<16x32xf32> to vector<16x8xf32>
    %cst_99 = arith.constant dense<0.000000e+00> : vector<8x16xf32>
    %255 = tpu.matmul %252, %253, %cst_99 {dimension_numbers = #tpu.dot_dimension_numbers<[1], [1], [0], [0], [0, 0, 1, 0], [], []>} : vector<8x8xf32>, vector<16x8xf32>, vector<8x16xf32> -> vector<8x16xf32>
    %cst_100 = arith.constant dense<0xFF800000> : vector<8xf32>
    %256 = vector.multi_reduction <maximumf>, %255, %cst_100 [1] : vector<8x16xf32> to vector<8xf32>
    %257 = vector.shape_cast %256 : vector<8xf32> to vector<8x1xf32>
    %258 = vector.broadcast %257 : vector<8x1xf32> to vector<8x16xf32>
    %259 = arith.subf %255, %258 : vector<8x16xf32>
    %260 = math.exp %259 : vector<8x16xf32>
    %cst_101 = arith.constant dense<0.000000e+00> : vector<8xf32>
    %261 = vector.multi_reduction <add>, %260, %cst_101 [1] : vector<8x16xf32> to vector<8xf32>
    %262 = vector.shape_cast %261 : vector<8xf32> to vector<8x1xf32>
    %263 = tpu.reciprocal %262 {approx = true} : vector<8x1xf32> -> vector<8x1xf32>
    %264 = vector.broadcast %263 : vector<8x1xf32> to vector<8x16xf32>
    %265 = arith.mulf %260, %264 : vector<8x16xf32>
    %cst_102 = arith.constant dense<0.000000e+00> : vector<8x8xf32>
    %266 = tpu.matmul %265, %254, %cst_102 {dimension_numbers = #tpu.dot_dimension_numbers<[1], [0], [0], [1], [0, 0, 1, 1], [], []>} : vector<8x16xf32>, vector<16x8xf32>, vector<8x8xf32> -> vector<8x8xf32>
    %267 = vector.extract_strided_slice %226 {offsets = [8, 0], sizes = [8, 32], strides = [1, 1]} : vector<32x32xf32> to vector<8x32xf32>
    %cst_103 = arith.constant dense<0.000000e+00> : vector<8x32xf32>
    %268 = tpu.matmul %266, %267, %cst_103 {dimension_numbers = #tpu.dot_dimension_numbers<[1], [0], [0], [1], [0, 0, 1, 1], [], []>} : vector<8x8xf32>, vector<8x32xf32>, vector<8x32xf32> -> vector<8x32xf32>
    %269 = arith.addf %249, %268 : vector<8x32xf32>
    %270 = vector.extract_strided_slice %215 {offsets = [0, 16], sizes = [8, 8], strides = [1, 1]} : vector<8x32xf32> to vector<8x8xf32>
    %cst_104 = arith.constant 0.353553385 : f32
    %271 = vector.broadcast %cst_104 : f32 to vector<8x8xf32>
    %272 = arith.mulf %270, %271 : vector<8x8xf32>
    %273 = vector.extract_strided_slice %223 {offsets = [0, 16], sizes = [16, 8], strides = [1, 1]} : vector<16x32xf32> to vector<16x8xf32>
    %274 = vector.extract_strided_slice %224 {offsets = [0, 16], sizes = [16, 8], strides = [1, 1]} : vector<16x32xf32> to vector<16x8xf32>
    %cst_105 = arith.constant dense<0.000000e+00> : vector<8x16xf32>
    %275 = tpu.matmul %272, %273, %cst_105 {dimension_numbers = #tpu.dot_dimension_numbers<[1], [1], [0], [0], [0, 0, 1, 0], [], []>} : vector<8x8xf32>, vector<16x8xf32>, vector<8x16xf32> -> vector<8x16xf32>
    %cst_106 = arith.constant dense<0xFF800000> : vector<8xf32>
    %276 = vector.multi_reduction <maximumf>, %275, %cst_106 [1] : vector<8x16xf32> to vector<8xf32>
    %277 = vector.shape_cast %276 : vector<8xf32> to vector<8x1xf32>
    %278 = vector.broadcast %277 : vector<8x1xf32> to vector<8x16xf32>
    %279 = arith.subf %275, %278 : vector<8x16xf32>
    %280 = math.exp %279 : vector<8x16xf32>
    %cst_107 = arith.constant dense<0.000000e+00> : vector<8xf32>
    %281 = vector.multi_reduction <add>, %280, %cst_107 [1] : vector<8x16xf32> to vector<8xf32>
    %282 = vector.shape_cast %281 : vector<8xf32> to vector<8x1xf32>
    %283 = tpu.reciprocal %282 {approx = true} : vector<8x1xf32> -> vector<8x1xf32>
    %284 = vector.broadcast %283 : vector<8x1xf32> to vector<8x16xf32>
    %285 = arith.mulf %280, %284 : vector<8x16xf32>
    %cst_108 = arith.constant dense<0.000000e+00> : vector<8x8xf32>
    %286 = tpu.matmul %285, %274, %cst_108 {dimension_numbers = #tpu.dot_dimension_numbers<[1], [0], [0], [1], [0, 0, 1, 1], [], []>} : vector<8x16xf32>, vector<16x8xf32>, vector<8x8xf32> -> vector<8x8xf32>
    %287 = vector.extract_strided_slice %226 {offsets = [16, 0], sizes = [8, 32], strides = [1, 1]} : vector<32x32xf32> to vector<8x32xf32>
    %cst_109 = arith.constant dense<0.000000e+00> : vector<8x32xf32>
    %288 = tpu.matmul %286, %287, %cst_109 {dimension_numbers = #tpu.dot_dimension_numbers<[1], [0], [0], [1], [0, 0, 1, 1], [], []>} : vector<8x8xf32>, vector<8x32xf32>, vector<8x32xf32> -> vector<8x32xf32>
    %289 = arith.addf %269, %288 : vector<8x32xf32>
    %290 = vector.extract_strided_slice %215 {offsets = [0, 24], sizes = [8, 8], strides = [1, 1]} : vector<8x32xf32> to vector<8x8xf32>
    %cst_110 = arith.constant 0.353553385 : f32
    %291 = vector.broadcast %cst_110 : f32 to vector<8x8xf32>
    %292 = arith.mulf %290, %291 : vector<8x8xf32>
    %293 = vector.extract_strided_slice %223 {offsets = [0, 24], sizes = [16, 8], strides = [1, 1]} : vector<16x32xf32> to vector<16x8xf32>
    %294 = vector.extract_strided_slice %224 {offsets = [0, 24], sizes = [16, 8], strides = [1, 1]} : vector<16x32xf32> to vector<16x8xf32>
    %cst_111 = arith.constant dense<0.000000e+00> : vector<8x16xf32>
    %295 = tpu.matmul %292, %293, %cst_111 {dimension_numbers = #tpu.dot_dimension_numbers<[1], [1], [0], [0], [0, 0, 1, 0], [], []>} : vector<8x8xf32>, vector<16x8xf32>, vector<8x16xf32> -> vector<8x16xf32>
    %cst_112 = arith.constant dense<0xFF800000> : vector<8xf32>
    %296 = vector.multi_reduction <maximumf>, %295, %cst_112 [1] : vector<8x16xf32> to vector<8xf32>
    %297 = vector.shape_cast %296 : vector<8xf32> to vector<8x1xf32>
    %298 = vector.broadcast %297 : vector<8x1xf32> to vector<8x16xf32>
    %299 = arith.subf %295, %298 : vector<8x16xf32>
    %300 = math.exp %299 : vector<8x16xf32>
    %cst_113 = arith.constant dense<0.000000e+00> : vector<8xf32>
    %301 = vector.multi_reduction <add>, %300, %cst_113 [1] : vector<8x16xf32> to vector<8xf32>
    %302 = vector.shape_cast %301 : vector<8xf32> to vector<8x1xf32>
    %303 = tpu.reciprocal %302 {approx = true} : vector<8x1xf32> -> vector<8x1xf32>
    %304 = vector.broadcast %303 : vector<8x1xf32> to vector<8x16xf32>
    %305 = arith.mulf %300, %304 : vector<8x16xf32>
    %cst_114 = arith.constant dense<0.000000e+00> : vector<8x8xf32>
    %306 = tpu.matmul %305, %294, %cst_114 {dimension_numbers = #tpu.dot_dimension_numbers<[1], [0], [0], [1], [0, 0, 1, 1], [], []>} : vector<8x16xf32>, vector<16x8xf32>, vector<8x8xf32> -> vector<8x8xf32>
    %307 = vector.extract_strided_slice %226 {offsets = [24, 0], sizes = [8, 32], strides = [1, 1]} : vector<32x32xf32> to vector<8x32xf32>
    %cst_115 = arith.constant dense<0.000000e+00> : vector<8x32xf32>
    %308 = tpu.matmul %306, %307, %cst_115 {dimension_numbers = #tpu.dot_dimension_numbers<[1], [0], [0], [1], [0, 0, 1, 1], [], []>} : vector<8x8xf32>, vector<8x32xf32>, vector<8x32xf32> -> vector<8x32xf32>
    %309 = arith.addf %289, %308 : vector<8x32xf32>
    %310 = vector.broadcast %228 : vector<1x32xf32> to vector<8x32xf32>
    %311 = arith.addf %309, %310 : vector<8x32xf32>
    %312 = arith.addf %207, %311 : vector<8x32xf32>
    %c0_116 = arith.constant 0 : index
    %c0_117 = arith.constant 0 : index
    %c0_118 = arith.constant 0 : index
    %313 = vector.load %arg24[%c0_116, %c0_117, %c0_118] : memref<2x1x32xf32, #tpu.memory_space<vmem>>, vector<1x1x32xf32>
    %314 = vector.shape_cast %313 : vector<1x1x32xf32> to vector<1x32xf32>
    %c0_119 = arith.constant 0 : index
    %c0_120 = arith.constant 0 : index
    %c0_121 = arith.constant 0 : index
    %315 = vector.load %arg25[%c0_119, %c0_120, %c0_121] : memref<2x1x32xf32, #tpu.memory_space<vmem>>, vector<1x1x32xf32>
    %316 = vector.shape_cast %315 : vector<1x1x32xf32> to vector<1x32xf32>
    %cst_122 = arith.constant dense<0.000000e+00> : vector<8xf32>
    %317 = vector.multi_reduction <add>, %312, %cst_122 [1] : vector<8x32xf32> to vector<8xf32>
    %318 = vector.shape_cast %317 : vector<8xf32> to vector<8x1xf32>
    %cst_123 = arith.constant 3.200000e+01 : f32
    %319 = vector.broadcast %cst_123 : f32 to vector<8x1xf32>
    %320 = arith.divf %318, %319 : vector<8x1xf32>
    %321 = vector.broadcast %320 : vector<8x1xf32> to vector<8x32xf32>
    %322 = arith.subf %312, %321 : vector<8x32xf32>
    %323 = arith.mulf %322, %322 : vector<8x32xf32>
    %cst_124 = arith.constant dense<0.000000e+00> : vector<8xf32>
    %324 = vector.multi_reduction <add>, %323, %cst_124 [1] : vector<8x32xf32> to vector<8xf32>
    %325 = vector.shape_cast %324 : vector<8xf32> to vector<8x1xf32>
    %cst_125 = arith.constant 3.200000e+01 : f32
    %326 = vector.broadcast %cst_125 : f32 to vector<8x1xf32>
    %327 = arith.divf %325, %326 : vector<8x1xf32>
    %cst_126 = arith.constant 9.99999974E-6 : f32
    %328 = vector.broadcast %cst_126 : f32 to vector<8x1xf32>
    %329 = arith.addf %327, %328 : vector<8x1xf32>
    %330 = math.rsqrt %329 : vector<8x1xf32>
    %331 = vector.broadcast %330 : vector<8x1xf32> to vector<8x32xf32>
    %332 = arith.mulf %322, %331 : vector<8x32xf32>
    %333 = vector.broadcast %314 : vector<1x32xf32> to vector<8x32xf32>
    %334 = arith.mulf %332, %333 : vector<8x32xf32>
    %335 = vector.broadcast %316 : vector<1x32xf32> to vector<8x32xf32>
    %336 = arith.addf %334, %335 : vector<8x32xf32>
    %c0_127 = arith.constant 0 : index
    %c0_128 = arith.constant 0 : index
    %c0_129 = arith.constant 0 : index
    %337 = vector.load %arg18[%c0_127, %c0_128, %c0_129] : memref<2x32x64xf32, #tpu.memory_space<vmem>>, vector<1x32x64xf32>
    %338 = vector.shape_cast %337 : vector<1x32x64xf32> to vector<32x64xf32>
    %cst_130 = arith.constant dense<0.000000e+00> : vector<8x64xf32>
    %339 = tpu.matmul %336, %338, %cst_130 {dimension_numbers = #tpu.dot_dimension_numbers<[1], [0], [0], [1], [0, 0, 1, 1], [], []>} : vector<8x32xf32>, vector<32x64xf32>, vector<8x64xf32> -> vector<8x64xf32>
    %c0_131 = arith.constant 0 : index
    %c0_132 = arith.constant 0 : index
    %c0_133 = arith.constant 0 : index
    %340 = vector.load %arg19[%c0_131, %c0_132, %c0_133] : memref<2x1x64xf32, #tpu.memory_space<vmem>>, vector<1x1x64xf32>
    %341 = vector.shape_cast %340 : vector<1x1x64xf32> to vector<1x64xf32>
    %342 = vector.broadcast %341 : vector<1x64xf32> to vector<8x64xf32>
    %343 = arith.addf %339, %342 : vector<8x64xf32>
    %cst_134 = arith.constant 0.000000e+00 : f32
    %344 = vector.broadcast %cst_134 : f32 to vector<8x64xf32>
    %345 = arith.maximumf %343, %344 : vector<8x64xf32>
    %c0_135 = arith.constant 0 : index
    %c0_136 = arith.constant 0 : index
    %c0_137 = arith.constant 0 : index
    %346 = vector.load %arg20[%c0_135, %c0_136, %c0_137] : memref<2x64x32xf32, #tpu.memory_space<vmem>>, vector<1x64x32xf32>
    %347 = vector.shape_cast %346 : vector<1x64x32xf32> to vector<64x32xf32>
    %cst_138 = arith.constant dense<0.000000e+00> : vector<8x32xf32>
    %348 = tpu.matmul %345, %347, %cst_138 {dimension_numbers = #tpu.dot_dimension_numbers<[1], [0], [0], [1], [0, 0, 1, 1], [], []>} : vector<8x64xf32>, vector<64x32xf32>, vector<8x32xf32> -> vector<8x32xf32>
    %c0_139 = arith.constant 0 : index
    %c0_140 = arith.constant 0 : index
    %c0_141 = arith.constant 0 : index
    %349 = vector.load %arg21[%c0_139, %c0_140, %c0_141] : memref<2x1x32xf32, #tpu.memory_space<vmem>>, vector<1x1x32xf32>
    %350 = vector.shape_cast %349 : vector<1x1x32xf32> to vector<1x32xf32>
    %351 = vector.broadcast %350 : vector<1x32xf32> to vector<8x32xf32>
    %352 = arith.addf %348, %351 : vector<8x32xf32>
    %353 = arith.addf %336, %352 : vector<8x32xf32>
    %c0_142 = arith.constant 0 : index
    %c0_143 = arith.constant 0 : index
    %c0_144 = arith.constant 0 : index
    %354 = vector.load %arg26[%c0_142, %c0_143, %c0_144] : memref<2x1x32xf32, #tpu.memory_space<vmem>>, vector<1x1x32xf32>
    %355 = vector.shape_cast %354 : vector<1x1x32xf32> to vector<1x32xf32>
    %c0_145 = arith.constant 0 : index
    %c0_146 = arith.constant 0 : index
    %c0_147 = arith.constant 0 : index
    %356 = vector.load %arg27[%c0_145, %c0_146, %c0_147] : memref<2x1x32xf32, #tpu.memory_space<vmem>>, vector<1x1x32xf32>
    %357 = vector.shape_cast %356 : vector<1x1x32xf32> to vector<1x32xf32>
    %cst_148 = arith.constant dense<0.000000e+00> : vector<8xf32>
    %358 = vector.multi_reduction <add>, %353, %cst_148 [1] : vector<8x32xf32> to vector<8xf32>
    %359 = vector.shape_cast %358 : vector<8xf32> to vector<8x1xf32>
    %cst_149 = arith.constant 3.200000e+01 : f32
    %360 = vector.broadcast %cst_149 : f32 to vector<8x1xf32>
    %361 = arith.divf %359, %360 : vector<8x1xf32>
    %362 = vector.broadcast %361 : vector<8x1xf32> to vector<8x32xf32>
    %363 = arith.subf %353, %362 : vector<8x32xf32>
    %364 = arith.mulf %363, %363 : vector<8x32xf32>
    %cst_150 = arith.constant dense<0.000000e+00> : vector<8xf32>
    %365 = vector.multi_reduction <add>, %364, %cst_150 [1] : vector<8x32xf32> to vector<8xf32>
    %366 = vector.shape_cast %365 : vector<8xf32> to vector<8x1xf32>
    %cst_151 = arith.constant 3.200000e+01 : f32
    %367 = vector.broadcast %cst_151 : f32 to vector<8x1xf32>
    %368 = arith.divf %366, %367 : vector<8x1xf32>
    %cst_152 = arith.constant 9.99999974E-6 : f32
    %369 = vector.broadcast %cst_152 : f32 to vector<8x1xf32>
    %370 = arith.addf %368, %369 : vector<8x1xf32>
    %371 = math.rsqrt %370 : vector<8x1xf32>
    %372 = vector.broadcast %371 : vector<8x1xf32> to vector<8x32xf32>
    %373 = arith.mulf %363, %372 : vector<8x32xf32>
    %374 = vector.broadcast %355 : vector<1x32xf32> to vector<8x32xf32>
    %375 = arith.mulf %373, %374 : vector<8x32xf32>
    %376 = vector.broadcast %357 : vector<1x32xf32> to vector<8x32xf32>
    %377 = arith.addf %375, %376 : vector<8x32xf32>
    %378 = arith.addf %377, %77 : vector<8x32xf32>
    %c1_153 = arith.constant 1 : index
    %c0_154 = arith.constant 0 : index
    %c0_155 = arith.constant 0 : index
    %379 = vector.load %arg6[%c1_153, %c0_154, %c0_155] : memref<2x32x64xf32, #tpu.memory_space<vmem>>, vector<1x32x64xf32>
    %380 = vector.shape_cast %379 : vector<1x32x64xf32> to vector<32x64xf32>
    %cst_156 = arith.constant dense<0.000000e+00> : vector<8x64xf32>
    %381 = tpu.matmul %378, %380, %cst_156 {dimension_numbers = #tpu.dot_dimension_numbers<[1], [0], [0], [1], [0, 0, 1, 1], [], []>} : vector<8x32xf32>, vector<32x64xf32>, vector<8x64xf32> -> vector<8x64xf32>
    %c1_157 = arith.constant 1 : index
    %c0_158 = arith.constant 0 : index
    %c0_159 = arith.constant 0 : index
    %382 = vector.load %arg7[%c1_157, %c0_158, %c0_159] : memref<2x1x64xf32, #tpu.memory_space<vmem>>, vector<1x1x64xf32>
    %383 = vector.shape_cast %382 : vector<1x1x64xf32> to vector<1x64xf32>
    %384 = vector.broadcast %383 : vector<1x64xf32> to vector<8x64xf32>
    %385 = arith.addf %381, %384 : vector<8x64xf32>
    %c1_160 = arith.constant 1 : index
    %c0_161 = arith.constant 0 : index
    %c0_162 = arith.constant 0 : index
    %386 = vector.load %arg8[%c1_160, %c0_161, %c0_162] : memref<2x32x32xf32, #tpu.memory_space<vmem>>, vector<1x32x32xf32>
    %387 = vector.shape_cast %386 : vector<1x32x32xf32> to vector<32x32xf32>
    %cst_163 = arith.constant dense<0.000000e+00> : vector<8x32xf32>
    %388 = tpu.matmul %377, %387, %cst_163 {dimension_numbers = #tpu.dot_dimension_numbers<[1], [0], [0], [1], [0, 0, 1, 1], [], []>} : vector<8x32xf32>, vector<32x32xf32>, vector<8x32xf32> -> vector<8x32xf32>
    %c1_164 = arith.constant 1 : index
    %c0_165 = arith.constant 0 : index
    %c0_166 = arith.constant 0 : index
    %389 = vector.load %arg9[%c1_164, %c0_165, %c0_166] : memref<2x1x32xf32, #tpu.memory_space<vmem>>, vector<1x1x32xf32>
    %390 = vector.shape_cast %389 : vector<1x1x32xf32> to vector<1x32xf32>
    %391 = vector.broadcast %390 : vector<1x32xf32> to vector<8x32xf32>
    %392 = arith.addf %388, %391 : vector<8x32xf32>
    %393 = vector.extract_strided_slice %385 {offsets = [0, 0], sizes = [8, 32], strides = [1, 1]} : vector<8x64xf32> to vector<8x32xf32>
    %394 = vector.extract_strided_slice %385 {offsets = [0, 32], sizes = [8, 32], strides = [1, 1]} : vector<8x64xf32> to vector<8x32xf32>
    %c1_167 = arith.constant 1 : index
    %c0_168 = arith.constant 0 : index
    %c0_169 = arith.constant 0 : index
    %395 = vector.load %arg10[%c1_167, %c0_168, %c0_169] : memref<2x32x32xf32, #tpu.memory_space<vmem>>, vector<1x32x32xf32>
    %396 = vector.shape_cast %395 : vector<1x32x32xf32> to vector<32x32xf32>
    %c1_170 = arith.constant 1 : index
    %c0_171 = arith.constant 0 : index
    %c0_172 = arith.constant 0 : index
    %397 = vector.load %arg11[%c1_170, %c0_171, %c0_172] : memref<2x1x32xf32, #tpu.memory_space<vmem>>, vector<1x1x32xf32>
    %398 = vector.shape_cast %397 : vector<1x1x32xf32> to vector<1x32xf32>
    %cst_173 = arith.constant 0.000000e+00 : f32
    %399 = vector.broadcast %cst_173 : f32 to vector<8x32xf32>
    %400 = vector.extract_strided_slice %393 {offsets = [0, 0], sizes = [8, 8], strides = [1, 1]} : vector<8x32xf32> to vector<8x8xf32>
    %cst_174 = arith.constant 0.353553385 : f32
    %401 = vector.broadcast %cst_174 : f32 to vector<8x8xf32>
    %402 = arith.mulf %400, %401 : vector<8x8xf32>
    %403 = vector.extract_strided_slice %394 {offsets = [0, 0], sizes = [8, 8], strides = [1, 1]} : vector<8x32xf32> to vector<8x8xf32>
    %404 = vector.extract_strided_slice %392 {offsets = [0, 0], sizes = [8, 8], strides = [1, 1]} : vector<8x32xf32> to vector<8x8xf32>
    %cst_175 = arith.constant dense<0.000000e+00> : vector<8x8xf32>
    %405 = tpu.matmul %402, %403, %cst_175 {dimension_numbers = #tpu.dot_dimension_numbers<[1], [1], [0], [0], [0, 0, 1, 0], [], []>} : vector<8x8xf32>, vector<8x8xf32>, vector<8x8xf32> -> vector<8x8xf32>
    %cst_176 = arith.constant dense<0xFF800000> : vector<8xf32>
    %406 = vector.multi_reduction <maximumf>, %405, %cst_176 [1] : vector<8x8xf32> to vector<8xf32>
    %407 = vector.shape_cast %406 : vector<8xf32> to vector<8x1xf32>
    %408 = vector.broadcast %407 : vector<8x1xf32> to vector<8x8xf32>
    %409 = arith.subf %405, %408 : vector<8x8xf32>
    %410 = math.exp %409 : vector<8x8xf32>
    %cst_177 = arith.constant dense<0.000000e+00> : vector<8xf32>
    %411 = vector.multi_reduction <add>, %410, %cst_177 [1] : vector<8x8xf32> to vector<8xf32>
    %412 = vector.shape_cast %411 : vector<8xf32> to vector<8x1xf32>
    %413 = tpu.reciprocal %412 {approx = true} : vector<8x1xf32> -> vector<8x1xf32>
    %414 = vector.broadcast %413 : vector<8x1xf32> to vector<8x8xf32>
    %415 = arith.mulf %410, %414 : vector<8x8xf32>
    %cst_178 = arith.constant dense<0.000000e+00> : vector<8x8xf32>
    %416 = tpu.matmul %415, %404, %cst_178 {dimension_numbers = #tpu.dot_dimension_numbers<[1], [0], [0], [1], [0, 0, 1, 1], [], []>} : vector<8x8xf32>, vector<8x8xf32>, vector<8x8xf32> -> vector<8x8xf32>
    %417 = vector.extract_strided_slice %396 {offsets = [0, 0], sizes = [8, 32], strides = [1, 1]} : vector<32x32xf32> to vector<8x32xf32>
    %cst_179 = arith.constant dense<0.000000e+00> : vector<8x32xf32>
    %418 = tpu.matmul %416, %417, %cst_179 {dimension_numbers = #tpu.dot_dimension_numbers<[1], [0], [0], [1], [0, 0, 1, 1], [], []>} : vector<8x8xf32>, vector<8x32xf32>, vector<8x32xf32> -> vector<8x32xf32>
    %419 = arith.addf %399, %418 : vector<8x32xf32>
    %420 = vector.extract_strided_slice %393 {offsets = [0, 8], sizes = [8, 8], strides = [1, 1]} : vector<8x32xf32> to vector<8x8xf32>
    %cst_180 = arith.constant 0.353553385 : f32
    %421 = vector.broadcast %cst_180 : f32 to vector<8x8xf32>
    %422 = arith.mulf %420, %421 : vector<8x8xf32>
    %423 = vector.extract_strided_slice %394 {offsets = [0, 8], sizes = [8, 8], strides = [1, 1]} : vector<8x32xf32> to vector<8x8xf32>
    %424 = vector.extract_strided_slice %392 {offsets = [0, 8], sizes = [8, 8], strides = [1, 1]} : vector<8x32xf32> to vector<8x8xf32>
    %cst_181 = arith.constant dense<0.000000e+00> : vector<8x8xf32>
    %425 = tpu.matmul %422, %423, %cst_181 {dimension_numbers = #tpu.dot_dimension_numbers<[1], [1], [0], [0], [0, 0, 1, 0], [], []>} : vector<8x8xf32>, vector<8x8xf32>, vector<8x8xf32> -> vector<8x8xf32>
    %cst_182 = arith.constant dense<0xFF800000> : vector<8xf32>
    %426 = vector.multi_reduction <maximumf>, %425, %cst_182 [1] : vector<8x8xf32> to vector<8xf32>
    %427 = vector.shape_cast %426 : vector<8xf32> to vector<8x1xf32>
    %428 = vector.broadcast %427 : vector<8x1xf32> to vector<8x8xf32>
    %429 = arith.subf %425, %428 : vector<8x8xf32>
    %430 = math.exp %429 : vector<8x8xf32>
    %cst_183 = arith.constant dense<0.000000e+00> : vector<8xf32>
    %431 = vector.multi_reduction <add>, %430, %cst_183 [1] : vector<8x8xf32> to vector<8xf32>
    %432 = vector.shape_cast %431 : vector<8xf32> to vector<8x1xf32>
    %433 = tpu.reciprocal %432 {approx = true} : vector<8x1xf32> -> vector<8x1xf32>
    %434 = vector.broadcast %433 : vector<8x1xf32> to vector<8x8xf32>
    %435 = arith.mulf %430, %434 : vector<8x8xf32>
    %cst_184 = arith.constant dense<0.000000e+00> : vector<8x8xf32>
    %436 = tpu.matmul %435, %424, %cst_184 {dimension_numbers = #tpu.dot_dimension_numbers<[1], [0], [0], [1], [0, 0, 1, 1], [], []>} : vector<8x8xf32>, vector<8x8xf32>, vector<8x8xf32> -> vector<8x8xf32>
    %437 = vector.extract_strided_slice %396 {offsets = [8, 0], sizes = [8, 32], strides = [1, 1]} : vector<32x32xf32> to vector<8x32xf32>
    %cst_185 = arith.constant dense<0.000000e+00> : vector<8x32xf32>
    %438 = tpu.matmul %436, %437, %cst_185 {dimension_numbers = #tpu.dot_dimension_numbers<[1], [0], [0], [1], [0, 0, 1, 1], [], []>} : vector<8x8xf32>, vector<8x32xf32>, vector<8x32xf32> -> vector<8x32xf32>
    %439 = arith.addf %419, %438 : vector<8x32xf32>
    %440 = vector.extract_strided_slice %393 {offsets = [0, 16], sizes = [8, 8], strides = [1, 1]} : vector<8x32xf32> to vector<8x8xf32>
    %cst_186 = arith.constant 0.353553385 : f32
    %441 = vector.broadcast %cst_186 : f32 to vector<8x8xf32>
    %442 = arith.mulf %440, %441 : vector<8x8xf32>
    %443 = vector.extract_strided_slice %394 {offsets = [0, 16], sizes = [8, 8], strides = [1, 1]} : vector<8x32xf32> to vector<8x8xf32>
    %444 = vector.extract_strided_slice %392 {offsets = [0, 16], sizes = [8, 8], strides = [1, 1]} : vector<8x32xf32> to vector<8x8xf32>
    %cst_187 = arith.constant dense<0.000000e+00> : vector<8x8xf32>
    %445 = tpu.matmul %442, %443, %cst_187 {dimension_numbers = #tpu.dot_dimension_numbers<[1], [1], [0], [0], [0, 0, 1, 0], [], []>} : vector<8x8xf32>, vector<8x8xf32>, vector<8x8xf32> -> vector<8x8xf32>
    %cst_188 = arith.constant dense<0xFF800000> : vector<8xf32>
    %446 = vector.multi_reduction <maximumf>, %445, %cst_188 [1] : vector<8x8xf32> to vector<8xf32>
    %447 = vector.shape_cast %446 : vector<8xf32> to vector<8x1xf32>
    %448 = vector.broadcast %447 : vector<8x1xf32> to vector<8x8xf32>
    %449 = arith.subf %445, %448 : vector<8x8xf32>
    %450 = math.exp %449 : vector<8x8xf32>
    %cst_189 = arith.constant dense<0.000000e+00> : vector<8xf32>
    %451 = vector.multi_reduction <add>, %450, %cst_189 [1] : vector<8x8xf32> to vector<8xf32>
    %452 = vector.shape_cast %451 : vector<8xf32> to vector<8x1xf32>
    %453 = tpu.reciprocal %452 {approx = true} : vector<8x1xf32> -> vector<8x1xf32>
    %454 = vector.broadcast %453 : vector<8x1xf32> to vector<8x8xf32>
    %455 = arith.mulf %450, %454 : vector<8x8xf32>
    %cst_190 = arith.constant dense<0.000000e+00> : vector<8x8xf32>
    %456 = tpu.matmul %455, %444, %cst_190 {dimension_numbers = #tpu.dot_dimension_numbers<[1], [0], [0], [1], [0, 0, 1, 1], [], []>} : vector<8x8xf32>, vector<8x8xf32>, vector<8x8xf32> -> vector<8x8xf32>
    %457 = vector.extract_strided_slice %396 {offsets = [16, 0], sizes = [8, 32], strides = [1, 1]} : vector<32x32xf32> to vector<8x32xf32>
    %cst_191 = arith.constant dense<0.000000e+00> : vector<8x32xf32>
    %458 = tpu.matmul %456, %457, %cst_191 {dimension_numbers = #tpu.dot_dimension_numbers<[1], [0], [0], [1], [0, 0, 1, 1], [], []>} : vector<8x8xf32>, vector<8x32xf32>, vector<8x32xf32> -> vector<8x32xf32>
    %459 = arith.addf %439, %458 : vector<8x32xf32>
    %460 = vector.extract_strided_slice %393 {offsets = [0, 24], sizes = [8, 8], strides = [1, 1]} : vector<8x32xf32> to vector<8x8xf32>
    %cst_192 = arith.constant 0.353553385 : f32
    %461 = vector.broadcast %cst_192 : f32 to vector<8x8xf32>
    %462 = arith.mulf %460, %461 : vector<8x8xf32>
    %463 = vector.extract_strided_slice %394 {offsets = [0, 24], sizes = [8, 8], strides = [1, 1]} : vector<8x32xf32> to vector<8x8xf32>
    %464 = vector.extract_strided_slice %392 {offsets = [0, 24], sizes = [8, 8], strides = [1, 1]} : vector<8x32xf32> to vector<8x8xf32>
    %cst_193 = arith.constant dense<0.000000e+00> : vector<8x8xf32>
    %465 = tpu.matmul %462, %463, %cst_193 {dimension_numbers = #tpu.dot_dimension_numbers<[1], [1], [0], [0], [0, 0, 1, 0], [], []>} : vector<8x8xf32>, vector<8x8xf32>, vector<8x8xf32> -> vector<8x8xf32>
    %cst_194 = arith.constant dense<0xFF800000> : vector<8xf32>
    %466 = vector.multi_reduction <maximumf>, %465, %cst_194 [1] : vector<8x8xf32> to vector<8xf32>
    %467 = vector.shape_cast %466 : vector<8xf32> to vector<8x1xf32>
    %468 = vector.broadcast %467 : vector<8x1xf32> to vector<8x8xf32>
    %469 = arith.subf %465, %468 : vector<8x8xf32>
    %470 = math.exp %469 : vector<8x8xf32>
    %cst_195 = arith.constant dense<0.000000e+00> : vector<8xf32>
    %471 = vector.multi_reduction <add>, %470, %cst_195 [1] : vector<8x8xf32> to vector<8xf32>
    %472 = vector.shape_cast %471 : vector<8xf32> to vector<8x1xf32>
    %473 = tpu.reciprocal %472 {approx = true} : vector<8x1xf32> -> vector<8x1xf32>
    %474 = vector.broadcast %473 : vector<8x1xf32> to vector<8x8xf32>
    %475 = arith.mulf %470, %474 : vector<8x8xf32>
    %cst_196 = arith.constant dense<0.000000e+00> : vector<8x8xf32>
    %476 = tpu.matmul %475, %464, %cst_196 {dimension_numbers = #tpu.dot_dimension_numbers<[1], [0], [0], [1], [0, 0, 1, 1], [], []>} : vector<8x8xf32>, vector<8x8xf32>, vector<8x8xf32> -> vector<8x8xf32>
    %477 = vector.extract_strided_slice %396 {offsets = [24, 0], sizes = [8, 32], strides = [1, 1]} : vector<32x32xf32> to vector<8x32xf32>
    %cst_197 = arith.constant dense<0.000000e+00> : vector<8x32xf32>
    %478 = tpu.matmul %476, %477, %cst_197 {dimension_numbers = #tpu.dot_dimension_numbers<[1], [0], [0], [1], [0, 0, 1, 1], [], []>} : vector<8x8xf32>, vector<8x32xf32>, vector<8x32xf32> -> vector<8x32xf32>
    %479 = arith.addf %459, %478 : vector<8x32xf32>
    %480 = vector.broadcast %398 : vector<1x32xf32> to vector<8x32xf32>
    %481 = arith.addf %479, %480 : vector<8x32xf32>
    %482 = arith.addf %377, %481 : vector<8x32xf32>
    %c1_198 = arith.constant 1 : index
    %c0_199 = arith.constant 0 : index
    %c0_200 = arith.constant 0 : index
    %483 = vector.load %arg22[%c1_198, %c0_199, %c0_200] : memref<2x1x32xf32, #tpu.memory_space<vmem>>, vector<1x1x32xf32>
    %484 = vector.shape_cast %483 : vector<1x1x32xf32> to vector<1x32xf32>
    %c1_201 = arith.constant 1 : index
    %c0_202 = arith.constant 0 : index
    %c0_203 = arith.constant 0 : index
    %485 = vector.load %arg23[%c1_201, %c0_202, %c0_203] : memref<2x1x32xf32, #tpu.memory_space<vmem>>, vector<1x1x32xf32>
    %486 = vector.shape_cast %485 : vector<1x1x32xf32> to vector<1x32xf32>
    %cst_204 = arith.constant dense<0.000000e+00> : vector<8xf32>
    %487 = vector.multi_reduction <add>, %482, %cst_204 [1] : vector<8x32xf32> to vector<8xf32>
    %488 = vector.shape_cast %487 : vector<8xf32> to vector<8x1xf32>
    %cst_205 = arith.constant 3.200000e+01 : f32
    %489 = vector.broadcast %cst_205 : f32 to vector<8x1xf32>
    %490 = arith.divf %488, %489 : vector<8x1xf32>
    %491 = vector.broadcast %490 : vector<8x1xf32> to vector<8x32xf32>
    %492 = arith.subf %482, %491 : vector<8x32xf32>
    %493 = arith.mulf %492, %492 : vector<8x32xf32>
    %cst_206 = arith.constant dense<0.000000e+00> : vector<8xf32>
    %494 = vector.multi_reduction <add>, %493, %cst_206 [1] : vector<8x32xf32> to vector<8xf32>
    %495 = vector.shape_cast %494 : vector<8xf32> to vector<8x1xf32>
    %cst_207 = arith.constant 3.200000e+01 : f32
    %496 = vector.broadcast %cst_207 : f32 to vector<8x1xf32>
    %497 = arith.divf %495, %496 : vector<8x1xf32>
    %cst_208 = arith.constant 9.99999974E-6 : f32
    %498 = vector.broadcast %cst_208 : f32 to vector<8x1xf32>
    %499 = arith.addf %497, %498 : vector<8x1xf32>
    %500 = math.rsqrt %499 : vector<8x1xf32>
    %501 = vector.broadcast %500 : vector<8x1xf32> to vector<8x32xf32>
    %502 = arith.mulf %492, %501 : vector<8x32xf32>
    %503 = vector.broadcast %484 : vector<1x32xf32> to vector<8x32xf32>
    %504 = arith.mulf %502, %503 : vector<8x32xf32>
    %505 = vector.broadcast %486 : vector<1x32xf32> to vector<8x32xf32>
    %506 = arith.addf %504, %505 : vector<8x32xf32>
    %507 = arith.addf %506, %77 : vector<8x32xf32>
    %c1_209 = arith.constant 1 : index
    %c0_210 = arith.constant 0 : index
    %c0_211 = arith.constant 0 : index
    %508 = vector.load %arg12[%c1_209, %c0_210, %c0_211] : memref<2x32x32xf32, #tpu.memory_space<vmem>>, vector<1x32x32xf32>
    %509 = vector.shape_cast %508 : vector<1x32x32xf32> to vector<32x32xf32>
    %cst_212 = arith.constant dense<0.000000e+00> : vector<8x32xf32>
    %510 = tpu.matmul %507, %509, %cst_212 {dimension_numbers = #tpu.dot_dimension_numbers<[1], [0], [0], [1], [0, 0, 1, 1], [], []>} : vector<8x32xf32>, vector<32x32xf32>, vector<8x32xf32> -> vector<8x32xf32>
    %c1_213 = arith.constant 1 : index
    %c0_214 = arith.constant 0 : index
    %c0_215 = arith.constant 0 : index
    %511 = vector.load %arg13[%c1_213, %c0_214, %c0_215] : memref<2x1x32xf32, #tpu.memory_space<vmem>>, vector<1x1x32xf32>
    %512 = vector.shape_cast %511 : vector<1x1x32xf32> to vector<1x32xf32>
    %513 = vector.broadcast %512 : vector<1x32xf32> to vector<8x32xf32>
    %514 = arith.addf %510, %513 : vector<8x32xf32>
    %c1_216 = arith.constant 1 : index
    %c0_217 = arith.constant 0 : index
    %c0_218 = arith.constant 0 : index
    %515 = vector.load %arg14[%c1_216, %c0_217, %c0_218] : memref<2x32x64xf32, #tpu.memory_space<vmem>>, vector<1x32x64xf32>
    %516 = vector.shape_cast %515 : vector<1x32x64xf32> to vector<32x64xf32>
    %cst_219 = arith.constant dense<0.000000e+00> : vector<16x64xf32>
    %517 = tpu.matmul %76, %516, %cst_219 {dimension_numbers = #tpu.dot_dimension_numbers<[1], [0], [0], [1], [0, 0, 1, 1], [], []>} : vector<16x32xf32>, vector<32x64xf32>, vector<16x64xf32> -> vector<16x64xf32>
    %c1_220 = arith.constant 1 : index
    %c0_221 = arith.constant 0 : index
    %c0_222 = arith.constant 0 : index
    %518 = vector.load %arg15[%c1_220, %c0_221, %c0_222] : memref<2x1x64xf32, #tpu.memory_space<vmem>>, vector<1x1x64xf32>
    %519 = vector.shape_cast %518 : vector<1x1x64xf32> to vector<1x64xf32>
    %520 = vector.broadcast %519 : vector<1x64xf32> to vector<16x64xf32>
    %521 = arith.addf %517, %520 : vector<16x64xf32>
    %522 = vector.extract_strided_slice %521 {offsets = [0, 0], sizes = [16, 32], strides = [1, 1]} : vector<16x64xf32> to vector<16x32xf32>
    %523 = vector.extract_strided_slice %521 {offsets = [0, 32], sizes = [16, 32], strides = [1, 1]} : vector<16x64xf32> to vector<16x32xf32>
    %c1_223 = arith.constant 1 : index
    %c0_224 = arith.constant 0 : index
    %c0_225 = arith.constant 0 : index
    %524 = vector.load %arg16[%c1_223, %c0_224, %c0_225] : memref<2x32x32xf32, #tpu.memory_space<vmem>>, vector<1x32x32xf32>
    %525 = vector.shape_cast %524 : vector<1x32x32xf32> to vector<32x32xf32>
    %c1_226 = arith.constant 1 : index
    %c0_227 = arith.constant 0 : index
    %c0_228 = arith.constant 0 : index
    %526 = vector.load %arg17[%c1_226, %c0_227, %c0_228] : memref<2x1x32xf32, #tpu.memory_space<vmem>>, vector<1x1x32xf32>
    %527 = vector.shape_cast %526 : vector<1x1x32xf32> to vector<1x32xf32>
    %cst_229 = arith.constant 0.000000e+00 : f32
    %528 = vector.broadcast %cst_229 : f32 to vector<8x32xf32>
    %529 = vector.extract_strided_slice %514 {offsets = [0, 0], sizes = [8, 8], strides = [1, 1]} : vector<8x32xf32> to vector<8x8xf32>
    %cst_230 = arith.constant 0.353553385 : f32
    %530 = vector.broadcast %cst_230 : f32 to vector<8x8xf32>
    %531 = arith.mulf %529, %530 : vector<8x8xf32>
    %532 = vector.extract_strided_slice %522 {offsets = [0, 0], sizes = [16, 8], strides = [1, 1]} : vector<16x32xf32> to vector<16x8xf32>
    %533 = vector.extract_strided_slice %523 {offsets = [0, 0], sizes = [16, 8], strides = [1, 1]} : vector<16x32xf32> to vector<16x8xf32>
    %cst_231 = arith.constant dense<0.000000e+00> : vector<8x16xf32>
    %534 = tpu.matmul %531, %532, %cst_231 {dimension_numbers = #tpu.dot_dimension_numbers<[1], [1], [0], [0], [0, 0, 1, 0], [], []>} : vector<8x8xf32>, vector<16x8xf32>, vector<8x16xf32> -> vector<8x16xf32>
    %cst_232 = arith.constant dense<0xFF800000> : vector<8xf32>
    %535 = vector.multi_reduction <maximumf>, %534, %cst_232 [1] : vector<8x16xf32> to vector<8xf32>
    %536 = vector.shape_cast %535 : vector<8xf32> to vector<8x1xf32>
    %537 = vector.broadcast %536 : vector<8x1xf32> to vector<8x16xf32>
    %538 = arith.subf %534, %537 : vector<8x16xf32>
    %539 = math.exp %538 : vector<8x16xf32>
    %cst_233 = arith.constant dense<0.000000e+00> : vector<8xf32>
    %540 = vector.multi_reduction <add>, %539, %cst_233 [1] : vector<8x16xf32> to vector<8xf32>
    %541 = vector.shape_cast %540 : vector<8xf32> to vector<8x1xf32>
    %542 = tpu.reciprocal %541 {approx = true} : vector<8x1xf32> -> vector<8x1xf32>
    %543 = vector.broadcast %542 : vector<8x1xf32> to vector<8x16xf32>
    %544 = arith.mulf %539, %543 : vector<8x16xf32>
    %cst_234 = arith.constant dense<0.000000e+00> : vector<8x8xf32>
    %545 = tpu.matmul %544, %533, %cst_234 {dimension_numbers = #tpu.dot_dimension_numbers<[1], [0], [0], [1], [0, 0, 1, 1], [], []>} : vector<8x16xf32>, vector<16x8xf32>, vector<8x8xf32> -> vector<8x8xf32>
    %546 = vector.extract_strided_slice %525 {offsets = [0, 0], sizes = [8, 32], strides = [1, 1]} : vector<32x32xf32> to vector<8x32xf32>
    %cst_235 = arith.constant dense<0.000000e+00> : vector<8x32xf32>
    %547 = tpu.matmul %545, %546, %cst_235 {dimension_numbers = #tpu.dot_dimension_numbers<[1], [0], [0], [1], [0, 0, 1, 1], [], []>} : vector<8x8xf32>, vector<8x32xf32>, vector<8x32xf32> -> vector<8x32xf32>
    %548 = arith.addf %528, %547 : vector<8x32xf32>
    %549 = vector.extract_strided_slice %514 {offsets = [0, 8], sizes = [8, 8], strides = [1, 1]} : vector<8x32xf32> to vector<8x8xf32>
    %cst_236 = arith.constant 0.353553385 : f32
    %550 = vector.broadcast %cst_236 : f32 to vector<8x8xf32>
    %551 = arith.mulf %549, %550 : vector<8x8xf32>
    %552 = vector.extract_strided_slice %522 {offsets = [0, 8], sizes = [16, 8], strides = [1, 1]} : vector<16x32xf32> to vector<16x8xf32>
    %553 = vector.extract_strided_slice %523 {offsets = [0, 8], sizes = [16, 8], strides = [1, 1]} : vector<16x32xf32> to vector<16x8xf32>
    %cst_237 = arith.constant dense<0.000000e+00> : vector<8x16xf32>
    %554 = tpu.matmul %551, %552, %cst_237 {dimension_numbers = #tpu.dot_dimension_numbers<[1], [1], [0], [0], [0, 0, 1, 0], [], []>} : vector<8x8xf32>, vector<16x8xf32>, vector<8x16xf32> -> vector<8x16xf32>
    %cst_238 = arith.constant dense<0xFF800000> : vector<8xf32>
    %555 = vector.multi_reduction <maximumf>, %554, %cst_238 [1] : vector<8x16xf32> to vector<8xf32>
    %556 = vector.shape_cast %555 : vector<8xf32> to vector<8x1xf32>
    %557 = vector.broadcast %556 : vector<8x1xf32> to vector<8x16xf32>
    %558 = arith.subf %554, %557 : vector<8x16xf32>
    %559 = math.exp %558 : vector<8x16xf32>
    %cst_239 = arith.constant dense<0.000000e+00> : vector<8xf32>
    %560 = vector.multi_reduction <add>, %559, %cst_239 [1] : vector<8x16xf32> to vector<8xf32>
    %561 = vector.shape_cast %560 : vector<8xf32> to vector<8x1xf32>
    %562 = tpu.reciprocal %561 {approx = true} : vector<8x1xf32> -> vector<8x1xf32>
    %563 = vector.broadcast %562 : vector<8x1xf32> to vector<8x16xf32>
    %564 = arith.mulf %559, %563 : vector<8x16xf32>
    %cst_240 = arith.constant dense<0.000000e+00> : vector<8x8xf32>
    %565 = tpu.matmul %564, %553, %cst_240 {dimension_numbers = #tpu.dot_dimension_numbers<[1], [0], [0], [1], [0, 0, 1, 1], [], []>} : vector<8x16xf32>, vector<16x8xf32>, vector<8x8xf32> -> vector<8x8xf32>
    %566 = vector.extract_strided_slice %525 {offsets = [8, 0], sizes = [8, 32], strides = [1, 1]} : vector<32x32xf32> to vector<8x32xf32>
    %cst_241 = arith.constant dense<0.000000e+00> : vector<8x32xf32>
    %567 = tpu.matmul %565, %566, %cst_241 {dimension_numbers = #tpu.dot_dimension_numbers<[1], [0], [0], [1], [0, 0, 1, 1], [], []>} : vector<8x8xf32>, vector<8x32xf32>, vector<8x32xf32> -> vector<8x32xf32>
    %568 = arith.addf %548, %567 : vector<8x32xf32>
    %569 = vector.extract_strided_slice %514 {offsets = [0, 16], sizes = [8, 8], strides = [1, 1]} : vector<8x32xf32> to vector<8x8xf32>
    %cst_242 = arith.constant 0.353553385 : f32
    %570 = vector.broadcast %cst_242 : f32 to vector<8x8xf32>
    %571 = arith.mulf %569, %570 : vector<8x8xf32>
    %572 = vector.extract_strided_slice %522 {offsets = [0, 16], sizes = [16, 8], strides = [1, 1]} : vector<16x32xf32> to vector<16x8xf32>
    %573 = vector.extract_strided_slice %523 {offsets = [0, 16], sizes = [16, 8], strides = [1, 1]} : vector<16x32xf32> to vector<16x8xf32>
    %cst_243 = arith.constant dense<0.000000e+00> : vector<8x16xf32>
    %574 = tpu.matmul %571, %572, %cst_243 {dimension_numbers = #tpu.dot_dimension_numbers<[1], [1], [0], [0], [0, 0, 1, 0], [], []>} : vector<8x8xf32>, vector<16x8xf32>, vector<8x16xf32> -> vector<8x16xf32>
    %cst_244 = arith.constant dense<0xFF800000> : vector<8xf32>
    %575 = vector.multi_reduction <maximumf>, %574, %cst_244 [1] : vector<8x16xf32> to vector<8xf32>
    %576 = vector.shape_cast %575 : vector<8xf32> to vector<8x1xf32>
    %577 = vector.broadcast %576 : vector<8x1xf32> to vector<8x16xf32>
    %578 = arith.subf %574, %577 : vector<8x16xf32>
    %579 = math.exp %578 : vector<8x16xf32>
    %cst_245 = arith.constant dense<0.000000e+00> : vector<8xf32>
    %580 = vector.multi_reduction <add>, %579, %cst_245 [1] : vector<8x16xf32> to vector<8xf32>
    %581 = vector.shape_cast %580 : vector<8xf32> to vector<8x1xf32>
    %582 = tpu.reciprocal %581 {approx = true} : vector<8x1xf32> -> vector<8x1xf32>
    %583 = vector.broadcast %582 : vector<8x1xf32> to vector<8x16xf32>
    %584 = arith.mulf %579, %583 : vector<8x16xf32>
    %cst_246 = arith.constant dense<0.000000e+00> : vector<8x8xf32>
    %585 = tpu.matmul %584, %573, %cst_246 {dimension_numbers = #tpu.dot_dimension_numbers<[1], [0], [0], [1], [0, 0, 1, 1], [], []>} : vector<8x16xf32>, vector<16x8xf32>, vector<8x8xf32> -> vector<8x8xf32>
    %586 = vector.extract_strided_slice %525 {offsets = [16, 0], sizes = [8, 32], strides = [1, 1]} : vector<32x32xf32> to vector<8x32xf32>
    %cst_247 = arith.constant dense<0.000000e+00> : vector<8x32xf32>
    %587 = tpu.matmul %585, %586, %cst_247 {dimension_numbers = #tpu.dot_dimension_numbers<[1], [0], [0], [1], [0, 0, 1, 1], [], []>} : vector<8x8xf32>, vector<8x32xf32>, vector<8x32xf32> -> vector<8x32xf32>
    %588 = arith.addf %568, %587 : vector<8x32xf32>
    %589 = vector.extract_strided_slice %514 {offsets = [0, 24], sizes = [8, 8], strides = [1, 1]} : vector<8x32xf32> to vector<8x8xf32>
    %cst_248 = arith.constant 0.353553385 : f32
    %590 = vector.broadcast %cst_248 : f32 to vector<8x8xf32>
    %591 = arith.mulf %589, %590 : vector<8x8xf32>
    %592 = vector.extract_strided_slice %522 {offsets = [0, 24], sizes = [16, 8], strides = [1, 1]} : vector<16x32xf32> to vector<16x8xf32>
    %593 = vector.extract_strided_slice %523 {offsets = [0, 24], sizes = [16, 8], strides = [1, 1]} : vector<16x32xf32> to vector<16x8xf32>
    %cst_249 = arith.constant dense<0.000000e+00> : vector<8x16xf32>
    %594 = tpu.matmul %591, %592, %cst_249 {dimension_numbers = #tpu.dot_dimension_numbers<[1], [1], [0], [0], [0, 0, 1, 0], [], []>} : vector<8x8xf32>, vector<16x8xf32>, vector<8x16xf32> -> vector<8x16xf32>
    %cst_250 = arith.constant dense<0xFF800000> : vector<8xf32>
    %595 = vector.multi_reduction <maximumf>, %594, %cst_250 [1] : vector<8x16xf32> to vector<8xf32>
    %596 = vector.shape_cast %595 : vector<8xf32> to vector<8x1xf32>
    %597 = vector.broadcast %596 : vector<8x1xf32> to vector<8x16xf32>
    %598 = arith.subf %594, %597 : vector<8x16xf32>
    %599 = math.exp %598 : vector<8x16xf32>
    %cst_251 = arith.constant dense<0.000000e+00> : vector<8xf32>
    %600 = vector.multi_reduction <add>, %599, %cst_251 [1] : vector<8x16xf32> to vector<8xf32>
    %601 = vector.shape_cast %600 : vector<8xf32> to vector<8x1xf32>
    %602 = tpu.reciprocal %601 {approx = true} : vector<8x1xf32> -> vector<8x1xf32>
    %603 = vector.broadcast %602 : vector<8x1xf32> to vector<8x16xf32>
    %604 = arith.mulf %599, %603 : vector<8x16xf32>
    %cst_252 = arith.constant dense<0.000000e+00> : vector<8x8xf32>
    %605 = tpu.matmul %604, %593, %cst_252 {dimension_numbers = #tpu.dot_dimension_numbers<[1], [0], [0], [1], [0, 0, 1, 1], [], []>} : vector<8x16xf32>, vector<16x8xf32>, vector<8x8xf32> -> vector<8x8xf32>
    %606 = vector.extract_strided_slice %525 {offsets = [24, 0], sizes = [8, 32], strides = [1, 1]} : vector<32x32xf32> to vector<8x32xf32>
    %cst_253 = arith.constant dense<0.000000e+00> : vector<8x32xf32>
    %607 = tpu.matmul %605, %606, %cst_253 {dimension_numbers = #tpu.dot_dimension_numbers<[1], [0], [0], [1], [0, 0, 1, 1], [], []>} : vector<8x8xf32>, vector<8x32xf32>, vector<8x32xf32> -> vector<8x32xf32>
    %608 = arith.addf %588, %607 : vector<8x32xf32>
    %609 = vector.broadcast %527 : vector<1x32xf32> to vector<8x32xf32>
    %610 = arith.addf %608, %609 : vector<8x32xf32>
    %611 = arith.addf %506, %610 : vector<8x32xf32>
    %c1_254 = arith.constant 1 : index
    %c0_255 = arith.constant 0 : index
    %c0_256 = arith.constant 0 : index
    %612 = vector.load %arg24[%c1_254, %c0_255, %c0_256] : memref<2x1x32xf32, #tpu.memory_space<vmem>>, vector<1x1x32xf32>
    %613 = vector.shape_cast %612 : vector<1x1x32xf32> to vector<1x32xf32>
    %c1_257 = arith.constant 1 : index
    %c0_258 = arith.constant 0 : index
    %c0_259 = arith.constant 0 : index
    %614 = vector.load %arg25[%c1_257, %c0_258, %c0_259] : memref<2x1x32xf32, #tpu.memory_space<vmem>>, vector<1x1x32xf32>
    %615 = vector.shape_cast %614 : vector<1x1x32xf32> to vector<1x32xf32>
    %cst_260 = arith.constant dense<0.000000e+00> : vector<8xf32>
    %616 = vector.multi_reduction <add>, %611, %cst_260 [1] : vector<8x32xf32> to vector<8xf32>
    %617 = vector.shape_cast %616 : vector<8xf32> to vector<8x1xf32>
    %cst_261 = arith.constant 3.200000e+01 : f32
    %618 = vector.broadcast %cst_261 : f32 to vector<8x1xf32>
    %619 = arith.divf %617, %618 : vector<8x1xf32>
    %620 = vector.broadcast %619 : vector<8x1xf32> to vector<8x32xf32>
    %621 = arith.subf %611, %620 : vector<8x32xf32>
    %622 = arith.mulf %621, %621 : vector<8x32xf32>
    %cst_262 = arith.constant dense<0.000000e+00> : vector<8xf32>
    %623 = vector.multi_reduction <add>, %622, %cst_262 [1] : vector<8x32xf32> to vector<8xf32>
    %624 = vector.shape_cast %623 : vector<8xf32> to vector<8x1xf32>
    %cst_263 = arith.constant 3.200000e+01 : f32
    %625 = vector.broadcast %cst_263 : f32 to vector<8x1xf32>
    %626 = arith.divf %624, %625 : vector<8x1xf32>
    %cst_264 = arith.constant 9.99999974E-6 : f32
    %627 = vector.broadcast %cst_264 : f32 to vector<8x1xf32>
    %628 = arith.addf %626, %627 : vector<8x1xf32>
    %629 = math.rsqrt %628 : vector<8x1xf32>
    %630 = vector.broadcast %629 : vector<8x1xf32> to vector<8x32xf32>
    %631 = arith.mulf %621, %630 : vector<8x32xf32>
    %632 = vector.broadcast %613 : vector<1x32xf32> to vector<8x32xf32>
    %633 = arith.mulf %631, %632 : vector<8x32xf32>
    %634 = vector.broadcast %615 : vector<1x32xf32> to vector<8x32xf32>
    %635 = arith.addf %633, %634 : vector<8x32xf32>
    %c1_265 = arith.constant 1 : index
    %c0_266 = arith.constant 0 : index
    %c0_267 = arith.constant 0 : index
    %636 = vector.load %arg18[%c1_265, %c0_266, %c0_267] : memref<2x32x64xf32, #tpu.memory_space<vmem>>, vector<1x32x64xf32>
    %637 = vector.shape_cast %636 : vector<1x32x64xf32> to vector<32x64xf32>
    %cst_268 = arith.constant dense<0.000000e+00> : vector<8x64xf32>
    %638 = tpu.matmul %635, %637, %cst_268 {dimension_numbers = #tpu.dot_dimension_numbers<[1], [0], [0], [1], [0, 0, 1, 1], [], []>} : vector<8x32xf32>, vector<32x64xf32>, vector<8x64xf32> -> vector<8x64xf32>
    %c1_269 = arith.constant 1 : index
    %c0_270 = arith.constant 0 : index
    %c0_271 = arith.constant 0 : index
    %639 = vector.load %arg19[%c1_269, %c0_270, %c0_271] : memref<2x1x64xf32, #tpu.memory_space<vmem>>, vector<1x1x64xf32>
    %640 = vector.shape_cast %639 : vector<1x1x64xf32> to vector<1x64xf32>
    %641 = vector.broadcast %640 : vector<1x64xf32> to vector<8x64xf32>
    %642 = arith.addf %638, %641 : vector<8x64xf32>
    %cst_272 = arith.constant 0.000000e+00 : f32
    %643 = vector.broadcast %cst_272 : f32 to vector<8x64xf32>
    %644 = arith.maximumf %642, %643 : vector<8x64xf32>
    %c1_273 = arith.constant 1 : index
    %c0_274 = arith.constant 0 : index
    %c0_275 = arith.constant 0 : index
    %645 = vector.load %arg20[%c1_273, %c0_274, %c0_275] : memref<2x64x32xf32, #tpu.memory_space<vmem>>, vector<1x64x32xf32>
    %646 = vector.shape_cast %645 : vector<1x64x32xf32> to vector<64x32xf32>
    %cst_276 = arith.constant dense<0.000000e+00> : vector<8x32xf32>
    %647 = tpu.matmul %644, %646, %cst_276 {dimension_numbers = #tpu.dot_dimension_numbers<[1], [0], [0], [1], [0, 0, 1, 1], [], []>} : vector<8x64xf32>, vector<64x32xf32>, vector<8x32xf32> -> vector<8x32xf32>
    %c1_277 = arith.constant 1 : index
    %c0_278 = arith.constant 0 : index
    %c0_279 = arith.constant 0 : index
    %648 = vector.load %arg21[%c1_277, %c0_278, %c0_279] : memref<2x1x32xf32, #tpu.memory_space<vmem>>, vector<1x1x32xf32>
    %649 = vector.shape_cast %648 : vector<1x1x32xf32> to vector<1x32xf32>
    %650 = vector.broadcast %649 : vector<1x32xf32> to vector<8x32xf32>
    %651 = arith.addf %647, %650 : vector<8x32xf32>
    %652 = arith.addf %635, %651 : vector<8x32xf32>
    %c1_280 = arith.constant 1 : index
    %c0_281 = arith.constant 0 : index
    %c0_282 = arith.constant 0 : index
    %653 = vector.load %arg26[%c1_280, %c0_281, %c0_282] : memref<2x1x32xf32, #tpu.memory_space<vmem>>, vector<1x1x32xf32>
    %654 = vector.shape_cast %653 : vector<1x1x32xf32> to vector<1x32xf32>
    %c1_283 = arith.constant 1 : index
    %c0_284 = arith.constant 0 : index
    %c0_285 = arith.constant 0 : index
    %655 = vector.load %arg27[%c1_283, %c0_284, %c0_285] : memref<2x1x32xf32, #tpu.memory_space<vmem>>, vector<1x1x32xf32>
    %656 = vector.shape_cast %655 : vector<1x1x32xf32> to vector<1x32xf32>
    %cst_286 = arith.constant dense<0.000000e+00> : vector<8xf32>
    %657 = vector.multi_reduction <add>, %652, %cst_286 [1] : vector<8x32xf32> to vector<8xf32>
    %658 = vector.shape_cast %657 : vector<8xf32> to vector<8x1xf32>
    %cst_287 = arith.constant 3.200000e+01 : f32
    %659 = vector.broadcast %cst_287 : f32 to vector<8x1xf32>
    %660 = arith.divf %658, %659 : vector<8x1xf32>
    %661 = vector.broadcast %660 : vector<8x1xf32> to vector<8x32xf32>
    %662 = arith.subf %652, %661 : vector<8x32xf32>
    %663 = arith.mulf %662, %662 : vector<8x32xf32>
    %cst_288 = arith.constant dense<0.000000e+00> : vector<8xf32>
    %664 = vector.multi_reduction <add>, %663, %cst_288 [1] : vector<8x32xf32> to vector<8xf32>
    %665 = vector.shape_cast %664 : vector<8xf32> to vector<8x1xf32>
    %cst_289 = arith.constant 3.200000e+01 : f32
    %666 = vector.broadcast %cst_289 : f32 to vector<8x1xf32>
    %667 = arith.divf %665, %666 : vector<8x1xf32>
    %cst_290 = arith.constant 9.99999974E-6 : f32
    %668 = vector.broadcast %cst_290 : f32 to vector<8x1xf32>
    %669 = arith.addf %667, %668 : vector<8x1xf32>
    %670 = math.rsqrt %669 : vector<8x1xf32>
    %671 = vector.broadcast %670 : vector<8x1xf32> to vector<8x32xf32>
    %672 = arith.mulf %662, %671 : vector<8x32xf32>
    %673 = vector.broadcast %654 : vector<1x32xf32> to vector<8x32xf32>
    %674 = arith.mulf %672, %673 : vector<8x32xf32>
    %675 = vector.broadcast %656 : vector<1x32xf32> to vector<8x32xf32>
    %676 = arith.addf %674, %675 : vector<8x32xf32>
    %c0_291 = arith.constant 0 : index
    %c0_292 = arith.constant 0 : index
    %677 = vector.load %arg28[%c0_291, %c0_292] : memref<1x32xf32, #tpu.memory_space<vmem>>, vector<1x32xf32>
    %c0_293 = arith.constant 0 : index
    %c0_294 = arith.constant 0 : index
    %678 = vector.load %arg29[%c0_293, %c0_294] : memref<1x32xf32, #tpu.memory_space<vmem>>, vector<1x32xf32>
    %cst_295 = arith.constant dense<0.000000e+00> : vector<8xf32>
    %679 = vector.multi_reduction <add>, %676, %cst_295 [1] : vector<8x32xf32> to vector<8xf32>
    %680 = vector.shape_cast %679 : vector<8xf32> to vector<8x1xf32>
    %cst_296 = arith.constant 3.200000e+01 : f32
    %681 = vector.broadcast %cst_296 : f32 to vector<8x1xf32>
    %682 = arith.divf %680, %681 : vector<8x1xf32>
    %683 = vector.broadcast %682 : vector<8x1xf32> to vector<8x32xf32>
    %684 = arith.subf %676, %683 : vector<8x32xf32>
    %685 = arith.mulf %684, %684 : vector<8x32xf32>
    %cst_297 = arith.constant dense<0.000000e+00> : vector<8xf32>
    %686 = vector.multi_reduction <add>, %685, %cst_297 [1] : vector<8x32xf32> to vector<8xf32>
    %687 = vector.shape_cast %686 : vector<8xf32> to vector<8x1xf32>
    %cst_298 = arith.constant 3.200000e+01 : f32
    %688 = vector.broadcast %cst_298 : f32 to vector<8x1xf32>
    %689 = arith.divf %687, %688 : vector<8x1xf32>
    %cst_299 = arith.constant 9.99999974E-6 : f32
    %690 = vector.broadcast %cst_299 : f32 to vector<8x1xf32>
    %691 = arith.addf %689, %690 : vector<8x1xf32>
    %692 = math.rsqrt %691 : vector<8x1xf32>
    %693 = vector.broadcast %692 : vector<8x1xf32> to vector<8x32xf32>
    %694 = arith.mulf %684, %693 : vector<8x32xf32>
    %695 = vector.broadcast %677 : vector<1x32xf32> to vector<8x32xf32>
    %696 = arith.mulf %694, %695 : vector<8x32xf32>
    %697 = vector.broadcast %678 : vector<1x32xf32> to vector<8x32xf32>
    %698 = arith.addf %696, %697 : vector<8x32xf32>
    %c0_300 = arith.constant 0 : index
    %c0_301 = arith.constant 0 : index
    %c0_302 = arith.constant 0 : index
    %699 = vector.load %arg30[%c0_300, %c0_301, %c0_302] : memref<1x8x32xf32, #tpu.memory_space<vmem>>, vector<1x8x32xf32>
    %700 = vector.shape_cast %699 : vector<1x8x32xf32> to vector<8x32xf32>
    %701 = vector.shape_cast %698 : vector<8x32xf32> to vector<1x8x32xf32>
    tpu.vector_store %arg30[%c0_300, %c0_301, %c0_302], %701 {strides = array<i32>} : memref<1x8x32xf32, #tpu.memory_space<vmem>>, vector<1x8x32xf32>,
    return
  }
  func.func @transform_0(%arg0: i32) -> (i32, i32, i32) {
    %c0_i32 = arith.constant 0 : i32
    %c0_i32_0 = arith.constant 0 : i32
    %c0_i32_1 = arith.constant 0 : i32
    return %arg0, %c0_i32, %c0_i32_0 : i32, i32, i32
  }
  func.func @transform_1(%arg0: i32) -> i32 {
    %c0_i32 = arith.constant 0 : i32
    %c0_i32_0 = arith.constant 0 : i32
    return %c0_i32 : i32
  }
  func.func @transform_2(%arg0: i32) -> i32 {
    %c0_i32 = arith.constant 0 : i32
    %c0_i32_0 = arith.constant 0 : i32
    return %c0_i32 : i32
  }
  func.func @transform_3(%arg0: i32) -> (i32, i32) {
    %c0_i32 = arith.constant 0 : i32
    %c0_i32_0 = arith.constant 0 : i32
    %c0_i32_1 = arith.constant 0 : i32
    return %c0_i32, %c0_i32_0 : i32, i32
  }
  func.func @transform_4(%arg0: i32) -> (i32, i32) {
    %c0_i32 = arith.constant 0 : i32
    %c0_i32_0 = arith.constant 0 : i32
    %c0_i32_1 = arith.constant 0 : i32
    return %c0_i32, %c0_i32_0 : i32, i32
  }
  func.func @transform_5(%arg0: i32) -> (i32, i32, i32) {
    %c0_i32 = arith.constant 0 : i32
    %c0_i32_0 = arith.constant 0 : i32
    %c0_i32_1 = arith.constant 0 : i32
    %c0_i32_2 = arith.constant 0 : i32
    return %c0_i32, %c0_i32_0, %c0_i32_1 : i32, i32, i32
  }
  func.func @transform_6(%arg0: i32) -> (i32, i32, i32) {
    %c0_i32 = arith.constant 0 : i32
    %c0_i32_0 = arith.constant 0 : i32
    %c0_i32_1 = arith.constant 0 : i32
    %c0_i32_2 = arith.constant 0 : i32
    return %c0_i32, %c0_i32_0, %c0_i32_1 : i32, i32, i32
  }
  func.func @transform_7(%arg0: i32) -> (i32, i32, i32) {
    %c0_i32 = arith.constant 0 : i32
    %c0_i32_0 = arith.constant 0 : i32
    %c0_i32_1 = arith.constant 0 : i32
    %c0_i32_2 = arith.constant 0 : i32
    return %c0_i32, %c0_i32_0, %c0_i32_1 : i32, i32, i32
  }
  func.func @transform_8(%arg0: i32) -> (i32, i32, i32) {
    %c0_i32 = arith.constant 0 : i32
    %c0_i32_0 = arith.constant 0 : i32
    %c0_i32_1 = arith.constant 0 : i32
    %c0_i32_2 = arith.constant 0 : i32
    return %c0_i32, %c0_i32_0, %c0_i32_1 : i32, i32, i32
  }
  func.func @transform_9(%arg0: i32) -> (i32, i32, i32) {
    %c0_i32 = arith.constant 0 : i32
    %c0_i32_0 = arith.constant 0 : i32
    %c0_i32_1 = arith.constant 0 : i32
    %c0_i32_2 = arith.constant 0 : i32
    return %c0_i32, %c0_i32_0, %c0_i32_1 : i32, i32, i32
  }
  func.func @transform_10(%arg0: i32) -> (i32, i32, i32) {
    %c0_i32 = arith.constant 0 : i32
    %c0_i32_0 = arith.constant 0 : i32
    %c0_i32_1 = arith.constant 0 : i32
    %c0_i32_2 = arith.constant 0 : i32
    return %c0_i32, %c0_i32_0, %c0_i32_1 : i32, i32, i32
  }
  func.func @transform_11(%arg0: i32) -> (i32, i32, i32) {
    %c0_i32 = arith.constant 0 : i32
    %c0_i32_0 = arith.constant 0 : i32
    %c0_i32_1 = arith.constant 0 : i32
    %c0_i32_2 = arith.constant 0 : i32
    return %c0_i32, %c0_i32_0, %c0_i32_1 : i32, i32, i32
  }
  func.func @transform_12(%arg0: i32) -> (i32, i32, i32) {
    %c0_i32 = arith.constant 0 : i32
    %c0_i32_0 = arith.constant 0 : i32
    %c0_i32_1 = arith.constant 0 : i32
    %c0_i32_2 = arith.constant 0 : i32
    return %c0_i32, %c0_i32_0, %c0_i32_1 : i32, i32, i32
  }
  func.func @transform_13(%arg0: i32) -> (i32, i32, i32) {
    %c0_i32 = arith.constant 0 : i32
    %c0_i32_0 = arith.constant 0 : i32
    %c0_i32_1 = arith.constant 0 : i32
    %c0_i32_2 = arith.constant 0 : i32
    return %c0_i32, %c0_i32_0, %c0_i32_1 : i32, i32, i32
  }
  func.func @transform_14(%arg0: i32) -> (i32, i32, i32) {
    %c0_i32 = arith.constant 0 : i32
    %c0_i32_0 = arith.constant 0 : i32
    %c0_i32_1 = arith.constant 0 : i32
    %c0_i32_2 = arith.constant 0 : i32
    return %c0_i32, %c0_i32_0, %c0_i32_1 : i32, i32, i32
  }
  func.func @transform_15(%arg0: i32) -> (i32, i32, i32) {
    %c0_i32 = arith.constant 0 : i32
    %c0_i32_0 = arith.constant 0 : i32
    %c0_i32_1 = arith.constant 0 : i32
    %c0_i32_2 = arith.constant 0 : i32
    return %c0_i32, %c0_i32_0, %c0_i32_1 : i32, i32, i32
  }
  func.func @transform_16(%arg0: i32) -> (i32, i32, i32) {
    %c0_i32 = arith.constant 0 : i32
    %c0_i32_0 = arith.constant 0 : i32
    %c0_i32_1 = arith.constant 0 : i32
    %c0_i32_2 = arith.constant 0 : i32
    return %c0_i32, %c0_i32_0, %c0_i32_1 : i32, i32, i32
  }
  func.func @transform_17(%arg0: i32) -> (i32, i32, i32) {
    %c0_i32 = arith.constant 0 : i32
    %c0_i32_0 = arith.constant 0 : i32
    %c0_i32_1 = arith.constant 0 : i32
    %c0_i32_2 = arith.constant 0 : i32
    return %c0_i32, %c0_i32_0, %c0_i32_1 : i32, i32, i32
  }
  func.func @transform_18(%arg0: i32) -> (i32, i32, i32) {
    %c0_i32 = arith.constant 0 : i32
    %c0_i32_0 = arith.constant 0 : i32
    %c0_i32_1 = arith.constant 0 : i32
    %c0_i32_2 = arith.constant 0 : i32
    return %c0_i32, %c0_i32_0, %c0_i32_1 : i32, i32, i32
  }
  func.func @transform_19(%arg0: i32) -> (i32, i32, i32) {
    %c0_i32 = arith.constant 0 : i32
    %c0_i32_0 = arith.constant 0 : i32
    %c0_i32_1 = arith.constant 0 : i32
    %c0_i32_2 = arith.constant 0 : i32
    return %c0_i32, %c0_i32_0, %c0_i32_1 : i32, i32, i32
  }
  func.func @transform_20(%arg0: i32) -> (i32, i32, i32) {
    %c0_i32 = arith.constant 0 : i32
    %c0_i32_0 = arith.constant 0 : i32
    %c0_i32_1 = arith.constant 0 : i32
    %c0_i32_2 = arith.constant 0 : i32
    return %c0_i32, %c0_i32_0, %c0_i32_1 : i32, i32, i32
  }
  func.func @transform_21(%arg0: i32) -> (i32, i32, i32) {
    %c0_i32 = arith.constant 0 : i32
    %c0_i32_0 = arith.constant 0 : i32
    %c0_i32_1 = arith.constant 0 : i32
    %c0_i32_2 = arith.constant 0 : i32
    return %c0_i32, %c0_i32_0, %c0_i32_1 : i32, i32, i32
  }
  func.func @transform_22(%arg0: i32) -> (i32, i32, i32) {
    %c0_i32 = arith.constant 0 : i32
    %c0_i32_0 = arith.constant 0 : i32
    %c0_i32_1 = arith.constant 0 : i32
    %c0_i32_2 = arith.constant 0 : i32
    return %c0_i32, %c0_i32_0, %c0_i32_1 : i32, i32, i32
  }
  func.func @transform_23(%arg0: i32) -> (i32, i32, i32) {
    %c0_i32 = arith.constant 0 : i32
    %c0_i32_0 = arith.constant 0 : i32
    %c0_i32_1 = arith.constant 0 : i32
    %c0_i32_2 = arith.constant 0 : i32
    return %c0_i32, %c0_i32_0, %c0_i32_1 : i32, i32, i32
  }
  func.func @transform_24(%arg0: i32) -> (i32, i32, i32) {
    %c0_i32 = arith.constant 0 : i32
    %c0_i32_0 = arith.constant 0 : i32
    %c0_i32_1 = arith.constant 0 : i32
    %c0_i32_2 = arith.constant 0 : i32
    return %c0_i32, %c0_i32_0, %c0_i32_1 : i32, i32, i32
  }
  func.func @transform_25(%arg0: i32) -> (i32, i32, i32) {
    %c0_i32 = arith.constant 0 : i32
    %c0_i32_0 = arith.constant 0 : i32
    %c0_i32_1 = arith.constant 0 : i32
    %c0_i32_2 = arith.constant 0 : i32
    return %c0_i32, %c0_i32_0, %c0_i32_1 : i32, i32, i32
  }
  func.func @transform_26(%arg0: i32) -> (i32, i32, i32) {
    %c0_i32 = arith.constant 0 : i32
    %c0_i32_0 = arith.constant 0 : i32
    %c0_i32_1 = arith.constant 0 : i32
    %c0_i32_2 = arith.constant 0 : i32
    return %c0_i32, %c0_i32_0, %c0_i32_1 : i32, i32, i32
  }
  func.func @transform_27(%arg0: i32) -> (i32, i32) {
    %c0_i32 = arith.constant 0 : i32
    %c0_i32_0 = arith.constant 0 : i32
    %c0_i32_1 = arith.constant 0 : i32
    return %c0_i32, %c0_i32_0 : i32, i32
  }
  func.func @transform_28(%arg0: i32) -> (i32, i32) {
    %c0_i32 = arith.constant 0 : i32
    %c0_i32_0 = arith.constant 0 : i32
    %c0_i32_1 = arith.constant 0 : i32
    return %c0_i32, %c0_i32_0 : i32, i32
  }
  func.func @transform_29(%arg0: i32) -> (i32, i32, i32) {
    %c0_i32 = arith.constant 0 : i32
    %c0_i32_0 = arith.constant 0 : i32
    %c0_i32_1 = arith.constant 0 : i32
    return %arg0, %c0_i32, %c0_i32_0 : i32, i32, i32
  }
}

</mosaic_0001>

<bundles_post_ra>
// kernel: decoder_forward.1
= control target key start
LH: loop header
LB: loop body
LE: loop exit
PB: predicated region body
PF: predicated region fallthrough
CT: control target
= control target key end

     0   :  { %s8973_s6 = smov 1   ;;  %s8974_s10 = smov 2   ;;  %s10190_s0 = inlined_call_operand.smem [shape: u32[30], index: -1, kind: input, shape index: {}] }
   0x1   :  { %s9045_s5 = sld [smem:[%s10190_s0]]   ;;  %s8975_s14 = smov 3  }
   0x2   :  { %s9050_s9 = sld [smem:[%s10190_s0 + %s8973_s6]]   ;;  %s8976_s18 = smov 4  }
   0x3   :  { %s9055_s13 = sld [smem:[%s10190_s0 + %s8974_s10]]   ;;  %s8977_s22 = smov 5  }
   0x4   :  { %s9060_s17 = sld [smem:[%s10190_s0 + %s8975_s14]]   ;;  %s8978_s26 = smov 6  }
   0x5   :  { %s9065_s21 = sld [smem:[%s10190_s0 + %s8976_s18]]   ;;  %s8979_s30 = smov 7  }
   0x6   :  { %s9070_s25 = sld [smem:[%s10190_s0 + %s8977_s22]]   ;;  %s8980_s4 = smov 8  }
   0x7   :  { %10229 = sst [smem:[#allocation48_spill]] %s9045_s5  ;;  %s8981_s10 = smov 9  }
   0x8   :  { %10230 = sst [smem:[#allocation49_spill]] %s9050_s9  ;;  %s8982_s15 = smov 10  }
   0x9   :  { %s9075_s29 = sld [smem:[%s10190_s0 + %s8978_s26]]   ;;  %s8983_s20 = smov 11  }
   0xa   :  { %10231 = sst [smem:[#allocation50_spill]] %s9060_s17  ;;  %s8984_s26 = smov 12  }
   0xb   :  { %10232 = sst [smem:[#allocation51_spill]] %s9065_s21  ;;  %s8985_s1 = smov 13  }
   0xc   :  { %10233 = sst [smem:[#allocation52_spill]] %s9070_s25  ;;  %s8986_s7 = smov 14  }
   0xd   :  { %s9080_s3 = sld [smem:[%s10190_s0 + %s8979_s30]]   ;;  %s8988_s22 = smov 16  }
   0xe   :  { %s9085_s8 = sld [smem:[%s10190_s0 + %s8980_s4]]   ;;  %s8989_s28 = smov 17  }
   0xf   :  { %s9090_s14 = sld [smem:[%s10190_s0 + %s8981_s10]]   ;;  %s9001_s25 = smov 29  }
  0x10   :  { %s9095_s19 = sld [smem:[%s10190_s0 + %s8982_s15]]   ;;  %s8987_s15 = smov 15  }
  0x11   :  { %s9100_s24 = sld [smem:[%s10190_s0 + %s8983_s20]]  }
  0x12   :  { %s9105_s30 = sld [smem:[%s10190_s0 + %s8984_s26]]  }
  0x13   :  { %10234 = sst [smem:[#allocation53_spill]] %s9080_s3  ;;  %s9000_s3 = smov 28  }
  0x14   :  { %10235 = sst [smem:[#allocation54_spill]] %s9085_s8 }
  0x15   :  { %10236 = sst [smem:[#allocation55_spill]] %s9090_s14 }
  0x16   :  { %s9110_s6 = sld [smem:[%s10190_s0 + %s8985_s1]]  }
  0x17   :  { %10237 = sst [smem:[#allocation56_spill]] %s9100_s24 }
  0x18   :  { %s9115_s12 = sld [smem:[%s10190_s0 + %s8986_s7]]   ;;  %s8990_s7 = smov 18  }
  0x19   :  { %s9120_s20 = sld [smem:[%s10190_s0 + %s8987_s15]]   ;;  %s8991_s15 = smov 19  }
  0x1a   :  { %s9125_s27 = sld [smem:[%s10190_s0 + %s8988_s22]]   ;;  %s8992_s22 = smov 20  }
  0x1b   :  { %s9130_s4 = sld [smem:[%s10190_s0 + %s8989_s28]]   ;;  %s8993_s28 = smov 21  }
  0x1c   :  { %10238 = sst [smem:[#allocation57_spill]] %s9110_s6 }
  0x1d   :  { %s9135_s24 = sld [smem:[%s10190_s0 + %s8990_s7]]   ;;  %s8994_s7 = smov 22  }
  0x1e   :  { %10239 = sst [smem:[#allocation58_spill]] %s9115_s12 }
  0x1f   :  { %s9140_s17 = sld [smem:[%s10190_s0 + %s8991_s15]]   ;;  %s8995_s15 = smov 23  }
  0x20   :  { %s9145_s14 = sld [smem:[%s10190_s0 + %s8992_s22]]   ;;  %s8996_s22 = smov 24  }
  0x21   :  { %10240 = sst [smem:[#allocation59_spill]] %s9130_s4 }
  0x22   :  { %s9150_s4 = sld [smem:[%s10190_s0 + %s8993_s28]]   ;;  %s8997_s28 = smov 25  }
  0x23   :  { %10241 = sst [smem:[#allocation60_spill]] %s9135_s24 }
  0x24   :  { %s9155_s16 = sld [smem:[%s10190_s0 + %s8994_s7]]   ;;  %s8998_s7 = smov 26  }
  0x25   :  { %10242 = sst [smem:[#allocation61_spill]] %s9140_s17  ;;  %s8999_s17 = smov 27  }
  0x26   :  { %10243 = sst [smem:[#allocation62_spill]] %s9145_s14 }
  0x27   :  { %s9160_s23 = sld [smem:[%s10190_s0 + %s8995_s15]]  }
  0x28   :  { %10244 = sst [smem:[#allocation63_spill]] %s9150_s4 }
  0x29   :  { %s9165_s1 = sld [smem:[%s10190_s0 + %s8996_s22]]  }
  0x2a   :  { %10245 = sst [smem:[#allocation64_spill]] %s9155_s16 }
  0x2b   :  { %s9170_s10 = sld [smem:[%s10190_s0 + %s8997_s28]]  }
  0x2c   :  { %s9175_s4 = sld [smem:[%s10190_s0 + %s8998_s7]]  }
  0x2d   :  { %10246 = sst [smem:[#allocation65_spill]] %s9160_s23 }
  0x2e   :  { %s9180_s23 = sld [smem:[%s10190_s0 + %s8999_s17]]  }
  0x2f   :  { %10247 = sst [smem:[#allocation66_spill]] %s9165_s1 }
  0x30   :  { %s9185_s24 = sld [smem:[%s10190_s0 + %s9000_s3]]  }
  0x31   :  { %10248 = sst [smem:[#allocation67_spill]] %s9170_s10 }
  0x32   :  { %10249 = sst [smem:[#allocation68_spill]] %s9175_s4 }
  0x33   :  { %s9190_s10 = sld [smem:[%s10190_s0 + %s9001_s25]]  }
  0x34   :  { %64 = sst [smem:[#allocation2]] %s9055_s13 }
  0x39   :  { %10250 = sst [smem:[#allocation69_spill]] %s9190_s10 }
  0x3a   :  { %65 = vsyncpa [#allocation4], 0 }
  0x3b   :  { %67 = vsyncpa [#allocation4 + $0x1], 0 }
  0x3c   :  { %68 = vsyncpa [#allocation6], 0 }
  0x3d   :  { %69 = vsyncpa [#allocation9], 0 }
  0x3e   :  { %70 = vsyncpa [#allocation12], 0 }
  0x3f   :  { %71 = vsyncpa [#allocation15], 0 }
  0x40   :  { %72 = vsyncpa [#allocation18], 0 }
  0x41   :  { %73 = vsyncpa [#allocation21], 0 }
  0x42   :  { %74 = vsyncpa [#allocation24], 0 }
  0x43   :  { %75 = vsyncpa [#allocation27], 0 }
  0x44   :  { %76 = vsyncpa [#allocation30], 0 }
  0x45   :  { %77 = vsyncpa [#allocation33], 0 }
  0x46   :  { %78 = vsyncpa [#allocation5], 0 }
  0x47   :  { %80 = vsyncpa [#allocation5 + $0x1], 0  ;;  %s9193_s5 = smov 0   ;;  %s9195_s7 = smov 0  }
  0x48   :  { %s9197_s0 = smov 0   ;;  %s9199_s13 = smov 0  }
  0x49 LB: > { %s9002_s11 = smov [#allocation8]   ;;  %s9214_s15 = sadd.s32 4294967295, %s8971_s13   ;;  %s8971_s13 = sphi %s9199_s13, %s10319_s13   ;;  %s8967_s0 = sphi %s9197_s0, %s10318_s0   ;;  %s8963_s7 = sphi %s9195_s7, %s10317_s7   ;;  %s8959_s5 = sphi %s9193_s5, %s10316_s5  }
  0x4a   : > { %s761_s17 = sshll.u32 %s9002_s11, 4  ;;  %p7109_p0 = scmp.ge.s32.totalorder %s8971_s13, 1  ;;  %s762_s17 = int_to_ptr.vmem [resolvable:$true] %s761_s17 }
  0x4b   : > { %p10199_p1 = scmp.eq.s32.totalorder %s9214_s15, 0  ;;  %p731_p2 = scmp.lt.s32.totalorder %s8971_s13, 3 }
  0x4c   : > { %s9003_s3 = smov [#allocation11]   ;;  %s9004_s25 = smov [#allocation14]  }
  0x4d   : > { %p9219_p3 = pnand %p7109_p0, %p731_p2  ;;  %s790_s22 = sshll.u32 %s9003_s3, 4  ;;  %s9232_s22 = int_to_ptr.vmem [resolvable:$true] %s790_s22 }
  0x4e   : > { %s822_s28 = sshll.u32 %s9004_s25, 4  ;;  %s8367_s11 = scalar_lea.vmem %s762_s17, 128  ;;  %s9234_s28 = int_to_ptr.vmem [resolvable:$true] %s822_s28 }
  0x4f   : > { %s10251_s18 = scalar_select %p9219_p3, 1, 0 }
  0x50   : > { %p8077_p5 = pneg %p9219_p3  ;;  %p8368_p8 = scmp.ne.s32.totalorder %s762_s17, %s8367_s11 }
  0x51   : > { %p8375_p11 = scmp.lt.s32.totalorder %s762_s17, %s762_s17  ;;  %p8376_p12 = scmp.lt.s32.totalorder %s8367_s11, %s8367_s11 }
  0x52   : > { %p9228_p6 = pnand %p8077_p5, %p10199_p1 }
  0x53   : > { %p8377_p13 = por %p8376_p12, %p8375_p11 }
  0x54   : > { %p9238_p7 = pneg %p9228_p6 }
  0x56   : > { %p8370_p9 = pnand %p8368_p8, %p9238_p7 }
  0x58   : > { %p8371_p10 = pneg %p8370_p9 }
  0x5a   : > { %p8378_p0 = pnand %p8377_p13, %p8371_p10 }
  0x5c   : > { %8381 = shalt.err (!%p8378_p0)
}
  0x5d   : > { %s10254_s21 = sld [smem:[#allocation51_spill]]  ;;  %s8393_s3 = scalar_lea.vmem %s9232_s22, 32 }
  0x5e   : > { %p8394_p2 = scmp.ne.s32.totalorder %s9232_s22, %s8393_s3  ;;  %p8401_p8 = scmp.lt.s32.totalorder %s9232_s22, %s9232_s22 }
  0x5f   : > { %p8402_p9 = scmp.lt.s32.totalorder %s8393_s3, %s8393_s3 }
  0x60   : > { %p8396_p5 = pnand %p8394_p2, %p9238_p7 }
  0x61   : > { %p8403_p1 = por %p8402_p9, %p8401_p8 }
  0x62   : > { %p8397_p4 = pneg %p8396_p5 }
  0x63   : > { %8083 = dma.hbm_to_vmem [thread:$0]  (!%p9228_p6), %s10254_s21, 128, %s762_s17, [#allocation9]  }
  0x64   : > { %p8404_p11 = pnand %p8403_p1, %p8397_p4 }
  0x66   : > { %8407 = shalt.err (!%p8404_p11)
}
  0x67   : > { %s10201_s25 = smov 16   ;;  %s10255_s8 = sld [smem:[#allocation54_spill]] }
  0x68   : > { %s10204_s17 = smov 1   ;;  %s8419_s11 = scalar_lea.vmem %s9234_s28, 32 }
  0x69   : > { %p8420_p10 = scmp.ne.s32.totalorder %s9234_s28, %s8419_s11  ;;  %p8427_p4 = scmp.lt.s32.totalorder %s9234_s28, %s9234_s28 }
  0x6a   : > { %p8428_p13 = scmp.lt.s32.totalorder %s8419_s11, %s8419_s11 }
  0x6b   : > { %p8422_p12 = pnand %p8420_p10, %p9238_p7 }
  0x6c   : > { %p8429_p0 = por %p8428_p13, %p8427_p4 }
  0x6d   : > { %8089 = dma.hbm_to_vmem [thread:$0]  (!%p9228_p6), %s10255_s8, 32, %s9232_s22, [#allocation12], %s10201_s25, %s10201_s25, %s10204_s17  }
  0x6e   : > { %p8423_p1 = pneg %p8422_p12 }
  0x70   : > { %p8430_p2 = pnand %p8429_p0, %p8423_p1 }
  0x72   : > { %8433 = shalt.err (!%p8430_p2)
}
  0x73   : > { %8095 = dma.hbm_to_vmem [thread:$0]  (!%p9228_p6), %s9105_s30, 32, %s9234_s28, [#allocation15], %s10201_s25, %s10201_s25, %s10204_s17  }
  0x74   : > { %s9007_s22 = smov [#allocation17]   ;;  %s9008_s8 = smov [#allocation20]  }
  0x75   : > { %s848_s3 = sshll.u32 %s9007_s22, 4  ;;  %s874_s21 = sshll.u32 %s9008_s8, 4  ;;  %s849_s3 = int_to_ptr.vmem [resolvable:$true] %s848_s3  ;;  %s875_s21 = int_to_ptr.vmem [resolvable:$true] %s874_s21 }
  0x76   : > { %s8445_s10 = scalar_lea.vmem %s849_s3, 32  ;;  %p8453_p11 = scmp.lt.s32.totalorder %s849_s3, %s849_s3 }
  0x77   : > { %p8446_p5 = scmp.ne.s32.totalorder %s849_s3, %s8445_s10  ;;  %p8454_p10 = scmp.lt.s32.totalorder %s8445_s10, %s8445_s10 }
  0x79   : > { %p8448_p8 = pnand %p8446_p5, %p9238_p7  ;;  %p8455_p12 = por %p8454_p10, %p8453_p11 }
  0x7b   : > { %p8449_p9 = pneg %p8448_p8 }
  0x7d   : > { %p8456_p1 = pnand %p8455_p12, %p8449_p9 }
  0x7f   : > { %8459 = shalt.err (!%p8456_p1)
}
  0x80   : > { %s10256_s12 = sld [smem:[#allocation58_spill]]  ;;  %s8471_s8 = scalar_lea.vmem %s875_s21, 32 }
  0x81   : > { %p8472_p4 = scmp.ne.s32.totalorder %s875_s21, %s8471_s8  ;;  %p8479_p2 = scmp.lt.s32.totalorder %s875_s21, %s875_s21 }
  0x82   : > { %p8480_p5 = scmp.lt.s32.totalorder %s8471_s8, %s8471_s8 }
  0x83   : > { %p8474_p13 = pnand %p8472_p4, %p9238_p7 }
  0x84   : > { %p8481_p8 = por %p8480_p5, %p8479_p2 }
  0x85   : > { %p8475_p0 = pneg %p8474_p13 }
  0x86   : > { %8101 = dma.hbm_to_vmem [thread:$0]  (!%p9228_p6), %s10256_s12, 32, %s849_s3, [#allocation18], %s10201_s25, %s10201_s25, %s10204_s17  }
  0x87   : > { %p8482_p11 = pnand %p8481_p8, %p8475_p0 }
  0x89   : > { %8485 = shalt.err (!%p8482_p11)
}
  0x8a   : > { %8107 = dma.hbm_to_vmem [thread:$0]  (!%p9228_p6), %s9125_s27, 32, %s875_s21, [#allocation21], %s10201_s25, %s10201_s25, %s10204_s17  }
  0x8b   : > { %s9009_s10 = smov [#allocation23]   ;;  %s9010_s11 = smov [#allocation26]  }
  0x8c   : > { %s906_s28 = sshll.u32 %s9009_s10, 4  ;;  %s932_s22 = sshll.u32 %s9010_s11, 4  ;;  %s907_s28 = int_to_ptr.vmem [resolvable:$true] %s906_s28  ;;  %s933_s22 = int_to_ptr.vmem [resolvable:$true] %s932_s22 }
  0x8d   : > { %s8497_s3 = scalar_lea.vmem %s907_s28, 32  ;;  %p8505_p1 = scmp.lt.s32.totalorder %s907_s28, %s907_s28 }
  0x8e   : > { %p8498_p9 = scmp.ne.s32.totalorder %s907_s28, %s8497_s3  ;;  %p8506_p4 = scmp.lt.s32.totalorder %s8497_s3, %s8497_s3 }
  0x90   : > { %p8500_p10 = pnand %p8498_p9, %p9238_p7  ;;  %p8507_p13 = por %p8506_p4, %p8505_p1 }
  0x92   : > { %p8501_p12 = pneg %p8500_p10 }
  0x94   : > { %p8508_p0 = pnand %p8507_p13, %p8501_p12 }
  0x96   : > { %8511 = shalt.err (!%p8508_p0)
}
  0x97   : > { %s10257_s14 = sld [smem:[#allocation62_spill]]  ;;  %s8523_s21 = scalar_lea.vmem %s933_s22, 32 }
  0x98   : > { %p8524_p2 = scmp.ne.s32.totalorder %s933_s22, %s8523_s21  ;;  %p8531_p11 = scmp.lt.s32.totalorder %s933_s22, %s933_s22 }
  0x99   : > { %p8532_p9 = scmp.lt.s32.totalorder %s8523_s21, %s8523_s21 }
  0x9a   : > { %p8526_p5 = pnand %p8524_p2, %p9238_p7 }
  0x9b   : > { %p8533_p10 = por %p8532_p9, %p8531_p11 }
  0x9c   : > { %p8527_p8 = pneg %p8526_p5 }
  0x9d   : > { %8113 = dma.hbm_to_vmem [thread:$0]  (!%p9228_p6), %s10257_s14, 32, %s907_s28, [#allocation24], %s10201_s25, %s10201_s25, %s10204_s17  }
  0x9e   : > { %p8534_p1 = pnand %p8533_p10, %p8527_p8 }
  0xa0   : > { %8537 = shalt.err (!%p8534_p1)
}
  0xa1   : > { %s10258_s16 = sld [smem:[#allocation64_spill]]  ;;  %s9011_s8 = smov [#allocation29]  }
  0xa2   : > { %s958_s10 = sshll.u32 %s9011_s8, 4  ;;  %s9012_s28 = smov [#allocation32]   ;;  %s959_s10 = int_to_ptr.vmem [resolvable:$true] %s958_s10 }
  0xa3   : > { %s984_s11 = sshll.u32 %s9012_s28, 4  ;;  %s8549_s3 = scalar_lea.vmem %s959_s10, 32  ;;  %s985_s11 = int_to_ptr.vmem [resolvable:$true] %s984_s11 }
  0xa4   : > { %p8550_p12 = scmp.ne.s32.totalorder %s959_s10, %s8549_s3  ;;  %p8557_p0 = scmp.lt.s32.totalorder %s959_s10, %s959_s10 }
  0xa5   : > { %p8558_p2 = scmp.lt.s32.totalorder %s8549_s3, %s8549_s3 }
  0xa6   : > { %p8552_p4 = pnand %p8550_p12, %p9238_p7 }
  0xa7   : > { %8119 = dma.hbm_to_vmem [thread:$0]  (!%p9228_p6), %s10258_s16, 32, %s933_s22, [#allocation27], %s10201_s25, %s10201_s25, %s10204_s17  }
  0xa8   : > { %p8553_p13 = pneg %p8552_p4  ;;  %p8559_p5 = por %p8558_p2, %p8557_p0 }
  0xaa   : > { %p8560_p8 = pnand %p8559_p5, %p8553_p13 }
  0xac   : > { %8563 = shalt.err (!%p8560_p8)
}
  0xad   : > { %s10259_s1 = sld [smem:[#allocation66_spill]]  ;;  %s8575_s21 = scalar_lea.vmem %s985_s11, 32 }
  0xae   : > { %s10260_s9 = sld [smem:[#allocation49_spill]]  ;;  %p8576_p11 = scmp.ne.s32.totalorder %s985_s11, %s8575_s21 }
  0xaf   : > { %p8583_p1 = scmp.lt.s32.totalorder %s985_s11, %s985_s11  ;;  %p8584_p12 = scmp.lt.s32.totalorder %s8575_s21, %s8575_s21 }
  0xb0   : > { %p8578_p9 = pnand %p8576_p11, %p9238_p7 }
  0xb1   : > { %p8585_p4 = por %p8584_p12, %p8583_p1 }
  0xb2   : > { %p8579_p10 = pneg %p8578_p9 }
  0xb3   : > { %8125 = dma.hbm_to_vmem [thread:$0]  (!%p9228_p6), %s10259_s1, 32, %s959_s10, [#allocation30], %s10201_s25, %s10201_s25, %s10204_s17  }
  0xb4   : > { %s744_s22 = sshll.u32 %s10260_s9, 4  ;;  %p8586_p13 = pnand %p8585_p4, %p8579_p10  ;;  %s745_s22 = int_to_ptr.vmem [resolvable:$true] %s744_s22 }
  0xb6   : > { %8589 = shalt.err (!%p8586_p13)
}
  0xb7   : > { %s10261_s4 = sld [smem:[#allocation68_spill]]  ;;  %s8590_s8 = scalar_lea.vmem %s745_s22, 16 }
  0xb8   : > { %p8591_p0 = scmp.ne.s32.totalorder %s745_s22, %s8590_s8  ;;  %p8598_p8 = scmp.lt.s32.totalorder %s745_s22, %s745_s22 }
  0xb9   : > { %p8599_p11 = scmp.lt.s32.totalorder %s8590_s8, %s8590_s8 }
  0xba   : > { %p8593_p2 = pnand %p8591_p0, %p9238_p7 }
  0xbb   : > { %p8600_p9 = por %p8599_p11, %p8598_p8 }
  0xbc   : > { %p8594_p5 = pneg %p8593_p2 }
  0xbd   : > { %8131 = dma.hbm_to_vmem [thread:$0]  (!%p9228_p6), %s10261_s4, 32, %s985_s11, [#allocation33], %s10201_s25, %s10201_s25, %s10204_s17  }
  0xbe   : > { %p8601_p1 = pnand %p8600_p9, %p8594_p5 }
  0xc0   : > { %8604 = shalt.err (!%p8601_p1)
}
  0xc1   : > { %s9013_s10 = smov [#allocation7]   ;;  %s9014_s28 = smov [#allocation10]  }
  0xc2   : > { %8080 = dma.vmem_to_smem (!%p9228_p6), %s745_s22, 16, %s9013_s10, [#allocation6]  }
  0xc3   : > { %s774_s3 = sshll.u32 %s9014_s28, 4  ;;  %s9015_s21 = smov [#allocation13]   ;;  %s775_s3 = int_to_ptr.vmem [resolvable:$true] %s774_s3 }
  0xc4   : > { %s806_s11 = sshll.u32 %s9015_s21, 4  ;;  %s8616_s25 = scalar_lea.vmem %s775_s3, 32  ;;  %s807_s11 = int_to_ptr.vmem [resolvable:$true] %s806_s11 }
  0xc5   : > { %p8617_p10 = scmp.ne.s32.totalorder %s775_s3, %s8616_s25  ;;  %p8624_p13 = scmp.lt.s32.totalorder %s775_s3, %s775_s3 }
  0xc6   : > { %p8625_p0 = scmp.lt.s32.totalorder %s8616_s25, %s8616_s25 }
  0xc7   : > { %p8619_p12 = pnand %p8617_p10, %p9238_p7 }
  0xc8   : > { %p8626_p2 = por %p8625_p0, %p8624_p13 }
  0xc9   : > { %p8620_p4 = pneg %p8619_p12 }
  0xcb   : > { %p8627_p5 = pnand %p8626_p2, %p8620_p4 }
  0xcd   : > { %8630 = shalt.err (!%p8627_p5)
}
  0xce   : > { %s10262_s22 = smov 16   ;;  %s8642_s8 = scalar_lea.vmem %s807_s11, 32 }
  0xcf   : > { %8086 = dma.hbm_to_vmem [thread:$0]  (!%p9228_p6), %s9075_s29, 32, %s775_s3, [#allocation9], %s10262_s22, %s10262_s22, %s10204_s17  }
  0xd0   : > { %p8643_p8 = scmp.ne.s32.totalorder %s807_s11, %s8642_s8  ;;  %p8650_p1 = scmp.lt.s32.totalorder %s807_s11, %s807_s11 }
  0xd1   : > { %p8651_p10 = scmp.lt.s32.totalorder %s8642_s8, %s8642_s8 }
  0xd2   : > { %p8645_p11 = pnand %p8643_p8, %p9238_p7 }
  0xd3   : > { %p8652_p12 = por %p8651_p10, %p8650_p1 }
  0xd4   : > { %p8646_p9 = pneg %p8645_p11 }
  0xd6   : > { %p8653_p3 = pnand %p8652_p12, %p8646_p9 }
  0xd8   : > { %8656 = shalt.err (!%p8653_p3)
}
  0xd9   : > { %8092 = dma.hbm_to_vmem [thread:$0]  (!%p9228_p6), %s9095_s19, 32, %s807_s11, [#allocation12], %s10262_s22, %s10262_s22, %s10204_s17  }
  0xda   : > { %s9016_s25 = smov [#allocation16]  }
  0xdb   : > { %s835_s10 = sshll.u32 %s9016_s25, 4  ;;  %s836_s10 = int_to_ptr.vmem [resolvable:$true] %s835_s10 }
  0xdc   : > { %s8668_s28 = scalar_lea.vmem %s836_s10, 1024  ;;  %p8676_p2 = scmp.lt.s32.totalorder %s836_s10, %s836_s10 }
  0xdd   : > { %p8669_p4 = scmp.ne.s32.totalorder %s836_s10, %s8668_s28  ;;  %p8677_p5 = scmp.lt.s32.totalorder %s8668_s28, %s8668_s28 }
  0xdf   : > { %p8671_p13 = pnand %p8669_p4, %p9238_p7  ;;  %p8678_p8 = por %p8677_p5, %p8676_p2 }
  0xe1   : > { %p8672_p0 = pneg %p8671_p13 }
  0xe3   : > { %p8679_p3 = pnand %p8678_p8, %p8672_p0 }
  0xe5   : > { %8682 = shalt.err (!%p8679_p3)
}
  0xe6   : > { %s10206_s3 = smov 128   ;;  %s10263_s6 = sld [smem:[#allocation57_spill]] }
  0xe7   : > { %s10207_s21 = smov 8   ;;  %s9019_s11 = smov [#allocation19]  }
  0xe8   : > { %s861_s8 = sshll.u32 %s9019_s11, 4  ;;  %s9020_s25 = smov [#allocation22]   ;;  %s862_s8 = int_to_ptr.vmem [resolvable:$true] %s861_s8 }
  0xe9   : > { %s890_s17 = sshll.u32 %s9020_s25, 4  ;;  %s8694_s1 = scalar_lea.vmem %s862_s8, 1024  ;;  %s891_s17 = int_to_ptr.vmem [resolvable:$true] %s890_s17 }
  0xea   : > { %p8695_p11 = scmp.ne.s32.totalorder %s862_s8, %s8694_s1  ;;  %p8702_p10 = scmp.lt.s32.totalorder %s862_s8, %s862_s8 }
  0xeb   : > { %p8703_p12 = scmp.lt.s32.totalorder %s8694_s1, %s8694_s1 }
  0xec   : > { %8098 = dma.hbm_to_vmem [thread:$0]  (!%p9228_p6), %s10263_s6, 1024, %s836_s10, [#allocation15], %s10206_s3, %s10206_s3, %s10207_s21  }
  0xed   : > { %p8697_p9 = pnand %p8695_p11, %p9238_p7  ;;  %p8704_p4 = por %p8703_p12, %p8702_p10 }
  0xef   : > { %p8698_p1 = pneg %p8697_p9 }
  0xf1   : > { %p8705_p13 = pnand %p8704_p4, %p8698_p1 }
  0xf3   : > { %8708 = shalt.err (!%p8705_p13)
}
  0xf4   : > { %8104 = dma.hbm_to_vmem [thread:$0]  (!%p9228_p6), %s9120_s20, 1024, %s862_s8, [#allocation18], %s10206_s3, %s10206_s3, %s10207_s21  }
  0xf5   : > { %s8720_s10 = scalar_lea.vmem %s891_s17, 32  ;;  %p8728_p8 = scmp.lt.s32.totalorder %s891_s17, %s891_s17 }
  0xf6   : > { %p8721_p0 = scmp.ne.s32.totalorder %s891_s17, %s8720_s10  ;;  %p8729_p3 = scmp.lt.s32.totalorder %s8720_s10, %s8720_s10 }
  0xf8   : > { %p8723_p2 = pnand %p8721_p0, %p9238_p7  ;;  %p8730_p11 = por %p8729_p3, %p8728_p8 }
  0xfa   : > { %p8724_p5 = pneg %p8723_p2 }
  0xfc   : > { %p8731_p9 = pnand %p8730_p11, %p8724_p5 }
  0xfe   : > { %8734 = shalt.err (!%p8731_p9)
}
  0xff   : > { %s10264_s1 = smov 1   ;;  %s10265_s28 = sld [smem:[#allocation60_spill]] }
 0x100   : > { %s9021_s11 = smov [#allocation25]   ;;  %s9022_s25 = smov [#allocation28]  }
 0x101   : > { %s919_s8 = sshll.u32 %s9021_s11, 4  ;;  %s945_s3 = sshll.u32 %s9022_s25, 4  ;;  %s920_s8 = int_to_ptr.vmem [resolvable:$true] %s919_s8  ;;  %s946_s3 = int_to_ptr.vmem [resolvable:$true] %s945_s3 }
 0x102   : > { %s8746_s21 = scalar_lea.vmem %s920_s8, 32  ;;  %p8754_p4 = scmp.lt.s32.totalorder %s920_s8, %s920_s8 }
 0x103   : > { %p8747_p1 = scmp.ne.s32.totalorder %s920_s8, %s8746_s21  ;;  %p8755_p13 = scmp.lt.s32.totalorder %s8746_s21, %s8746_s21 }
 0x105   : > { %8110 = dma.hbm_to_vmem [thread:$0]  (!%p9228_p6), %s10265_s28, 32, %s891_s17, [#allocation21], %s10262_s22, %s10262_s22, %s10264_s1  }
 0x106   : > { %p8749_p10 = pnand %p8747_p1, %p9238_p7  ;;  %p8756_p0 = por %p8755_p13, %p8754_p4 }
 0x108   : > { %p8750_p12 = pneg %p8749_p10 }
 0x10a   : > { %p8757_p2 = pnand %p8756_p0, %p8750_p12 }
 0x10c   : > { %8760 = shalt.err (!%p8757_p2)
}
 0x10d   : > { %s10266_s17 = sld [smem:[#allocation63_spill]]  ;;  %s8772_s10 = scalar_lea.vmem %s946_s3, 32 }
 0x10e   : > { %p8773_p5 = scmp.ne.s32.totalorder %s946_s3, %s8772_s10  ;;  %p8780_p11 = scmp.lt.s32.totalorder %s946_s3, %s946_s3 }
 0x10f   : > { %p8781_p9 = scmp.lt.s32.totalorder %s8772_s10, %s8772_s10 }
 0x110   : > { %p8775_p8 = pnand %p8773_p5, %p9238_p7 }
 0x111   : > { %p8782_p1 = por %p8781_p9, %p8780_p11 }
 0x112   : > { %p8776_p3 = pneg %p8775_p8 }
 0x113   : > { %8116 = dma.hbm_to_vmem [thread:$0]  (!%p9228_p6), %s10266_s17, 32, %s920_s8, [#allocation24], %s10262_s22, %s10262_s22, %s10264_s1  }
 0x114   : > { %p8783_p10 = pnand %p8782_p1, %p8776_p3 }
 0x116   : > { %8786 = shalt.err (!%p8783_p10)
}
 0x117   : > { %s10267_s21 = sld [smem:[#allocation65_spill]]  ;;  %s9023_s28 = smov [#allocation31]  }
 0x118   : > { %s971_s11 = sshll.u32 %s9023_s28, 4  ;;  %s9024_s8 = smov [#allocation34]   ;;  %s972_s11 = int_to_ptr.vmem [resolvable:$true] %s971_s11 }
 0x119   : > { %s1001_s25 = sshll.u32 %s9024_s8, 4  ;;  %s8798_s17 = scalar_lea.vmem %s972_s11, 32  ;;  %s1002_s25 = int_to_ptr.vmem [resolvable:$true] %s1001_s25 }
 0x11a   : > { %p8799_p12 = scmp.ne.s32.totalorder %s972_s11, %s8798_s17  ;;  %p8806_p0 = scmp.lt.s32.totalorder %s972_s11, %s972_s11 }
 0x11b   : > { %p8807_p2 = scmp.lt.s32.totalorder %s8798_s17, %s8798_s17 }
 0x11c   : > { %p8801_p4 = pnand %p8799_p12, %p9238_p7 }
 0x11d   : > { %8122 = dma.hbm_to_vmem [thread:$0]  (!%p9228_p6), %s10267_s21, 32, %s946_s3, [#allocation27], %s10262_s22, %s10262_s22, %s10264_s1  }
 0x11e   : > { %p8802_p13 = pneg %p8801_p4  ;;  %p8808_p5 = por %p8807_p2, %p8806_p0 }
 0x120   : > { %p8809_p8 = pnand %p8808_p5, %p8802_p13 }
 0x122   : > { %8812 = shalt.err (!%p8809_p8)
}
 0x123   : > { %s10268_s3 = sld [smem:[#allocation67_spill]]  ;;  %s8824_s10 = scalar_lea.vmem %s1002_s25, 16 }
 0x124   : > { %p8825_p3 = scmp.ne.s32.totalorder %s1002_s25, %s8824_s10  ;;  %s8831_s21 = scalar_lea.vmem %s1002_s25, 32 }
 0x125   : > { %p8832_p1 = scmp.lt.s32.totalorder %s1002_s25, %s1002_s25  ;;  %p8833_p10 = scmp.lt.s32.totalorder %s8831_s21, %s8824_s10 }
 0x126   : > { %p8827_p11 = pnand %p8825_p3, %p9238_p7 }
 0x127   : > { %p8834_p12 = por %p8833_p10, %p8832_p1 }
 0x128   : > { %p8828_p9 = pneg %p8827_p11 }
 0x129   : > { %8128 = dma.hbm_to_vmem [thread:$0]  (!%p9228_p6), %s10268_s3, 32, %s972_s11, [#allocation30], %s10262_s22, %s10262_s22, %s10264_s1  }
 0x12a   : > { %p8835_p4 = pnand %p8834_p12, %p8828_p9 }
 0x12c   : > { %8838 = shalt.err (!%p8835_p4)
}
 0x12d   : > { %8134 = dma.hbm_to_vmem [thread:$0]  (!%p9228_p6), %s9185_s24, 16, %s1002_s25, [#allocation33]  }
 0x12e   : > { %s7108_s2 = sadd.s32 4294967294, %s8971_s13   ;;  %s9397_s22 = sadd.s32 1, %s8971_s13  }
 0x12f   : > { %s93_s26 = sadd.s32 1, %s8967_s0  ;;  %s90_s1 = ssub.s32 %s8971_s13, %s9397_s22 }
 0x130   : > { %s10269_s28 = sld [smem:[#allocation48_spill]]  ;;  %p100_p7 = scmp.ne.s32.totalorder %s8967_s0, %s8963_s7 }
 0x131   : > { %p91_p13 = scmp.eq.s32.totalorder %s90_s1, 0  ;;  %p101_p0 = scmp.eq.s32.totalorder %s8971_s13, 0 }
 0x132   : > { %p106_p2 = scmp.ne.s32.totalorder %s8963_s7, %s8959_s5  ;;  %p718_p5 = scmp.eq.s32.totalorder %s9214_s15, 1 }
 0x133   : > { %s9409_s11 = scalar_select %p91_p13, %s8967_s0, %s93_s26  }
 0x134   : > { %p102_p8 = por %p101_p0, %p100_p7  ;;  %p10270_p3 = scmp.eq.s32.totalorder %s9214_s15, 0 }
 0x135   : > { %p9417_p6 = por %p718_p5, %p100_p7  ;;  %p724_p9 = scmp.eq.s32.totalorder %s7108_s2, 1 }
 0x136   : > { %p9413_p11 = por %p10270_p3, %p106_p2  ;;  %p8162_p1 = scmp.lt.s32.totalorder %s8971_s13, 2 }
 0x137   : > { %s10272_s25 = scalar_select %p9417_p6, 1, 0 }
 0x138   : > { %s10271_s8 = scalar_select %p9413_p11, 1, 0 }
 0x139   : > { %s1012_s17 = sand.u32 1, %s8967_s0   ;;  %p9423_p10 = por %p724_p9, %p106_p2 }
 0x13a   : > { %s7130_s10 = sshll.u32 %s1012_s17, 4  ;;  %s7338_s21 = sshll.u32 %s8971_s13, 8 }
 0x13b   : > { %s10273_s3 = scalar_select %p9423_p10, 1, 0 }
 0x13c   : > { %s9429_s26 = scalar_lea.hbm %s10269_s28, %s7338_s21  ;;  %s1016_s1 = scalar_lea.vmem [#allocation3], %s7130_s10 }
 0x13d   : > { %s1023_s4 = sshll.u32 %s1016_s1, 4  ;;  %p9431_p12 = pnand %p8162_p1, %p102_p8  ;;  %s9435_s4 = int_to_ptr.vmem [resolvable:$true] %s1023_s4 }
 0x13e   : > { %s9437_s2 = scalar_lea.sflag [#allocation4], %s1012_s17  ;;  %s8839_s9 = scalar_lea.hbm %s9429_s26, 256 }
 0x13f   : > { %p8840_p4 = scmp.ne.s32.totalorder %s9429_s26, %s8839_s9  ;;  %p8841_p7 = pneg %p9431_p12 }
 0x140   : > { %s8844_s21 = scalar_lea.hbm %s10269_s28, 512  ;;  %p8845_p2 = scmp.lt.s32.totalorder %s9429_s26, %s10269_s28 }
 0x141   : > { %p8842_p13 = pnand %p8841_p7, %p8840_p4  ;;  %p8846_p5 = scmp.lt.s32.totalorder %s8844_s21, %s8839_s9 }
 0x143   : > { %p8843_p0 = pneg %p8842_p13  ;;  %p8847_p3 = por %p8846_p5, %p8845_p2 }
 0x145   : > { %p8848_p9 = pnand %p8847_p3, %p8843_p0 }
 0x147   : > { %8851 = shalt.err (!%p8848_p9)
}
 0x148   : > { %s8852_s10 = scalar_lea.vmem %s9435_s4, 256  ;;  %s9025_s17 = smov [#allocation3]  }
 0x149   : > { %p8853_p8 = scmp.ne.s32.totalorder %s9435_s4, %s8852_s10  ;;  %s8857_s1 = sshll.u32 %s9025_s17, 4  ;;  %s8858_s1 = int_to_ptr.vmem [resolvable:$false] %s8857_s1 }
 0x14a   : > { %s8859_s12 = scalar_lea.vmem %s8858_s1, 512  ;;  %p8860_p6 = scmp.lt.s32.totalorder %s9435_s4, %s8858_s1 }
 0x14b   : > { %p8855_p1 = pnand %p8853_p8, %p8841_p7  ;;  %p8861_p4 = scmp.lt.s32.totalorder %s8859_s12, %s8852_s10 }
 0x14d   : > { %p8856_p10 = pneg %p8855_p1  ;;  %p8862_p13 = por %p8861_p4, %p8860_p6 }
 0x14f   : > { %p8863_p11 = pnand %p8862_p13, %p8856_p10 }
 0x151   : > { %8866 = shalt.err (!%p8863_p11)
}
 0x152   : > { %s10275_s9 = smov 8   ;;  %s10276_s21 = smov 128  }
 0x153   : > { %8138 = dma.hbm_to_vmem [thread:$0]  (!%p9431_p12), %s9429_s26, 256, %s9435_s4, %s9437_s2, %s10276_s21, %s10276_s21, %s10275_s9  }
 0x154   : > { %p10277_p7 = scmp.ne.s32.totalorder %s10251_s18, 0 }
 0x155   : > { %s9460_s17 = sand.u32 (!%p10277_p7), 1, %s8963_s7   ;;  %p10278_p11 = scmp.ne.s32.totalorder (!%p10277_p7), %s10271_s8, 0 }
 0x156   : > { %1035 = sbr.rel (%p10277_p7) target bundleno = 13434 (0x347a), region = 136  ;;  %s7134_s12 = sshll.u32 (!%p10277_p7), %s9460_s17, 4 }
 0x157   : > { %s1038_s10 = scalar_lea.sflag (!%p10277_p7), [#allocation4], %s9460_s17  ;;  %s1041_s1 = scalar_lea.vmem (!%p10277_p7), [#allocation3], %s7134_s12 }
 0x15b   : > { %8910 = dma.done.wait (%p10278_p11), %s1038_s10, 256  }
 0x15c   : > { %8912 = vsyncadd (%p10278_p11), %s1038_s10, 4294967040  ;;  %p10279_p6 = scmp.eq.s32.totalorder %s9214_s15, 0 }
 0x15e   : > { %8914 = dma.done.wait (%p10279_p6), [#allocation6], 16   ;;  %p10280_p10 = pmov %p10279_p6 }
 0x15f   : > { %p10281_p12 = pmov %p10279_p6 }
 0x160   : > { %8916 = vsyncadd (%p10280_p10), [#allocation6], 4294967280 }
 0x161   : > { %8918 = dma.done.wait (%p10281_p12), [#allocation9], 160   ;;  %p10282_p0 = pmov %p10279_p6 }
 0x163   : > { %8920 = vsyncadd (%p10282_p0), [#allocation9], 4294967136  ;;  %p10283_p2 = pmov %p10282_p0 }
 0x164   : > { %p10284_p5 = pmov %p10282_p0 }
 0x165   : > { %8922 = dma.done.wait (%p10283_p2), [#allocation12], 64  }
 0x166   : > { %8924 = vsyncadd (%p10284_p5), [#allocation12], 4294967232  ;;  %p10285_p3 = pmov %p10282_p0 }
 0x167   : > { %p10286_p9 = pmov %p10282_p0 }
 0x168   : > { %8926 = dma.done.wait (%p10285_p3), [#allocation15], 1056  }
 0x169   : > { %8928 = vsyncadd (%p10286_p9), [#allocation15], 4294966240  ;;  %p10287_p8 = pmov %p10282_p0 }
 0x16a   : > { %p10288_p1 = pmov %p10282_p0 }
 0x16b   : > { %8930 = dma.done.wait (%p10287_p8), [#allocation18], 1056  }
 0x16c   : > { %8932 = vsyncadd (%p10288_p1), [#allocation18], 4294966240  ;;  %p10289_p4 = pmov %p10282_p0 }
 0x16d   : > { %p10290_p13 = pmov %p10282_p0 }
 0x16e   : > { %8934 = dma.done.wait (%p10289_p4), [#allocation21], 64  }
 0x16f   : > { %8936 = vsyncadd (%p10290_p13), [#allocation21], 4294967232  ;;  %p10291_p7 = pmov %p10282_p0 }
 0x170   : > { %p10292_p11 = pmov %p10282_p0 }
 0x171   : > { %8938 = dma.done.wait (%p10291_p7), [#allocation24], 64  }
 0x172   : > { %8940 = vsyncadd (%p10292_p11), [#allocation24], 4294967232  ;;  %p10293_p6 = pmov %p10282_p0 }
 0x173   : > { %p10294_p10 = pmov %p10282_p0 }
 0x174   : > { %8942 = dma.done.wait (%p10293_p6), [#allocation27], 64  }
 0x175   : > { %8944 = vsyncadd (%p10294_p10), [#allocation27], 4294967232  ;;  %p10295_p12 = pmov %p10282_p0 }
 0x177   : > { %8946 = dma.done.wait (%p10295_p12), [#allocation30], 64  }
 0x178   : > { %8948 = vsyncadd (%p10282_p0), [#allocation30], 4294967232  ;;  %p10296_p2 = pmov %p10282_p0 }
 0x179   : > { %p10297_p5 = pmov %p10282_p0 }
 0x17a   : > { %8950 = dma.done.wait (%p10296_p2), [#allocation33], 48  }
 0x17b   : > { %8952 = vsyncadd (%p10297_p5), [#allocation33], 4294967248 }
 0x17c   : > { %1122 = sfence }
 0x17d   : > { %v9508_v0 = vld [vmem:[%s1041_s1 + $0x8] sm:$0xff]  ;;  %v9510_v1 = vld [vmem:[%s1041_s1] sm:$0xff]  ;;  %v1195_v2 = vlaneseq  ;;  %vm1208_vm0 = vcmask 130048   ;;  %v9026_v10 = vmov 0.0   ;;  %v9027_v18 = vmov 1.0   ;;  %s1379_s6 = sld [smem:[#allocation7]] }
 0x17e   : > { %7541 = vmatprep.subr.mxu0 %v9508_v0  ;;  %s7163_s4 = sld [smem:[#allocation7 + $0x3]]  ;;  %vm1426_vm13 = vcmask 261120   ;;  %vm9028_vm14 = vmmov 0   ;;  %v9561_v62 = vld [vmem:[#allocation8] sm:$0xff]  ;;  %vm1809_vm15 = vcmask 64512   ;;  %p10313_p9 = scmp.ne.s32.totalorder %s10272_s25, 0 }
 0x17f   : > { %7542 = vmatpush3.msra.mxu0 %v9508_v0  ;;  %v1196_v3 = vshrl.u32 %v1195_v2, 7  ;;  %v1199_v4 = vand.u32 127, %v1195_v2  ;;  %s9530_s18 = sld [smem:[#allocation7 + $0x1]] }
 0x180   : > { %7543 = vmatprep.subr.mxu0 %v9510_v1  ;;  %s9532_s8 = sld [smem:[#allocation7 + $0x4]] }
 0x181   : > { %7544 = vmatpush3.msra.mxu0 %v9510_v1  ;;  %v1200_v5 = vadd.s32 4294967295, %v1196_v3  ;;  %v1197_v6 = vadd.s32 8, %v1196_v3  ;;  %v1290_v7 = vadd.s32 1, %v1196_v3  ;;  %v1396_v15 = vadd.s32 24, %v1196_v3  ;;  %s7178_s26 = sld [smem:[#allocation7 + $0x2]] }
 0x182   : > { %7548 = vmatprep.subr.mxu0 %v9508_v0  ;;  %v1397_v16 = vadd.s32 4294967295, %v1199_v4  ;;  %v1524_v17 = vadd.s32 1, %v1199_v4  ;;  %v1395_v19 = vadd.s32 16, %v1196_v3  ;;  %s7179_s2 = sld [smem:[#allocation7 + $0x5]] }
 0x183   : > { %vm1202_vm1 = vcmp.eq.s32.totalorder %v1199_v4, %v1200_v5  ;;  %v1201_v8 = vadd.s32 4294967295, %v1197_v6  ;;  %vm1292_vm2 = vcmp.eq.s32.totalorder %v1199_v4, %v1290_v7  ;;  %v1291_v9 = vadd.s32 1, %v1197_v6  ;;  %s9534_s9 = sld [smem:[#allocation7 + $0x7]] }
 0x184   : > { %v7155_v11 = vsel %vm1202_vm1, 1.0, %v9026_v10  ;;  %v7159_v12 = vsel %vm1292_vm2, 1.0, %v9026_v10  ;;  %vm1401_vm5 = vcmp.eq.s32.totalorder %v1396_v15, %v1397_v16  ;;  %vm1528_vm6 = vcmp.eq.s32.totalorder %v1396_v15, %v1524_v17  ;;  %s7164_s21 = sld [smem:[#allocation7 + $0x6]]  ;;  %v7191_v15 = vld [vmem:[#allocation10] ss:$0 sm:$0xff] }
 0x185   : > { %7545 = vmatprep.mubr.msk.f32.mxu0 %vm1208_vm0, %v7155_v11  ;;  %vm1203_vm3 = vcmp.eq.s32.totalorder %v1199_v4, %v1201_v8  ;;  %vm1293_vm4 = vcmp.eq.s32.totalorder %v1199_v4, %v1291_v9  ;;  %7566 = vmatprep.subr.msk.mxu1 %vm1528_vm6, %v9027_v18  ;;  %vm1400_vm7 = vcmp.eq.s32.totalorder %v1395_v19, %v1397_v16  ;;  %s9536_s12 = sld [smem:[#allocation7 + $0x8]]  ;;  %v1411_v20 = vstv %s9530_s18  ;;  %s10218_s18 = smov 88  }
 0x186   : > { %v7156_v13 = vsel %vm1203_vm3, 1.0, %v9026_v10  ;;  %v7160_v14 = vsel %vm1293_vm4, 1.0, %v9026_v10  ;;  %7567 = vmatpush3.msk.msra.mxu1 %vm1528_vm6, %v9027_v18  ;;  %vm1527_vm8 = vcmp.eq.s32.totalorder %v1395_v19, %v1524_v17  ;;  %vm1399_vm9 = vcmp.eq.s32.totalorder %v1197_v6, %v1397_v16  ;;  %s10298_s10 = sld [smem:[#allocation52_spill]] }
 0x187   : > { %7546 = vmatmul.mubr.msk.f32.vlgmr.msra.gmra.mxu0 %vm1208_vm0, %v7156_v13  ;;  %7568 = vmatprep.subr.msk.mxu1 %vm1527_vm8, %v9027_v18  ;;  %vm1526_vm10 = vcmp.eq.s32.totalorder %v1197_v6, %v1524_v17  ;;  %vm1398_vm11 = vcmp.eq.s32.totalorder %v1196_v3, %v1397_v16  ;;  %vm1525_vm12 = vcmp.eq.s32.totalorder %v1196_v3, %v1524_v17  ;;  %v1415_v21 = vstv %s9532_s8  ;;  %s10299_s1 = sld [smem:[#allocation53_spill]]  ;;  %s10214_s8 = smov 80  }
 0x188   : > { %7549 = vmatpush3.msra.mxu0 %v9508_v0  ;;  %7552 = vmatprep.mubr.msk.f32.mxu0 %vm1208_vm0, %v7159_v12  ;;  %v1384_v23 = vstv %s7163_s4  ;;  %v1380_v24 = vstv %s1379_s6  ;;  %v1509_v25 = vstv %s7178_s26  ;;  %v1513_v27 = vstv %s7179_s2  ;;  %s10222_s6 = smov 96   ;;  %s10220_s4 = smov 120  }
 0x189   : > { %7550 = vmatprep.subr.mxu0 %v9510_v1  ;;  %7569 = vmatpush3.msk.msra.mxu1 %vm1527_vm8, %v9027_v18  ;;  %v1421_v29 = vstv %s9534_s9  ;;  %v1417_v30 = vmul.f32 %v1415_v21, %v9508_v0  ;;  %v1386_v31 = vmul.f32 %v1384_v23, %v9508_v0  ;;  %v1385_v33 = vmul.f32 %v1384_v23, %v9510_v1  ;;  %s10216_s26 = smov 112   ;;  %s10300_s2 = sld [smem:[#allocation55_spill]] }
 0x18a   : > { %7551 = vmatpush3.msra.mxu0 %v9510_v1  ;;  %7570 = vmatprep.subr.msk.mxu1 %vm1526_vm10, %v9027_v18  ;;  %v1390_v34 = vstv %s7164_s21  ;;  %v1514_v39 = vmul.f32 %v1513_v27, %v9510_v1  ;;  %v1515_v41 = vmul.f32 %v1513_v27, %v9508_v0  ;;  %v1416_v2 = vmul.f32 %v1415_v21, %v9510_v1  ;;  %s10212_s9 = smov 104   ;;  %s10210_s21 = smov 72  }
 0x18b   : > { %7553 = vmatmul.mubr.msk.f32.vlgmr.msra.gmra.mxu0 %vm1208_vm0, %v7160_v14  ;;  %7555 = vmatprep.subr.msk.mxu0 %vm1401_vm5, %v9027_v18  ;;  %v1519_v38 = vstv %s9536_s12  ;;  %s10301_s12 = sld [smem:[#allocation50_spill]]  ;;  %vm4096_vm1 = vcmask 523264  }
 0x18c   : > { %7556 = vmatpush3.msk.msra.mxu0 %vm1401_vm5, %v9027_v18  ;;  %7571 = vmatpush3.msk.msra.mxu1 %vm1526_vm10, %v9027_v18  ;;  %v1635_v57 = vld [vmem:[%s10298_s10 + $0x18] sm:$0xff]  ;;  %v1634_v59 = vld [vmem:[%s10298_s10 + $0x10] sm:$0xff]  ;;  %v1633_v60 = vld [vmem:[%s10298_s10 + $0x8] sm:$0xff] }
 0x18d   : > { %7557 = vmatprep.subr.msk.mxu0 %vm1400_vm7, %v9027_v18  ;;  %7572 = vmatprep.subr.msk.mxu1 %vm1525_vm12, %v9027_v18  ;;  %v1632_v61 = vld [vmem:[%s10298_s10] sm:$0xff]  ;;  %v1719_v13 = vld [vmem:[%s10299_s1 + $0x18] sm:$0xff]  ;;  %v1718_v14 = vld [vmem:[%s10299_s1 + $0x10] sm:$0xff] }
 0x18e   : > { %7558 = vmatpush3.msk.msra.mxu0 %vm1400_vm7, %v9027_v18  ;;  %7573 = vmatpush3.msk.msra.mxu1 %vm1525_vm12, %v9027_v18  ;;  %v1717_v16 = vld [vmem:[%s10299_s1 + $0x8] sm:$0xff] }
 0x18f   : > { %7559 = vmatprep.subr.msk.mxu0 %vm1399_vm9, %v9027_v18  ;;  %7588 = vmatprep.subr.mxu1 %v9026_v10 }
 0x190   : > { %7560 = vmatpush3.msk.msra.mxu0 %vm1399_vm9, %v9027_v18 }
 0x191   : > { %7561 = vmatprep.subr.msk.mxu0 %vm1398_vm11, %v9027_v18 }
 0x192   : > { %7562 = vmatpush3.msk.msra.mxu0 %vm1398_vm11, %v9027_v18 }
 0x193   : > { %7577 = vmatprep.subr.mxu0 %v9026_v10 }
 0x247   : > { %v7547_v22 = vpop.f32.mrf.mxu0 }
 0x248   : > { %v1413_v26 = vmul.f32 %v7547_v22, %v1411_v20  ;;  %v1382_v35 = vmul.f32 %v7547_v22, %v1380_v24  ;;  %v1511_v40 = vmul.f32 %v7547_v22, %v1509_v25 }
 0x249   : > { %v1281_v28 = vpop.f32.mrf.mxu0 }
 0x24a   : > { %v1381_v32 = vmul.f32 %v1380_v24, %v1281_v28  ;;  %v1510_v36 = vmul.f32 %v1509_v25, %v1281_v28  ;;  %v1419_v45 = vadd.f32 %v1417_v30, %v1413_v26  ;;  %v1388_v49 = vadd.f32 %v1386_v31, %v1382_v35  ;;  %v1716_v24 = vld [vmem:[%s10299_s1] sm:$0xff] }
 0x24b   : > { %v7554_v37 = vpop.f32.mrf.mxu0  ;;  %v1517_v53 = vadd.f32 %v1515_v41, %v1511_v40  ;;  %v1412_v63 = vmul.f32 %v1411_v20, %v1281_v28 }
 0x24c   : > { %v1423_v42 = vmul.f32 %v7554_v37, %v1421_v29  ;;  %v1392_v43 = vmul.f32 %v7554_v37, %v1390_v34  ;;  %v1387_v46 = vadd.f32 %v1385_v33, %v1381_v32  ;;  %v1521_v47 = vmul.f32 %v7554_v37, %v1519_v38  ;;  %v7193_v32 = vld [vmem:[#allocation11] ss:$0 sm:$0xff] }
 0x24d   : > { %v1370_v44 = vpop.f32.mrf.mxu0  ;;  %v1516_v50 = vadd.f32 %v1514_v39, %v1510_v36  ;;  %v1418_v4 = vadd.f32 %v1416_v2, %v1412_v63 }
 0x24e   : > { %v1391_v48 = vmul.f32 %v1390_v34, %v1370_v44  ;;  %v1520_v51 = vmul.f32 %v1519_v38, %v1370_v44  ;;  %v1425_v52 = vadd.f32 %v1423_v42, %v1419_v45  ;;  %v1394_v55 = vadd.f32 %v1392_v43, %v1388_v49 }
 0x24f   : > { %v1523_v58 = vadd.f32 %v1521_v47, %v1517_v53  ;;  %v1422_v3 = vmul.f32 %v1421_v29, %v1370_v44  ;;  %v1800_v53 = vld [vmem:[%s10300_s2] sm:$0xff] }
 0x250   : > { %v1393_v54 = vadd.f32 %v1391_v48, %v1387_v46  ;;  %v1522_v56 = vadd.f32 %v1520_v51, %v1516_v50 }
 0x251   : > { %v1424_v7 = vadd.f32 %v1422_v3, %v1418_v4 }
 0x252   : > { %7563 = vmatprep.mubr.msk.f32.mxu0 %vm1426_vm13, %v1393_v54  ;;  %7574 = vmatprep.mubr.msk.f32.mxu1 %vm1426_vm13, %v1522_v56  ;;  %v1801_v54 = vld [vmem:[%s10300_s2 + $0x8] sm:$0xff] }
 0x253   : > { %7564 = vmatmul.mubr.msk.f32.vlgmr.msra.gmra.mxu0 %vm1426_vm13, %v1394_v55  ;;  %7575 = vmatmul.mubr.msk.f32.vlgmr.msra.gmra.mxu1 %vm1426_vm13, %v1523_v58 }
 0x254   : > { %7578 = vmatpush3.msra.mxu0 %v1635_v57  ;;  %7585 = vmatprep.mubr.msk.f32.mxu0 %vm9028_vm14, %v9026_v10 }
 0x255   : > { %7579 = vmatprep.subr.mxu0 %v9026_v10  ;;  %7596 = vmatprep.mubr.msk.f32.mxu1 %vm9028_vm14, %v9026_v10 }
 0x256   : > { %7580 = vmatpush3.msra.mxu0 %v1634_v59  ;;  %7589 = vmatpush3.msra.mxu1 %v1719_v13 }
 0x257   : > { %7581 = vmatprep.subr.mxu0 %v9026_v10  ;;  %7590 = vmatprep.subr.mxu1 %v9026_v10 }
 0x258   : > { %7582 = vmatpush3.msra.mxu0 %v1633_v60  ;;  %7591 = vmatpush3.msra.mxu1 %v1718_v14 }
 0x259   : > { %7583 = vmatprep.subr.mxu0 %v9026_v10  ;;  %7592 = vmatprep.subr.mxu1 %v9026_v10 }
 0x25a   : > { %7584 = vmatpush3.msra.mxu0 %v1632_v61  ;;  %7593 = vmatpush3.msra.mxu1 %v1717_v16 }
 0x25b   : > { %7586 = vmatmul.mubr.msk.f32.vlgmr.msra.gmra.mxu0 %vm1426_vm13, %v9561_v62  ;;  %7599 = vmatprep.subr.mxu0 %v9026_v10 }
 0x25c   : > { %7601 = vmatprep.mubr.msk.f32.mxu0 %vm9028_vm14, %v9026_v10  ;;  %7594 = vmatprep.subr.mxu1 %v9026_v10 }
 0x25d   : > { %7595 = vmatpush3.msra.mxu1 %v1716_v24 }
 0x25e   : > { %7597 = vmatmul.mubr.f32.vlgmr.msra.gmra.mxu1 %v9026_v10  ;;  %7604 = vmatprep.subr.mxu1 %v9026_v10 }
 0x25f   : > { %7606 = vmatprep.mubr.msk.f32.mxu1 %vm9028_vm14, %v9026_v10 }
 0x313   : > { %v7565_v5 = vpop.f32.mrf.mxu0  ;;  %v7576_v8 = vpop.f32.mrf.mxu1 }
 0x314   : > { %v1505_v6 = vadd.f32 %v7565_v5, %v1425_v52 }
 0x315   : > { %v1499_v9 = vpop.f32.mrf.mxu0  ;;  %v9609_v31 = vpop.f32.mrf.mxu1 }
 0x316   : > { %v9570_v11 = vadd.f32 %v7576_v8, %v1505_v6  ;;  %v9572_v12 = vadd.f32 %v1499_v9, %v1424_v7 }
 0x31b   : > { %v1712_v17 = vpop.f32.mrf.mxu0 }
 0x31c   : > { %v9578_v18 = vadd.f32 %v7191_v15, %v1712_v17 }
 0x31d   : > { %v7587_v19 = vpop.f32.mrf.mxu0 }
 0x31e   : > { %1807 = vrot.lane.b32.xlu0 %v9578_v18, %s10222_s6  ;;  %v9584_v20 = vmul.f32 0.35355338, %v9578_v18  ;;  %v1796_v33 = vpop.f32.mrf.mxu1 }
 0x31f   : > { %v9611_v34 = vadd.f32 %v7193_v32, %v1796_v33 }
 0x320   : > { %1969 = vrot.lane.b32.xlu1 %v9584_v20, %s10220_s4  ;;  %v7598_v35 = vpop.f32.mrf.mxu1 }
 0x321   : > { %7605 = vmatpush3.msra.mxu1 %v9611_v34  ;;  %v1803_v35 = vld [vmem:[%s10300_s2 + $0x18] sm:$0xff] }
 0x322   : > { %1971 = vrot.lane.b32.xlu0 %v9578_v18, %s10218_s18  ;;  %7614 = vmatprep.subr.mxu1 %v9026_v10 }
 0x390   : > { %v1808_v21 = vpop.permute.xlu0 %1807 }
 0x391   : > { %7600 = vmatpush3.xpose.msk.msra.mxu0 %vm1809_vm15, %v1808_v21 }
 0x392   : > { %7609 = vmatprep.subr.mxu0 %v9026_v10  ;;  %v1970_v23 = vpop.permute.xlu1 %1969 }
 0x394   : > { %v1972_v22 = vpop.permute.xlu0 %1971  ;;  %7602 = vmatmul.mubr.msk.f32.vlgmr.msra.gmra.mxu0 %vm1809_vm15, %v9584_v20 }
 0x395   : > { %7610 = vmatpush3.xpose.msk.msra.mxu0 %vm1809_vm15, %v1972_v22  ;;  %7611 = vmatprep.mubr.msk.f32.mxu0 %vm9028_vm14, %v9026_v10 }
 0x396   : > { %7619 = vmatprep.subr.mxu0 %v9026_v10 }
 0x398   : > { %7612 = vmatmul.mubr.msk.f32.vlgmr.msra.gmra.mxu0 %vm1809_vm15, %v1970_v23 }
 0x399   : > { %7621 = vmatprep.mubr.msk.f32.mxu0 %vm9028_vm14, %v9026_v10  ;;  %7620 = vmatpush3.msra.mxu0 %v1801_v54 }
 0x39a   : > { %7629 = vmatprep.subr.mxu0 %v9026_v10 }
 0x454   : > { %v1881_v25 = vpop.f32.mrf.mxu0 }
 0x455   : > { %v1885_v26 = vsel %vm1809_vm15, %v1881_v25, -inf }
 0x456   : > { %1886 = vmax.xlane.f32.xlu1 %v1885_v26  ;;  %v7603_v27 = vpop.f32.mrf.mxu0 }
 0x458   : > { %v2043_v28 = vpop.f32.mrf.mxu0 }
 0x459   : > { %v2047_v29 = vsel %vm1809_vm15, %v2043_v28, -inf }
 0x45a   : > { %2048 = vmax.xlane.f32.xlu0 %v2047_v29  ;;  %v7613_v30 = vpop.f32.mrf.mxu0 }
 0x4df   : > { %v1887_v36 = vpop.xlane.xlu1 %1886 }
 0x4e0   : > { %v1888_v37 = vsub.f32 %v1881_v25, %v1887_v36 }
 0x4e2   : > { %v1889_v38 = vmul.f32 1.442695, %v1888_v37 }
 0x4e3   : > { %v2049_v39 = vpop.xlane.xlu0 %2048 }
 0x4e4   : > { %8277 = vpow2.f32 %v1889_v38  ;;  %v2050_v40 = vsub.f32 %v2043_v28, %v2049_v39 }
 0x4e6   : > { %v2051_v41 = vmul.f32 1.442695, %v2050_v40 }
 0x4e8   : > { %8279 = vpow2.f32 %v2051_v41 }
 0x4f1   : > { %v8278_v42 = vpop.eup %8277 }
 0x4f2   : > { %v1891_v43 = vsel %vm1809_vm15, %v8278_v42, 0.0 }
 0x4f3   : > { %1892 = vadd.xlane.f32.xlu0 %v1891_v43  ;;  %v1618_v43 = vadd.f32 %v9609_v31, %v9572_v12  ;;  %v2883_v12 = vld [vmem:[#allocation16 + $0x8] sm:$0xff] }
 0x4f5   : > { %v8280_v44 = vpop.eup %8279 }
 0x4f6   : > { %v2053_v45 = vsel %vm1809_vm15, %v8280_v44, 0.0 }
 0x4f7   : > { %2054 = vadd.xlane.f32.xlu1 %v2053_v45 }
 0x508   : > { %2283 = vrot.lane.b32.xlu1 %v9578_v18, %s10214_s8 }
 0x509   : > { %2059 = vrot.lane.b32.xlu0 %v9611_v34, %s10220_s4 }
 0x50c   : > { %2281 = vrot.lane.b32.xlu1 %v9584_v20, %s10216_s26 }
 0x57c   : > { %v1893_v46 = vpop.xlane.xlu0 %1892 }
 0x57d   : > { %8281 = vrcp.f32 %v1893_v46 }
 0x580   : > { %v2055_v47 = vpop.xlane.xlu1 %2054  ;;  %v2060_v50 = vpop.permute.xlu0 %2059 }
 0x581   : > { %8283 = vrcp.f32 %v2055_v47  ;;  %v1626_v47 = vld [vmem:[%s10301_s12] sm:$0xff] }
 0x584   : > { %v2284_v56 = vpop.permute.xlu1 %2283 }
 0x588   : > { %v2282_v60 = vpop.permute.xlu1 %2281 }
 0x58a   : > { %v8282_v48 = vpop.eup %8281 }
 0x58b   : > { %v1895_v49 = vmul.f32 %v8282_v48, %v8278_v42 }
 0x58d   : > { %7607 = vmatmul.mubr.msk.f32.vlgmr.msra.gmra.mxu1 %vm1809_vm15, %v1895_v49 }
 0x58e   : > { %v8284_v51 = vpop.eup %8283  ;;  %7615 = vmatpush3.msra.mxu1 %v2060_v50  ;;  %7616 = vmatprep.mubr.msk.f32.mxu1 %vm9028_vm14, %v9026_v10 }
 0x58f   : > { %v2057_v52 = vmul.f32 %v8284_v51, %v8280_v44  ;;  %7624 = vmatprep.subr.mxu1 %v9026_v10  ;;  %v2884_v51 = vld [vmem:[#allocation16 + $0x10] sm:$0xff] }
 0x591   : > { %7617 = vmatmul.mubr.msk.f32.vlgmr.msra.gmra.mxu1 %vm1809_vm15, %v2057_v52 }
 0x592   : > { %7626 = vmatprep.mubr.msk.f32.mxu1 %vm9028_vm14, %v9026_v10  ;;  %7625 = vmatpush3.msra.mxu1 %v1800_v53  ;;  %v1627_v53 = vld [vmem:[%s10301_s12 + $0x8] sm:$0xff]  ;;  %s9036_s12 = smov [#allocation35]  }
 0x593   : > { %7634 = vmatprep.subr.mxu1 %v9026_v10  ;;  %s8871_s14 = sshll.u32 %s9036_s12, 4  ;;  %s8872_s14 = int_to_ptr.vmem [resolvable:$false] %s8871_s14 }
 0x594   : > { %s8873_s16 = scalar_lea.vmem %s8872_s14, 256 }
 0x64d   : > { %v1965_v55 = vpop.f32.mrf.mxu1 }
 0x64e   : > { %7627 = vmatmul.mubr.msk.f32.vlgmr.msra.gmra.mxu1 %vm1809_vm15, %v1965_v55 }
 0x64f   : > { %v7608_v57 = vpop.f32.mrf.mxu1  ;;  %7636 = vmatprep.mubr.msk.f32.mxu1 %vm9028_vm14, %v9026_v10 }
 0x651   : > { %v2131_v58 = vpop.f32.mrf.mxu1 }
 0x652   : > { %7622 = vmatmul.mubr.msk.f32.vlgmr.msra.gmra.mxu0 %vm1809_vm15, %v2131_v58 }
 0x653   : > { %7630 = vmatpush3.xpose.msk.msra.mxu0 %vm1809_vm15, %v2284_v56  ;;  %v7618_v59 = vpop.f32.mrf.mxu1  ;;  %7631 = vmatprep.mubr.msk.f32.mxu0 %vm9028_vm14, %v9026_v10 }
 0x654   : > { %7639 = vmatprep.subr.mxu0 %v9026_v10 }
 0x656   : > { %7632 = vmatmul.mubr.msk.f32.vlgmr.msra.gmra.mxu0 %vm1809_vm15, %v2282_v60  ;;  %v7215_v60 = vld [vmem:[#allocation17] ss:$0 sm:$0xff] }
 0x657   : > { %7641 = vmatprep.mubr.msk.f32.mxu0 %vm9028_vm14, %v9026_v10 }
 0x70e   : > { %v2277_v61 = vpop.f32.mrf.mxu1 }
 0x710   : > { %v7628_v63 = vpop.f32.mrf.mxu1 }
 0x712   : > { %v2204_v2 = vpop.f32.mrf.mxu0 }
 0x713   : > { %v2278_v3 = vadd.f32 %v2277_v61, %v2204_v2 }
 0x714   : > { %v7623_v4 = vpop.f32.mrf.mxu0 }
 0x716   : > { %v2355_v5 = vpop.f32.mrf.mxu0 }
 0x717   : > { %v2359_v6 = vsel %vm1809_vm15, %v2355_v5, -inf }
 0x718   : > { %2360 = vmax.xlane.f32.xlu0 %v2359_v6  ;;  %v7633_v7 = vpop.f32.mrf.mxu0 }
 0x72e   : > { %2370 = vrot.lane.b32.xlu0 %v9611_v34, %s10216_s26 }
 0x732   : > { %2520 = vrot.lane.b32.xlu0 %v9584_v20, %s10212_s9 }
 0x7a1   : > { %v2361_v8 = vpop.xlane.xlu0 %2360 }
 0x7a2   : > { %v2362_v9 = vsub.f32 %v2355_v5, %v2361_v8 }
 0x7a4   : > { %v2363_v13 = vmul.f32 1.442695, %v2362_v9 }
 0x7a5   : > { %v2371_v14 = vpop.permute.xlu0 %2370 }
 0x7a6   : > { %8285 = vpow2.f32 %v2363_v13  ;;  %7635 = vmatpush3.msra.mxu1 %v2371_v14 }
 0x7a7   : > { %7644 = vmatprep.subr.mxu1 %v9026_v10 }
 0x7a9   : > { %v2521_v22 = vpop.permute.xlu0 %2520 }
 0x7b3   : > { %v8286_v15 = vpop.eup %8285 }
 0x7b4   : > { %v2365_v16 = vsel %vm1809_vm15, %v8286_v15, 0.0 }
 0x7b5   : > { %2366 = vadd.xlane.f32.xlu1 %v2365_v16 }
 0x7c6   : > { %2522 = vrot.lane.b32.xlu1 %v9578_v18, %s10210_s21  ;;  %v1802_v18 = vld [vmem:[%s10300_s2 + $0x10] sm:$0xff]  ;;  %s1620_s21 = sld [smem:[#allocation2]] }
 0x7c7   : > { %7640 = vmatpush3.msra.mxu0 %v1802_v18 }
 0x7c8   : > { %7649 = vmatprep.subr.mxu0 %v9026_v10 }
 0x7cc   : > { %v1621_v44 = vstv %s1620_s21  ;;  %s10302_s21 = sld [smem:[#allocation56_spill]] }
 0x7cd   : > { %v1622_v45 = vadd.f32 %v1621_v44, %v1618_v43  ;;  %v1623_v48 = vadd.f32 %v1621_v44, %v9570_v11 }
 0x7cf   : > { %v1624_v46 = vadd.f32 %v1622_v45, %v9510_v1  ;;  %v1625_v31 = vadd.f32 %v1623_v48, %v9508_v0  ;;  %v2882_v1 = vld [vmem:[#allocation16] sm:$0xff]  ;;  %v7210_v0 = vld [vmem:[#allocation13] ss:$0 sm:$0xff] }
 0x7d1   : > { %v9681_v49 = vadd.f32 %v1626_v47, %v1624_v46  ;;  %v9688_v11 = vadd.f32 %v1627_v53, %v1625_v31  ;;  %v2974_v46 = vld [vmem:[#allocation19] sm:$0xff] }
 0x7d2   : > { %v2801_v8 = vld [vmem:[%s10302_s21 + $0x18] sm:$0xff]  ;;  %v2800_v9 = vld [vmem:[%s10302_s21 + $0x10] sm:$0xff]  ;;  %v2799_v13 = vld [vmem:[%s10302_s21 + $0x8] sm:$0xff] }
 0x7d3   : > { %v2798_v14 = vld [vmem:[%s10302_s21] sm:$0xff] }
 0x83e   : > { %v2367_v17 = vpop.xlane.xlu1 %2366 }
 0x83f   : > { %8287 = vrcp.f32 %v2367_v17 }
 0x842   : > { %v2523_v21 = vpop.permute.xlu1 %2522 }
 0x84c   : > { %v8288_v19 = vpop.eup %8287 }
 0x84d   : > { %v2369_v20 = vmul.f32 %v8288_v19, %v8286_v15 }
 0x84f   : > { %7637 = vmatmul.mubr.msk.f32.vlgmr.msra.gmra.mxu1 %vm1809_vm15, %v2369_v20  ;;  %v7211_v20 = vld [vmem:[#allocation25] ss:$0 sm:$0xff] }
 0x850   : > { %7645 = vmatpush3.xpose.msk.msra.mxu1 %vm1809_vm15, %v2523_v21  ;;  %7646 = vmatprep.mubr.msk.f32.mxu1 %vm9028_vm14, %v9026_v10 }
 0x851   : > { %7654 = vmatprep.subr.mxu1 %v9026_v10 }
 0x853   : > { %7647 = vmatmul.mubr.msk.f32.vlgmr.msra.gmra.mxu1 %vm1809_vm15, %v2521_v22  ;;  %v7212_v22 = vld [vmem:[#allocation26] ss:$0 sm:$0xff] }
 0x854   : > { %7656 = vmatprep.mubr.msk.f32.mxu1 %vm9028_vm14, %v9026_v10  ;;  %7655 = vmatpush3.msra.mxu1 %v1803_v35 }
 0x90f   : > { %v2442_v23 = vpop.f32.mrf.mxu1 }
 0x910   : > { %7642 = vmatmul.mubr.msk.f32.vlgmr.msra.gmra.mxu0 %vm1809_vm15, %v2442_v23 }
 0x911   : > { %v7638_v24 = vpop.f32.mrf.mxu1  ;;  %7651 = vmatprep.mubr.msk.f32.mxu0 %vm9028_vm14, %v9026_v10 }
 0x913   : > { %v2594_v25 = vpop.f32.mrf.mxu1 }
 0x914   : > { %v2598_v26 = vsel %vm1809_vm15, %v2594_v25, -inf }
 0x915   : > { %2599 = vmax.xlane.f32.xlu1 %v2598_v26  ;;  %v7648_v27 = vpop.f32.mrf.mxu1 }
 0x99e   : > { %v2600_v28 = vpop.xlane.xlu1 %2599 }
 0x99f   : > { %v2601_v29 = vsub.f32 %v2594_v25, %v2600_v28  ;;  %v7213_v25 = vld [vmem:[#allocation14] ss:$0 sm:$0xff] }
 0x9a1   : > { %v2602_v30 = vmul.f32 1.442695, %v2601_v29 }
 0x9a3   : > { %8289 = vpow2.f32 %v2602_v30 }
 0x9b0   : > { %v8290_v32 = vpop.eup %8289 }
 0x9b1   : > { %v2604_v33 = vsel %vm1809_vm15, %v8290_v32, 0.0 }
 0x9b2   : > { %2605 = vadd.xlane.f32.xlu0 %v2604_v33 }
 0x9c8   : > { %2609 = vrot.lane.b32.xlu0 %v9611_v34, %s10212_s9  ;;  %v2885_v34 = vld [vmem:[#allocation16 + $0x18] sm:$0xff] }
 0x9c9   : > { %7670 = vmatprep.subr.mxu1 %v2885_v34 }
 0x9d0   : > { %v2515_v36 = vpop.f32.mrf.mxu0 }
 0x9d1   : > { %v2519_v37 = vadd.f32 %v2515_v36, %v2278_v3 }
 0x9d2   : > { %v7643_v38 = vpop.f32.mrf.mxu0 }
 0xa3b   : > { %v2606_v39 = vpop.xlane.xlu0 %2605 }
 0xa3c   : > { %8291 = vrcp.f32 %v2606_v39 }
 0xa3f   : > { %v2610_v40 = vpop.permute.xlu0 %2609 }
 0xa40   : > { %7650 = vmatpush3.msra.mxu0 %v2610_v40 }
 0xa41   : > { %7659 = vmatprep.subr.mxu0 %v9026_v10 }
 0xa49   : > { %v8292_v41 = vpop.eup %8291 }
 0xa4a   : > { %v2608_v42 = vmul.f32 %v8292_v41, %v8290_v32 }
 0xa4c   : > { %7652 = vmatmul.mubr.msk.f32.vlgmr.msra.gmra.mxu0 %vm1809_vm15, %v2608_v42 }
 0xa4d   : > { %7667 = vmatprep.mubr.msk.f32.mxu0 %vm9028_vm14, %v9026_v10  ;;  %7660 = vmatpush3.msra.mxu0 %v2801_v8 }
 0xa4e   : > { %7661 = vmatprep.subr.mxu0 %v9026_v10 }
 0xa4f   : > { %7662 = vmatpush3.msra.mxu0 %v2800_v9 }
 0xa50   : > { %7663 = vmatprep.subr.mxu0 %v9026_v10 }
 0xa51   : > { %7664 = vmatpush3.msra.mxu0 %v2799_v13 }
 0xa52   : > { %7665 = vmatprep.subr.mxu0 %v9026_v10 }
 0xa53   : > { %7666 = vmatpush3.msra.mxu0 %v2798_v14 }
 0xa54   : > { %7681 = vmatprep.subr.mxu0 %v9026_v10 }
 0xb0c   : > { %v2681_v50 = vpop.f32.mrf.mxu0 }
 0xb0d   : > { %7657 = vmatmul.mubr.msk.f32.vlgmr.msra.gmra.mxu1 %vm1809_vm15, %v2681_v50 }
 0xb0e   : > { %7671 = vmatpush3.msra.mxu1 %v2885_v34  ;;  %v7653_v52 = vpop.f32.mrf.mxu0  ;;  %7678 = vmatprep.mubr.msk.f32.mxu1 %vm1426_vm13, %v9681_v49 }
 0xb0f   : > { %7672 = vmatprep.subr.mxu1 %v2884_v51 }
 0xb10   : > { %7673 = vmatpush3.msra.mxu1 %v2884_v51 }
 0xb11   : > { %7674 = vmatprep.subr.mxu1 %v2883_v12 }
 0xb12   : > { %7675 = vmatpush3.msra.mxu1 %v2883_v12 }
 0xb13   : > { %7676 = vmatprep.subr.mxu1 %v2882_v1 }
 0xb14   : > { %7677 = vmatpush3.msra.mxu1 %v2882_v1 }
 0xb15   : > { %7679 = vmatmul.mubr.msk.f32.vlgmr.msra.gmra.mxu1 %vm1426_vm13, %v9688_v11  ;;  %7688 = vmatprep.subr.mxu1 %v9026_v10 }
 0xb16   : > { %7692 = vmatprep.mubr.msk.f32.mxu1 %vm9028_vm14, %v9026_v10 }
 0xbcd   : > { %v2754_v54 = vpop.f32.mrf.mxu1 }
 0xbce   : > { %v2758_v55 = vadd.f32 %v2754_v54, %v2519_v37 }
 0xbcf   : > { %v7658_v56 = vpop.f32.mrf.mxu1 }
 0xbd0   : > { %v2765_v57 = vadd.f32 %v7210_v0, %v2758_v55 }
 0xbd2   : > { %v2769_v58 = vsel %vm1426_vm13, %v2765_v57, 0.0 }
 0xbd3   : > { %2770 = vadd.xlane.f32.xlu1 %v2769_v58 }
 0xbd5   : > { %v7680_v59 = vpop.f32.mrf.mxu1 }
 0xbd6   : > { %v9700_v2 = vadd.f32 %v7680_v59, %v7215_v60 }
 0xbd7   : > { %v2965_v61 = vpop.f32.mrf.mxu1 }
 0xbd8   : > { %v9696_v63 = vadd.f32 %v7215_v60, %v2965_v61  ;;  %v2975_v61 = vld [vmem:[#allocation19 + $0x8] sm:$0xff] }
 0xbda   : > { %3070 = vrot.lane.b32.xlu0 %v9696_v63, %s10222_s6 }
 0xbde   : > { %3153 = vrot.lane.b32.xlu0 %v9700_v2, %s10220_s4 }
 0xbe2   : > { %3151 = vrot.lane.b32.xlu0 %v9696_v63, %s10220_s4 }
 0xc4c   : > { %v3071_v41 = vpop.permute.xlu0 %3070 }
 0xc50   : > { %v3154_v34 = vpop.permute.xlu0 %3153 }
 0xc54   : > { %v3152_v44 = vpop.permute.xlu0 %3151 }
 0xc5c   : > { %v2771_v3 = vpop.xlane.xlu1 %2770 }
 0xc5d   : > { %v2773_v4 = vmul.f32 0.03125, %v2771_v3 }
 0xc5f   : > { %v2774_v5 = vsub.f32 %v2765_v57, %v2773_v4 }
 0xc61   : > { %v2775_v6 = vmul.f32 %v2774_v5, %v2774_v5 }
 0xc63   : > { %v2776_v7 = vsel %vm1426_vm13, %v2775_v6, 0.0 }
 0xc64   : > { %2777 = vadd.xlane.f32.xlu1 %v2776_v7 }
 0xced   : > { %v2778_v15 = vpop.xlane.xlu1 %2777 }
 0xcee   : > { %v2779_v16 = vmul.f32 0.03125, %v2778_v15 }
 0xcf0   : > { %v2780_v17 = vadd.f32 1e-05, %v2779_v16 }
 0xcf2   : > { %8293 = vrsqrt.f32 %v2780_v17 }
 0xcff   : > { %v8294_v19 = vpop.eup %8293 }
 0xd00   : > { %v2782_v21 = vmul.f32 %v8294_v19, %v2774_v5 }
 0xd02   : > { %v2789_v18 = vmul.f32 %v7211_v20, %v2782_v21 }
 0xd04   : > { %v9715_v23 = vadd.f32 %v7212_v22, %v2789_v18 }
 0xd06   : > { %v2797_v24 = vadd.f32 %v9715_v23, %v9561_v62 }
 0xd08   : > { %7668 = vmatmul.mubr.msk.f32.vlgmr.msra.gmra.mxu0 %vm1426_vm13, %v2797_v24 }
 0xd09   : > { %7682 = vmatpush3.xpose.msk.msra.mxu0 %vm1809_vm15, %v9700_v2  ;;  %7685 = vmatprep.mubr.msk.f32.mxu0 %vm9028_vm14, %v9026_v10 }
 0xd0a   : > { %7683 = vmatprep.subr.mxu0 %v9026_v10 }
 0xd0d   : > { %7684 = vmatpush3.xpose.msk.msra.mxu0 %vm1809_vm15, %v9696_v63 }
 0xd0e   : > { %7702 = vmatprep.subr.mxu0 %v9026_v10 }
 0xdc8   : > { %v2878_v26 = vpop.f32.mrf.mxu0 }
 0xdc9   : > { %v2879_v27 = vadd.f32 %v7213_v25, %v2878_v26 }
 0xdca   : > { %v7669_v28 = vpop.f32.mrf.mxu0 }
 0xdcb   : > { %v9728_v62 = vmul.f32 0.35355338, %v2879_v27 }
 0xdcd   : > { %3149 = vrot.lane.b32.xlu0 %v9728_v62, %s10220_s4  ;;  %7686 = vmatmul.mubr.msk.f32.vlgmr.msra.gmra.mxu0 %vm1809_vm15, %v9728_v62 }
 0xdce   : > { %7706 = vmatprep.mubr.msk.f32.mxu0 %vm9028_vm14, %v9026_v10 }
 0xe3f   : > { %v3150_v45 = vpop.permute.xlu0 %3149 }
 0xe8d   : > { %v3055_v29 = vpop.f32.mrf.mxu0 }
 0xe8e   : > { %v3059_v30 = vsel %vm1208_vm0, %v3055_v29, -inf }
 0xe8f   : > { %3060 = vmax.xlane.f32.xlu1 %v3059_v30  ;;  %v7687_v32 = vpop.f32.mrf.mxu0 }
 0xf18   : > { %v3061_v33 = vpop.xlane.xlu1 %3060 }
 0xf19   : > { %v3062_v35 = vsub.f32 %v3055_v29, %v3061_v33 }
 0xf1b   : > { %v3063_v36 = vmul.f32 1.442695, %v3062_v35 }
 0xf1d   : > { %8295 = vpow2.f32 %v3063_v36 }
 0xf2a   : > { %v8296_v37 = vpop.eup %8295 }
 0xf2b   : > { %v3065_v38 = vsel %vm1208_vm0, %v8296_v37, 0.0 }
 0xf2c   : > { %3066 = vadd.xlane.f32.xlu1 %v3065_v38  ;;  %v2976_v38 = vld [vmem:[#allocation19 + $0x10] sm:$0xff] }
 0xf3d   : > { %3072 = vrot.lane.b32.xlu1 %v9700_v2, %s10222_s6 }
 0xfb5   : > { %v3067_v39 = vpop.xlane.xlu1 %3066 }
 0xfb6   : > { %8297 = vrcp.f32 %v3067_v39 }
 0xfb9   : > { %v3073_v40 = vpop.permute.xlu1 %3072 }
 0xfba   : > { %7689 = vmatpush3.msra.mxu1 %v3073_v40 }
 0xfbb   : > { %7690 = vmatprep.subr.mxu1 %v9026_v10 }
 0xfbc   : > { %7691 = vmatpush3.msra.mxu1 %v3071_v41 }
 0xfbd   : > { %7695 = vmatprep.subr.mxu1 %v9026_v10 }
 0xfc3   : > { %v8298_v42 = vpop.eup %8297 }
 0xfc4   : > { %v3069_v43 = vmul.f32 %v8298_v42, %v8296_v37 }
 0xfc6   : > { %7693 = vmatmul.mubr.msk.f32.vlgmr.msra.gmra.mxu1 %vm1208_vm0, %v3069_v43 }
 0xfc7   : > { %7696 = vmatpush3.xpose.msk.msra.mxu1 %vm1809_vm15, %v3154_v34  ;;  %7699 = vmatprep.mubr.msk.f32.mxu1 %vm9028_vm14, %v9026_v10 }
 0xfc8   : > { %7697 = vmatprep.subr.mxu1 %v9026_v10 }
 0xfcb   : > { %7698 = vmatpush3.xpose.msk.msra.mxu1 %vm1809_vm15, %v3152_v44  ;;  %v2977_v44 = vld [vmem:[#allocation19 + $0x18] sm:$0xff] }
 0xfcc   : > { %7714 = vmatprep.subr.mxu1 %v9026_v10 }
 0xfce   : > { %7700 = vmatmul.mubr.msk.f32.vlgmr.msra.gmra.mxu1 %vm1809_vm15, %v3150_v45 }
 0xfcf   : > { %7716 = vmatprep.mubr.msk.f32.mxu1 %vm9028_vm14, %v9026_v10  ;;  %7715 = vmatpush3.msra.mxu1 %v2974_v46 }
 0xfd0   : > { %7726 = vmatprep.subr.mxu1 %v9026_v10 }
0x1086   : > { %v3145_v47 = vpop.f32.mrf.mxu1 }
0x1087   : > { %7717 = vmatmul.mubr.msk.f32.vlgmr.msra.gmra.mxu1 %vm1809_vm15, %v3145_v47 }
0x1088   : > { %v7694_v48 = vpop.f32.mrf.mxu1  ;;  %7730 = vmatprep.mubr.msk.f32.mxu1 %vm9028_vm14, %v9026_v10 }
0x108e   : > { %v3227_v50 = vpop.f32.mrf.mxu1 }
0x108f   : > { %v3231_v51 = vsel %vm1208_vm0, %v3227_v50, -inf }
0x1090   : > { %3232 = vmax.xlane.f32.xlu1 %v3231_v51  ;;  %v7701_v52 = vpop.f32.mrf.mxu1 }
0x1091   : > { %v7238_v52 = vld [vmem:[#allocation20] ss:$0 sm:$0xff] }
0x10a1   : > { %3242 = vrot.lane.b32.xlu1 %v9696_v63, %s10218_s18 }
0x10a5   : > { %3471 = vrot.lane.b32.xlu1 %v9700_v2, %s10216_s26 }
0x10a9   : > { %3467 = vrot.lane.b32.xlu1 %v9728_v62, %s10216_s26 }
0x10ad   : > { %3715 = vrot.lane.b32.xlu1 %v9696_v63, %s10212_s9 }
0x1119   : > { %v3233_v12 = vpop.xlane.xlu1 %3232 }
0x111a   : > { %v3234_v31 = vsub.f32 %v3227_v50, %v3233_v12 }
0x111c   : > { %v3235_v53 = vmul.f32 1.442695, %v3234_v31 }
0x111d   : > { %v3243_v58 = vpop.permute.xlu1 %3242 }
0x111e   : > { %8299 = vpow2.f32 %v3235_v53 }
0x1121   : > { %v3472_v4 = vpop.permute.xlu1 %3471 }
0x1125   : > { %v3468_v7 = vpop.permute.xlu1 %3467 }
0x1129   : > { %v3716_v9 = vpop.permute.xlu1 %3715 }
0x112b   : > { %v8300_v1 = vpop.eup %8299 }
0x112c   : > { %v3237_v54 = vsel %vm1208_vm0, %v8300_v1, 0.0 }
0x112d   : > { %3238 = vadd.xlane.f32.xlu0 %v3237_v54 }
0x1143   : > { %3244 = vrot.lane.b32.xlu0 %v9700_v2, %s10218_s18 }
0x1147   : > { %3469 = vrot.lane.b32.xlu0 %v9696_v63, %s10216_s26  ;;  %v9770_v0 = vpop.f32.mrf.mxu1  ;;  %s10305_s26 = sld [smem:[#allocation61_spill]] }
0x1149   : > { %v7718_v55 = vpop.f32.mrf.mxu1 }
0x114b   : > { %3717 = vrot.lane.b32.xlu0 %v9700_v2, %s10212_s9 }
0x114f   : > { %3713 = vrot.lane.b32.xlu0 %v9728_v62, %s10212_s9  ;;  %s10303_s9 = smov 72  }
0x11b6   : > { %v3239_v56 = vpop.xlane.xlu0 %3238 }
0x11b7   : > { %8301 = vrcp.f32 %v3239_v56 }
0x11ba   : > { %v3245_v57 = vpop.permute.xlu0 %3244 }
0x11bb   : > { %7703 = vmatpush3.msra.mxu0 %v3245_v57 }
0x11bc   : > { %7704 = vmatprep.subr.mxu0 %v9026_v10 }
0x11bd   : > { %7705 = vmatpush3.msra.mxu0 %v3243_v58 }
0x11be   : > { %7709 = vmatprep.subr.mxu0 %v9026_v10  ;;  %v3470_v6 = vpop.permute.xlu0 %3469 }
0x11c2   : > { %v3718_v8 = vpop.permute.xlu0 %3717 }
0x11c4   : > { %v8302_v59 = vpop.eup %8301 }
0x11c5   : > { %v3241_v60 = vmul.f32 %v8302_v59, %v8300_v1 }
0x11c6   : > { %v3714_v13 = vpop.permute.xlu0 %3713 }
0x11c7   : > { %7707 = vmatmul.mubr.msk.f32.vlgmr.msra.gmra.mxu0 %vm1208_vm0, %v3241_v60 }
0x11c8   : > { %7710 = vmatpush3.msra.mxu0 %v2975_v61  ;;  %7711 = vmatprep.mubr.msk.f32.mxu0 %vm9028_vm14, %v9026_v10 }
0x11c9   : > { %7719 = vmatprep.subr.mxu0 %v9026_v10 }
0x1287   : > { %v3317_v3 = vpop.f32.mrf.mxu0 }
0x1288   : > { %7712 = vmatmul.mubr.msk.f32.vlgmr.msra.gmra.mxu0 %vm1809_vm15, %v3317_v3 }
0x1289   : > { %7720 = vmatpush3.xpose.msk.msra.mxu0 %vm1809_vm15, %v3472_v4  ;;  %v7708_v5 = vpop.f32.mrf.mxu0  ;;  %7723 = vmatprep.mubr.msk.f32.mxu0 %vm9028_vm14, %v9026_v10  ;;  %v4088_v4 = vld [vmem:[%s10305_s26 + $0x38] sm:$0xff] }
0x128a   : > { %7721 = vmatprep.subr.mxu0 %v9026_v10  ;;  %v4087_v5 = vld [vmem:[%s10305_s26 + $0x30] sm:$0xff] }
0x128d   : > { %7722 = vmatpush3.xpose.msk.msra.mxu0 %vm1809_vm15, %v3470_v6  ;;  %v4086_v6 = vld [vmem:[%s10305_s26 + $0x28] sm:$0xff] }
0x128e   : > { %7738 = vmatprep.subr.mxu0 %v9026_v10 }
0x1290   : > { %7724 = vmatmul.mubr.msk.f32.vlgmr.msra.gmra.mxu0 %vm1809_vm15, %v3468_v7  ;;  %v4085_v7 = vld [vmem:[%s10305_s26 + $0x20] sm:$0xff] }
0x1291   : > { %7739 = vmatpush3.xpose.msk.msra.mxu0 %vm1809_vm15, %v3718_v8  ;;  %7742 = vmatprep.mubr.msk.f32.mxu0 %vm9028_vm14, %v9026_v10  ;;  %v4084_v8 = vld [vmem:[%s10305_s26 + $0x18] sm:$0xff] }
0x1292   : > { %7740 = vmatprep.subr.mxu0 %v9026_v10 }
0x1295   : > { %7741 = vmatpush3.xpose.msk.msra.mxu0 %vm1809_vm15, %v3716_v9 }
0x1296   : > { %7757 = vmatprep.subr.mxu0 %v9026_v10 }
0x1298   : > { %7743 = vmatmul.mubr.msk.f32.vlgmr.msra.gmra.mxu0 %vm1809_vm15, %v3714_v13 }
0x1299   : > { %7765 = vmatprep.mubr.msk.f32.mxu0 %vm9028_vm14, %v9026_v10 }
0x1348   : > { %v3390_v14 = vpop.f32.mrf.mxu0 }
0x1349   : > { %v3464_v45 = vadd.f32 %v9770_v0, %v3390_v14 }
0x134a   : > { %v7713_v15 = vpop.f32.mrf.mxu0 }
0x1350   : > { %v3545_v16 = vpop.f32.mrf.mxu0 }
0x1351   : > { %v3549_v17 = vsel %vm1208_vm0, %v3545_v16, -inf }
0x1352   : > { %3550 = vmax.xlane.f32.xlu1 %v3549_v17  ;;  %v7725_v19 = vpop.f32.mrf.mxu0 }
0x1353   : > { %v7240_v19 = vld [vmem:[#allocation29] ss:$0 sm:$0xff] }
0x1358   : > { %v3791_v20 = vpop.f32.mrf.mxu0 }
0x1359   : > { %v3795_v22 = vsel %vm1208_vm0, %v3791_v20, -inf }
0x135a   : > { %v7744_v21 = vpop.f32.mrf.mxu0 }
0x1363   : > { %3560 = vrot.lane.b32.xlu1 %v9696_v63, %s10214_s8 }
0x1387   : > { %3796 = vmax.xlane.f32.xlu1 %v3795_v22  ;;  %v4083_v22 = vld [vmem:[%s10305_s26 + $0x10] sm:$0xff] }
0x1398   : > { %3806 = vrot.lane.b32.xlu1 %v9696_v63, %s10303_s9 }
0x13db   : > { %v3551_v18 = vpop.xlane.xlu1 %3550 }
0x13dc   : > { %v3552_v24 = vsub.f32 %v3545_v16, %v3551_v18  ;;  %v7239_v16 = vld [vmem:[#allocation28] ss:$0 sm:$0xff]  ;;  %v4082_v18 = vld [vmem:[%s10305_s26 + $0x8] sm:$0xff] }
0x13de   : > { %v3553_v25 = vmul.f32 1.442695, %v3552_v24  ;;  %v4081_v24 = vld [vmem:[%s10305_s26] sm:$0xff] }
0x13df   : > { %v3561_v28 = vpop.permute.xlu1 %3560 }
0x13e0   : > { %8303 = vpow2.f32 %v3553_v25  ;;  %v7241_v25 = vld [vmem:[#allocation22] ss:$0 sm:$0xff] }
0x13ed   : > { %v8304_v26 = vpop.eup %8303 }
0x13ee   : > { %v3555_v27 = vsel %vm1208_vm0, %v8304_v26, 0.0 }
0x13ef   : > { %3556 = vadd.xlane.f32.xlu0 %v3555_v27 }
0x1405   : > { %3562 = vrot.lane.b32.xlu0 %v9700_v2, %s10214_s8  ;;  %s10304_s8 = sld [smem:[#allocation59_spill]] }
0x140b   : > { %v3999_v60 = vld [vmem:[%s10304_s8 + $0x18] sm:$0xff]  ;;  %v3998_v61 = vld [vmem:[%s10304_s8 + $0x10] sm:$0xff]  ;;  %v3996_v3 = vld [vmem:[%s10304_s8] sm:$0xff] }
0x140c   : > { %7758 = vmatpush3.msra.mxu0 %v3999_v60 }
0x140d   : > { %7759 = vmatprep.subr.mxu0 %v9026_v10 }
0x140e   : > { %7760 = vmatpush3.msra.mxu0 %v3998_v61 }
0x140f   : > { %7761 = vmatprep.subr.mxu0 %v9026_v10 }
0x1410   : > { %v3797_v62 = vpop.xlane.xlu1 %3796 }
0x1411   : > { %v3798_v29 = vsub.f32 %v3791_v20, %v3797_v62 }
0x1413   : > { %v3799_v30 = vmul.f32 1.442695, %v3798_v29  ;;  %v7243_v29 = vld [vmem:[#allocation23] ss:$0 sm:$0xff] }
0x1414   : > { %v3807_v34 = vpop.permute.xlu1 %3806 }
0x1415   : > { %8305 = vpow2.f32 %v3799_v30 }
0x1422   : > { %v8306_v32 = vpop.eup %8305 }
0x1423   : > { %v3801_v33 = vsel %vm1208_vm0, %v8306_v32, 0.0 }
0x1424   : > { %3802 = vadd.xlane.f32.xlu0 %v3801_v33 }
0x143a   : > { %3808 = vrot.lane.b32.xlu0 %v9700_v2, %s10303_s9 }
0x1478   : > { %v3557_v63 = vpop.xlane.xlu0 %3556 }
0x1479   : > { %8307 = vrcp.f32 %v3557_v63 }
0x147c   : > { %v3563_v35 = vpop.permute.xlu0 %3562 }
0x147d   : > { %7727 = vmatpush3.msra.mxu1 %v3563_v35 }
0x147e   : > { %7728 = vmatprep.subr.mxu1 %v9026_v10 }
0x147f   : > { %7729 = vmatpush3.msra.mxu1 %v3561_v28 }
0x1480   : > { %7733 = vmatprep.subr.mxu1 %v9026_v10 }
0x1486   : > { %v8308_v36 = vpop.eup %8307 }
0x1487   : > { %v3559_v37 = vmul.f32 %v8308_v36, %v8304_v26 }
0x1489   : > { %7731 = vmatmul.mubr.msk.f32.vlgmr.msra.gmra.mxu1 %vm1208_vm0, %v3559_v37 }
0x148a   : > { %7734 = vmatpush3.msra.mxu1 %v2976_v38  ;;  %7735 = vmatprep.mubr.msk.f32.mxu1 %vm9028_vm14, %v9026_v10 }
0x148b   : > { %7745 = vmatprep.subr.mxu1 %v9026_v10 }
0x14ad   : > { %v3803_v2 = vpop.xlane.xlu0 %3802 }
0x14ae   : > { %8309 = vrcp.f32 %v3803_v2 }
0x14b1   : > { %v3809_v41 = vpop.permute.xlu0 %3808 }
0x14bb   : > { %v8310_v39 = vpop.eup %8309 }
0x14bc   : > { %v3805_v43 = vmul.f32 %v8310_v39, %v8306_v32 }
0x1549   : > { %v3635_v40 = vpop.f32.mrf.mxu1 }
0x154a   : > { %7736 = vmatmul.mubr.msk.f32.vlgmr.msra.gmra.mxu1 %vm1809_vm15, %v3635_v40  ;;  %v7250_v40 = vld [vmem:[%s10298_s10 + $0x38] sm:$0xff] }
0x154b   : > { %7746 = vmatpush3.msra.mxu1 %v3809_v41  ;;  %v7732_v42 = vpop.f32.mrf.mxu1  ;;  %7749 = vmatprep.mubr.msk.f32.mxu1 %vm9028_vm14, %v9026_v10  ;;  %v7249_v41 = vld [vmem:[%s10298_s10 + $0x30] sm:$0xff] }
0x154c   : > { %7747 = vmatprep.subr.mxu1 %v9026_v10  ;;  %v7248_v42 = vld [vmem:[%s10298_s10 + $0x28] sm:$0xff] }
0x154d   : > { %7748 = vmatpush3.msra.mxu1 %v3807_v34  ;;  %v7247_v34 = vld [vmem:[%s10298_s10 + $0x20] sm:$0xff] }
0x154e   : > { %7750 = vmatmul.mubr.msk.f32.vlgmr.msra.gmra.mxu1 %vm1208_vm0, %v3805_v43  ;;  %7752 = vmatprep.subr.mxu1 %v9026_v10 }
0x154f   : > { %7754 = vmatprep.mubr.msk.f32.mxu1 %vm9028_vm14, %v9026_v10  ;;  %7753 = vmatpush3.msra.mxu1 %v2977_v44 }
0x1550   : > { %7768 = vmatprep.subr.mxu1 %v9026_v10 }
0x160a   : > { %v3708_v46 = vpop.f32.mrf.mxu1 }
0x160b   : > { %v3712_v47 = vadd.f32 %v3708_v46, %v3464_v45 }
0x160c   : > { %v7737_v48 = vpop.f32.mrf.mxu1 }
0x160e   : > { %v3881_v50 = vpop.f32.mrf.mxu1 }
0x160f   : > { %7755 = vmatmul.mubr.msk.f32.vlgmr.msra.gmra.mxu1 %vm1809_vm15, %v3881_v50  ;;  %v7246_v50 = vld [vmem:[#allocation32] ss:$0 sm:$0xff] }
0x1610   : > { %v7751_v51 = vpop.f32.mrf.mxu1  ;;  %7784 = vmatprep.mubr.msk.f32.mxu1 %vm9028_vm14, %v9026_v10  ;;  %7769 = vmatpush3.msra.mxu1 %v4088_v4 }
0x1611   : > { %7770 = vmatprep.subr.mxu1 %v9026_v10 }
0x1612   : > { %7771 = vmatpush3.msra.mxu1 %v4087_v5 }
0x1613   : > { %7772 = vmatprep.subr.mxu1 %v9026_v10 }
0x1614   : > { %7773 = vmatpush3.msra.mxu1 %v4086_v6 }
0x1615   : > { %7774 = vmatprep.subr.mxu1 %v9026_v10 }
0x1616   : > { %7775 = vmatpush3.msra.mxu1 %v4085_v7 }
0x1617   : > { %7776 = vmatprep.subr.mxu1 %v9026_v10 }
0x1618   : > { %7777 = vmatpush3.msra.mxu1 %v4084_v8 }
0x1619   : > { %7778 = vmatprep.subr.mxu1 %v9026_v10 }
0x161a   : > { %7779 = vmatpush3.msra.mxu1 %v4083_v22 }
0x161b   : > { %7780 = vmatprep.subr.mxu1 %v9026_v10 }
0x161c   : > { %7781 = vmatpush3.msra.mxu1 %v4082_v18 }
0x161d   : > { %7782 = vmatprep.subr.mxu1 %v9026_v10 }
0x161e   : > { %7783 = vmatpush3.msra.mxu1 %v4081_v24 }
0x161f   : > { %7809 = vmatprep.subr.mxu1 %v9026_v10 }
0x16cf   : > { %v3954_v12 = vpop.f32.mrf.mxu1 }
0x16d0   : > { %v3958_v31 = vadd.f32 %v3954_v12, %v3712_v47  ;;  %v7245_v47 = vld [vmem:[#allocation31] ss:$0 sm:$0xff] }
0x16d1   : > { %v7756_v53 = vpop.f32.mrf.mxu1  ;;  %v9875_v12 = vld [vmem:[#allocation8] sm:$0xff] }
0x16d2   : > { %v3965_v1 = vadd.f32 %v7238_v52, %v3958_v31  ;;  %v7256_v53 = vld [vmem:[%s10299_s1 + $0x38] sm:$0xff] }
0x16d4   : > { %v3966_v54 = vadd.f32 %v3965_v1, %v9715_v23  ;;  %v3997_v23 = vld [vmem:[%s10304_s8 + $0x8] sm:$0xff]  ;;  %v7255_v1 = vld [vmem:[%s10299_s1 + $0x30] sm:$0xff] }
0x16d5   : > { %7762 = vmatpush3.msra.mxu0 %v3997_v23  ;;  %v7257_v23 = vld [vmem:[#allocation11 + $0x1] ss:$0 sm:$0xff] }
0x16d6   : > { %v3969_v0 = vsel %vm1426_vm13, %v3966_v54, 0.0  ;;  %7763 = vmatprep.subr.mxu0 %v9026_v10 }
0x16d7   : > { %3970 = vadd.xlane.f32.xlu1 %v3969_v0  ;;  %7764 = vmatpush3.msra.mxu0 %v3996_v3  ;;  %v7253_v0 = vld [vmem:[%s10299_s1 + $0x20] sm:$0xff] }
0x16d8   : > { %7787 = vmatprep.subr.mxu0 %v9026_v10 }
0x1760   : > { %v3971_v55 = vpop.xlane.xlu1 %3970 }
0x1761   : > { %v3972_v56 = vmul.f32 0.03125, %v3971_v55  ;;  %v7251_v55 = vld [vmem:[#allocation10 + $0x1] ss:$0 sm:$0xff] }
0x1763   : > { %v3973_v57 = vsub.f32 %v3966_v54, %v3972_v56  ;;  %v7254_v54 = vld [vmem:[%s10299_s1 + $0x28] sm:$0xff]  ;;  %s10309_s1 = smov 96  }
0x1765   : > { %v3974_v58 = vmul.f32 %v3973_v57, %v3973_v57 }
0x1767   : > { %v3975_v59 = vsel %vm1426_vm13, %v3974_v58, 0.0 }
0x1768   : > { %3976 = vadd.xlane.f32.xlu0 %v3975_v59 }
0x17f1   : > { %v3977_v9 = vpop.xlane.xlu0 %3976 }
0x17f2   : > { %v3978_v13 = vmul.f32 0.03125, %v3977_v9 }
0x17f4   : > { %v3979_v14 = vadd.f32 1e-05, %v3978_v13 }
0x17f6   : > { %8311 = vrsqrt.f32 %v3979_v14 }
0x1803   : > { %v8312_v15 = vpop.eup %8311 }
0x1804   : > { %v3981_v17 = vmul.f32 %v8312_v15, %v3973_v57 }
0x1806   : > { %v3988_v20 = vmul.f32 %v7239_v16, %v3981_v17 }
0x1808   : > { %v3995_v21 = vadd.f32 %v7240_v19, %v3988_v20 }
0x180a   : > { %7766 = vmatmul.mubr.msk.f32.vlgmr.msra.gmra.mxu0 %vm1426_vm13, %v3995_v21 }
0x180b   : > { %7795 = vmatprep.mubr.msk.f32.mxu0 %vm9028_vm14, %v9026_v10  ;;  %7788 = vmatpush3.msra.mxu0 %v7250_v40 }
0x180c   : > { %7789 = vmatprep.subr.mxu0 %v9026_v10 }
0x180d   : > { %7790 = vmatpush3.msra.mxu0 %v7249_v41 }
0x180e   : > { %7791 = vmatprep.subr.mxu0 %v9026_v10 }
0x180f   : > { %7792 = vmatpush3.msra.mxu0 %v7248_v42 }
0x1810   : > { %7793 = vmatprep.subr.mxu0 %v9026_v10 }
0x1811   : > { %7794 = vmatpush3.msra.mxu0 %v7247_v34 }
0x1812   : > { %7798 = vmatprep.subr.mxu0 %v9026_v10 }
0x18ca   : > { %v4076_v26 = vpop.f32.mrf.mxu0 }
0x18cb   : > { %v4077_v27 = vadd.f32 %v7241_v25, %v4076_v26 }
0x18cc   : > { %v7767_v28 = vpop.f32.mrf.mxu0 }
0x18cd   : > { %v4080_v62 = vmax.f32 %v4077_v27, 0.0 }
0x18cf   : > { %7785 = vmatmul.mubr.msk.f32.vlgmr.msra.gmra.mxu1 %vm4096_vm1, %v4080_v62 }
0x18d0   : > { %7811 = vmatprep.mubr.msk.f32.mxu1 %vm9028_vm14, %v9026_v10 }
0x198f   : > { %v4166_v30 = vpop.f32.mrf.mxu1 }
0x1990   : > { %v4167_v32 = vadd.f32 %v7243_v29, %v4166_v30 }
0x1991   : > { %v7786_v33 = vpop.f32.mrf.mxu1 }
0x1992   : > { %v4170_v63 = vadd.f32 %v4167_v32, %v3995_v21 }
0x1994   : > { %v4173_v35 = vsel %vm1426_vm13, %v4170_v63, 0.0 }
0x1995   : > { %4174 = vadd.xlane.f32.xlu0 %v4173_v35  ;;  %v7260_v35 = vld [vmem:[%s10300_s2 + $0x28] sm:$0xff] }
0x1a1e   : > { %v4175_v36 = vpop.xlane.xlu0 %4174 }
0x1a1f   : > { %v4176_v37 = vmul.f32 0.03125, %v4175_v36 }
0x1a21   : > { %v4177_v38 = vsub.f32 %v4170_v63, %v4176_v37  ;;  %v7259_v63 = vld [vmem:[%s10300_s2 + $0x20] sm:$0xff] }
0x1a23   : > { %v4178_v2 = vmul.f32 %v4177_v38, %v4177_v38 }
0x1a25   : > { %v4179_v39 = vsel %vm1426_vm13, %v4178_v2, 0.0 }
0x1a26   : > { %4180 = vadd.xlane.f32.xlu1 %v4179_v39 }
0x1aaf   : > { %v4181_v43 = vpop.xlane.xlu1 %4180 }
0x1ab0   : > { %v4182_v44 = vmul.f32 0.03125, %v4181_v43 }
0x1ab2   : > { %v4183_v45 = vadd.f32 1e-05, %v4182_v44 }
0x1ab4   : > { %8313 = vrsqrt.f32 %v4183_v45 }
0x1ac1   : > { %v8314_v46 = vpop.eup %8313 }
0x1ac2   : > { %v4185_v48 = vmul.f32 %v8314_v46, %v4177_v38 }
0x1ac4   : > { %v4192_v51 = vmul.f32 %v7245_v47, %v4185_v48 }
0x1ac6   : > { %v9873_v52 = vadd.f32 %v7246_v50, %v4192_v51 }
0x1ac8   : > { %v4200_v31 = vadd.f32 %v9875_v12, %v9873_v52 }
0x1aca   : > { %7796 = vmatmul.mubr.msk.f32.vlgmr.msra.gmra.mxu0 %vm1426_vm13, %v4200_v31 }
0x1acb   : > { %7799 = vmatpush3.msra.mxu0 %v7256_v53  ;;  %7806 = vmatprep.mubr.msk.f32.mxu0 %vm9028_vm14, %v9026_v10 }
0x1acc   : > { %7800 = vmatprep.subr.mxu0 %v9026_v10 }
0x1acd   : > { %7801 = vmatpush3.msra.mxu0 %v7255_v1 }
0x1ace   : > { %7802 = vmatprep.subr.mxu0 %v9026_v10 }
0x1acf   : > { %7803 = vmatpush3.msra.mxu0 %v7254_v54 }
0x1ad0   : > { %7804 = vmatprep.subr.mxu0 %v9026_v10 }
0x1ad1   : > { %7805 = vmatpush3.msra.mxu0 %v7253_v0 }
0x1ad2   : > { %7807 = vmatmul.mubr.msk.f32.vlgmr.msra.gmra.mxu0 %vm1426_vm13, %v9873_v52  ;;  %7819 = vmatprep.subr.mxu0 %v9026_v10 }
0x1ad3   : > { %7821 = vmatprep.mubr.msk.f32.mxu0 %vm9028_vm14, %v9026_v10 }
0x1b8a   : > { %v4283_v56 = vpop.f32.mrf.mxu0 }
0x1b8b   : > { %v9894_v57 = vadd.f32 %v7251_v55, %v4283_v56 }
0x1b8c   : > { %v7797_v58 = vpop.f32.mrf.mxu0 }
0x1b8d   : > { %4545 = vrot.lane.b32.xlu1 %v9894_v57, %s10218_s18  ;;  %4382 = vrot.lane.b32.xlu0 %v9894_v57, %s10222_s6  ;;  %v9901_v59 = vmul.f32 0.35355338, %v9894_v57  ;;  %s10306_s18 = smov 112   ;;  %s10308_s6 = smov 104   ;;  %v7261_v58 = vld [vmem:[%s10300_s2 + $0x30] sm:$0xff] }
0x1b91   : > { %4543 = vrot.lane.b32.xlu1 %v9901_v59, %s10220_s4 }
0x1b92   : > { %v4369_v60 = vpop.f32.mrf.mxu0 }
0x1b93   : > { %v9909_v5 = vadd.f32 %v7257_v23, %v4369_v60 }
0x1b94   : > { %v7808_v61 = vpop.f32.mrf.mxu0 }
0x1bff   : > { %v4546_v3 = vpop.permute.xlu1 %4545  ;;  %v4383_v4 = vpop.permute.xlu0 %4382 }
0x1c00   : > { %7810 = vmatpush3.xpose.msk.msra.mxu1 %vm1809_vm15, %v4383_v4  ;;  %7820 = vmatpush3.xpose.msk.msra.mxu0 %vm1809_vm15, %v4546_v3 }
0x1c01   : > { %7814 = vmatprep.subr.mxu1 %v9026_v10  ;;  %7829 = vmatprep.subr.mxu0 %v9026_v10 }
0x1c03   : > { %v4544_v6 = vpop.permute.xlu1 %4543  ;;  %7812 = vmatmul.mubr.msk.f32.vlgmr.msra.gmra.mxu1 %vm1809_vm15, %v9901_v59 }
0x1c04   : > { %7815 = vmatpush3.msra.mxu1 %v9909_v5  ;;  %7822 = vmatmul.mubr.msk.f32.vlgmr.msra.gmra.mxu0 %vm1809_vm15, %v4544_v6 }
0x1c05   : > { %7816 = vmatprep.mubr.msk.f32.mxu1 %vm9028_vm14, %v9026_v10  ;;  %7824 = vmatprep.subr.mxu1 %v9026_v10 }
0x1c06   : > { %7831 = vmatprep.mubr.msk.f32.mxu0 %vm9028_vm14, %v9026_v10  ;;  %7830 = vmatpush3.msra.mxu0 %v7260_v35 }
0x1c07   : > { %7839 = vmatprep.subr.mxu0 %v9026_v10 }
0x1cc3   : > { %v4455_v7 = vpop.f32.mrf.mxu1 }
0x1cc4   : > { %v4617_v8 = vpop.f32.mrf.mxu0  ;;  %v4459_v9 = vsel %vm1809_vm15, %v4455_v7, -inf }
0x1cc5   : > { %4460 = vmax.xlane.f32.xlu0 %v4459_v9  ;;  %v7813_v13 = vpop.f32.mrf.mxu1  ;;  %v4621_v14 = vsel %vm1809_vm15, %v4617_v8, -inf }
0x1cc6   : > { %4622 = vmax.xlane.f32.xlu1 %v4621_v14  ;;  %v7823_v15 = vpop.f32.mrf.mxu0  ;;  %v7262_v14 = vld [vmem:[%s10300_s2 + $0x38] sm:$0xff]  ;;  %s10310_s2 = smov 120  }
0x1cd7   : > { %4633 = vrot.lane.b32.xlu1 %v9909_v5, %s10220_s4  ;;  %s10307_s4 = smov 80  }
0x1cdb   : > { %4855 = vrot.lane.b32.xlu1 %v9901_v59, %s10306_s18 }
0x1d4e   : > { %v4461_v16 = vpop.xlane.xlu0 %4460 }
0x1d4f   : > { %v4462_v17 = vsub.f32 %v4455_v7, %v4461_v16  ;;  %v4623_v19 = vpop.xlane.xlu1 %4622 }
0x1d50   : > { %v4624_v20 = vsub.f32 %v4617_v8, %v4623_v19 }
0x1d51   : > { %v4463_v21 = vmul.f32 1.442695, %v4462_v17 }
0x1d52   : > { %v4625_v22 = vmul.f32 1.442695, %v4624_v20 }
0x1d53   : > { %8315 = vpow2.f32 %v4463_v21  ;;  %v4634_v30 = vpop.permute.xlu1 %4633  ;;  %v5463_v21 = vld [vmem:[#allocation16 + $0x38] sm:$0xff] }
0x1d54   : > { %8317 = vpow2.f32 %v4625_v22 }
0x1d57   : > { %v4856_v40 = vpop.permute.xlu1 %4855 }
0x1d60   : > { %v8316_v18 = vpop.eup %8315 }
0x1d61   : > { %v4465_v24 = vsel %vm1809_vm15, %v8316_v18, 0.0  ;;  %v8318_v25 = vpop.eup %8317 }
0x1d62   : > { %4466 = vadd.xlane.f32.xlu0 %v4465_v24  ;;  %v4627_v26 = vsel %vm1809_vm15, %v8318_v25, 0.0 }
0x1d66   : > { %4628 = vadd.xlane.f32.xlu0 %v4627_v26  ;;  %v5460_v26 = vld [vmem:[#allocation16 + $0x20] sm:$0xff] }
0x1d7c   : > { %4857 = vrot.lane.b32.xlu0 %v9894_v57, %s10307_s4 }
0x1deb   : > { %v4467_v27 = vpop.xlane.xlu0 %4466 }
0x1dec   : > { %8319 = vrcp.f32 %v4467_v27  ;;  %v7279_v27 = vld [vmem:[#allocation13 + $0x1] ss:$0 sm:$0xff] }
0x1def   : > { %v4629_v28 = vpop.xlane.xlu0 %4628 }
0x1df0   : > { %8321 = vrcp.f32 %v4629_v28 }
0x1df3   : > { %v4858_v2 = vpop.permute.xlu0 %4857 }
0x1df9   : > { %v8320_v62 = vpop.eup %8319 }
0x1dfa   : > { %v4469_v29 = vmul.f32 %v8320_v62, %v8316_v18  ;;  %v5462_v18 = vld [vmem:[#allocation16 + $0x30] sm:$0xff] }
0x1dfc   : > { %7817 = vmatmul.mubr.msk.f32.vlgmr.msra.gmra.mxu1 %vm1809_vm15, %v4469_v29 }
0x1dfd   : > { %v8322_v32 = vpop.eup %8321  ;;  %7825 = vmatpush3.msra.mxu1 %v4634_v30  ;;  %7826 = vmatprep.mubr.msk.f32.mxu1 %vm9028_vm14, %v9026_v10 }
0x1dfe   : > { %v4631_v33 = vmul.f32 %v8322_v32, %v8318_v25  ;;  %7834 = vmatprep.subr.mxu1 %v9026_v10  ;;  %v5461_v25 = vld [vmem:[#allocation16 + $0x28] sm:$0xff] }
0x1e00   : > { %7827 = vmatmul.mubr.msk.f32.vlgmr.msra.gmra.mxu1 %vm1809_vm15, %v4631_v33 }
0x1e01   : > { %7836 = vmatprep.mubr.msk.f32.mxu1 %vm9028_vm14, %v9026_v10  ;;  %7835 = vmatpush3.msra.mxu1 %v7259_v63  ;;  %v7288_v63 = vld [vmem:[#allocation17 + $0x1] ss:$0 sm:$0xff] }
0x1e02   : > { %7844 = vmatprep.subr.mxu1 %v9026_v10 }
0x1ebc   : > { %v4539_v36 = vpop.f32.mrf.mxu1 }
0x1ebd   : > { %7837 = vmatmul.mubr.msk.f32.vlgmr.msra.gmra.mxu1 %vm1809_vm15, %v4539_v36 }
0x1ebe   : > { %v7818_v37 = vpop.f32.mrf.mxu1  ;;  %7846 = vmatprep.mubr.msk.f32.mxu1 %vm9028_vm14, %v9026_v10 }
0x1ec0   : > { %v4705_v38 = vpop.f32.mrf.mxu1 }
0x1ec1   : > { %7832 = vmatmul.mubr.msk.f32.vlgmr.msra.gmra.mxu0 %vm1809_vm15, %v4705_v38 }
0x1ec2   : > { %7840 = vmatpush3.xpose.msk.msra.mxu0 %vm1809_vm15, %v4858_v2  ;;  %v7828_v39 = vpop.f32.mrf.mxu1  ;;  %7841 = vmatprep.mubr.msk.f32.mxu0 %vm9028_vm14, %v9026_v10 }
0x1ec3   : > { %7849 = vmatprep.subr.mxu0 %v9026_v10 }
0x1ec5   : > { %7842 = vmatmul.mubr.msk.f32.vlgmr.msra.gmra.mxu0 %vm1809_vm15, %v4856_v40  ;;  %v7285_v40 = vld [vmem:[%s10302_s21 + $0x38] sm:$0xff] }
0x1ec6   : > { %7851 = vmatprep.mubr.msk.f32.mxu0 %vm9028_vm14, %v9026_v10  ;;  %7850 = vmatpush3.msra.mxu0 %v7261_v58 }
0x1ec7   : > { %7859 = vmatprep.subr.mxu0 %v9026_v10 }
0x1f7d   : > { %v4851_v41 = vpop.f32.mrf.mxu1 }
0x1f7f   : > { %v7838_v42 = vpop.f32.mrf.mxu1 }
0x1f80   : > { %v7283_v42 = vld [vmem:[%s10302_s21 + $0x28] sm:$0xff] }
0x1f81   : > { %v4778_v34 = vpop.f32.mrf.mxu0 }
0x1f82   : > { %v4852_v43 = vadd.f32 %v4851_v41, %v4778_v34  ;;  %v7284_v41 = vld [vmem:[%s10302_s21 + $0x30] sm:$0xff]  ;;  %v7282_v34 = vld [vmem:[%s10302_s21 + $0x20] sm:$0xff] }
0x1f83   : > { %v7833_v44 = vpop.f32.mrf.mxu0 }
0x1f85   : > { %v4929_v45 = vpop.f32.mrf.mxu0 }
0x1f86   : > { %v4933_v46 = vsel %vm1809_vm15, %v4929_v45, -inf }
0x1f87   : > { %4934 = vmax.xlane.f32.xlu1 %v4933_v46  ;;  %v7843_v47 = vpop.f32.mrf.mxu0 }
0x1f88   : > { %v7280_v47 = vld [vmem:[#allocation25 + $0x1] ss:$0 sm:$0xff] }
0x1f98   : > { %5096 = vrot.lane.b32.xlu1 %v9894_v57, %s10303_s9 }
0x1f9c   : > { %5094 = vrot.lane.b32.xlu1 %v9901_v59, %s10308_s6 }
0x2010   : > { %v4935_v48 = vpop.xlane.xlu1 %4934 }
0x2011   : > { %v4936_v50 = vsub.f32 %v4929_v45, %v4935_v48 }
0x2013   : > { %v4937_v51 = vmul.f32 1.442695, %v4936_v50  ;;  %v7281_v50 = vld [vmem:[#allocation26 + $0x1] ss:$0 sm:$0xff] }
0x2014   : > { %v5097_v55 = vpop.permute.xlu1 %5096 }
0x2015   : > { %8323 = vpow2.f32 %v4937_v51 }
0x2018   : > { %v5095_v57 = vpop.permute.xlu1 %5094 }
0x2022   : > { %v8324_v31 = vpop.eup %8323 }
0x2023   : > { %v4939_v53 = vsel %vm1809_vm15, %v8324_v31, 0.0 }
0x2024   : > { %4940 = vadd.xlane.f32.xlu0 %v4939_v53 }
0x203a   : > { %4944 = vrot.lane.b32.xlu0 %v9909_v5, %s10306_s18 }
0x20ad   : > { %v4941_v1 = vpop.xlane.xlu0 %4940 }
0x20ae   : > { %8325 = vrcp.f32 %v4941_v1  ;;  %v7286_v1 = vld [vmem:[#allocation14 + $0x1] ss:$0 sm:$0xff] }
0x20b1   : > { %v4945_v54 = vpop.permute.xlu0 %4944 }
0x20b2   : > { %7845 = vmatpush3.msra.mxu1 %v4945_v54 }
0x20b3   : > { %7854 = vmatprep.subr.mxu1 %v9026_v10 }
0x20bb   : > { %v8326_v0 = vpop.eup %8325 }
0x20bc   : > { %v4943_v56 = vmul.f32 %v8326_v0, %v8324_v31 }
0x20be   : > { %7847 = vmatmul.mubr.msk.f32.vlgmr.msra.gmra.mxu1 %vm1809_vm15, %v4943_v56 }
0x20bf   : > { %7855 = vmatpush3.xpose.msk.msra.mxu1 %vm1809_vm15, %v5097_v55  ;;  %7856 = vmatprep.mubr.msk.f32.mxu1 %vm9028_vm14, %v9026_v10 }
0x20c0   : > { %7864 = vmatprep.subr.mxu1 %v9026_v10 }
0x20c2   : > { %7857 = vmatmul.mubr.msk.f32.vlgmr.msra.gmra.mxu1 %vm1809_vm15, %v5095_v57 }
0x20c3   : > { %7866 = vmatprep.mubr.msk.f32.mxu1 %vm9028_vm14, %v9026_v10  ;;  %7865 = vmatpush3.msra.mxu1 %v7262_v14 }
0x20c4   : > { %7880 = vmatprep.subr.mxu1 %v5463_v21 }
0x217e   : > { %v5016_v59 = vpop.f32.mrf.mxu1 }
0x217f   : > { %7852 = vmatmul.mubr.msk.f32.vlgmr.msra.gmra.mxu0 %vm1809_vm15, %v5016_v59 }
0x2180   : > { %v7848_v60 = vpop.f32.mrf.mxu1  ;;  %7861 = vmatprep.mubr.msk.f32.mxu0 %vm9028_vm14, %v9026_v10 }
0x2182   : > { %v5168_v61 = vpop.f32.mrf.mxu1 }
0x2183   : > { %v5172_v23 = vsel %vm1809_vm15, %v5168_v61, -inf }
0x2184   : > { %5173 = vmax.xlane.f32.xlu0 %v5172_v23  ;;  %v7858_v3 = vpop.f32.mrf.mxu1 }
0x219a   : > { %5183 = vrot.lane.b32.xlu0 %v9909_v5, %s10308_s6 }
0x220d   : > { %v5174_v4 = vpop.xlane.xlu0 %5173 }
0x220e   : > { %v5175_v6 = vsub.f32 %v5168_v61, %v5174_v4 }
0x2210   : > { %v5176_v7 = vmul.f32 1.442695, %v5175_v6 }
0x2211   : > { %v5184_v8 = vpop.permute.xlu0 %5183 }
0x2212   : > { %8327 = vpow2.f32 %v5176_v7  ;;  %7860 = vmatpush3.msra.mxu0 %v5184_v8 }
0x2213   : > { %7869 = vmatprep.subr.mxu0 %v9026_v10 }
0x221f   : > { %v8328_v9 = vpop.eup %8327 }
0x2220   : > { %v5178_v13 = vsel %vm1809_vm15, %v8328_v9, 0.0 }
0x2221   : > { %5179 = vadd.xlane.f32.xlu1 %v5178_v13 }
0x223f   : > { %v5089_v15 = vpop.f32.mrf.mxu0 }
0x2240   : > { %v5093_v16 = vadd.f32 %v5089_v15, %v4852_v43 }
0x2241   : > { %v7853_v17 = vpop.f32.mrf.mxu0 }
0x22aa   : > { %v5180_v19 = vpop.xlane.xlu1 %5179 }
0x22ab   : > { %8329 = vrcp.f32 %v5180_v19 }
0x22b8   : > { %v8330_v5 = vpop.eup %8329 }
0x22b9   : > { %v5182_v20 = vmul.f32 %v8330_v5, %v8328_v9 }
0x22bb   : > { %7862 = vmatmul.mubr.msk.f32.vlgmr.msra.gmra.mxu0 %vm1809_vm15, %v5182_v20 }
0x22bc   : > { %7877 = vmatprep.mubr.msk.f32.mxu0 %vm9028_vm14, %v9026_v10  ;;  %7870 = vmatpush3.msra.mxu0 %v7285_v40 }
0x22bd   : > { %7871 = vmatprep.subr.mxu0 %v9026_v10 }
0x22be   : > { %7872 = vmatpush3.msra.mxu0 %v7284_v41 }
0x22bf   : > { %7873 = vmatprep.subr.mxu0 %v9026_v10 }
0x22c0   : > { %7874 = vmatpush3.msra.mxu0 %v7283_v42 }
0x22c1   : > { %7875 = vmatprep.subr.mxu0 %v9026_v10 }
0x22c2   : > { %7876 = vmatpush3.msra.mxu0 %v7282_v34 }
0x22c3   : > { %7891 = vmatprep.subr.mxu0 %v9026_v10 }
0x237b   : > { %v5255_v22 = vpop.f32.mrf.mxu0 }
0x237c   : > { %7867 = vmatmul.mubr.msk.f32.vlgmr.msra.gmra.mxu1 %vm1809_vm15, %v5255_v22 }
0x237d   : > { %7881 = vmatpush3.msra.mxu1 %v5463_v21  ;;  %v7863_v24 = vpop.f32.mrf.mxu0  ;;  %7888 = vmatprep.mubr.msk.f32.mxu1 %vm1426_vm13, %v9681_v49 }
0x237e   : > { %7882 = vmatprep.subr.mxu1 %v5462_v18 }
0x237f   : > { %7883 = vmatpush3.msra.mxu1 %v5462_v18 }
0x2380   : > { %7884 = vmatprep.subr.mxu1 %v5461_v25 }
0x2381   : > { %7885 = vmatpush3.msra.mxu1 %v5461_v25 }
0x2382   : > { %7886 = vmatprep.subr.mxu1 %v5460_v26 }
0x2383   : > { %7887 = vmatpush3.msra.mxu1 %v5460_v26 }
0x2384   : > { %7889 = vmatmul.mubr.msk.f32.vlgmr.msra.gmra.mxu1 %vm1426_vm13, %v9688_v11  ;;  %7898 = vmatprep.subr.mxu1 %v9026_v10 }
0x2385   : > { %7902 = vmatprep.mubr.msk.f32.mxu1 %vm9028_vm14, %v9026_v10 }
0x243c   : > { %v5328_v28 = vpop.f32.mrf.mxu1 }
0x243d   : > { %v5332_v62 = vadd.f32 %v5328_v28, %v5093_v16  ;;  %v5548_v16 = vld [vmem:[#allocation19 + $0x20] sm:$0xff] }
0x243e   : > { %v7868_v49 = vpop.f32.mrf.mxu1 }
0x243f   : > { %v5339_v29 = vadd.f32 %v7279_v27, %v5332_v62 }
0x2441   : > { %v5340_v30 = vadd.f32 %v5339_v29, %v9873_v52 }
0x2443   : > { %v5345_v32 = vsel %vm1426_vm13, %v5340_v30, 0.0 }
0x2444   : > { %v7890_v33 = vpop.f32.mrf.mxu1  ;;  %5346 = vadd.xlane.f32.xlu1 %v5345_v32 }
0x2445   : > { %v9997_v36 = vadd.f32 %v7890_v33, %v7288_v63  ;;  %v5549_v33 = vld [vmem:[#allocation19 + $0x28] sm:$0xff] }
0x2446   : > { %v5538_v11 = vpop.f32.mrf.mxu1 }
0x2447   : > { %v9993_v35 = vadd.f32 %v7288_v63, %v5538_v11 }
0x2449   : > { %5645 = vrot.lane.b32.xlu0 %v9993_v35, %s10309_s1 }
0x244d   : > { %5728 = vrot.lane.b32.xlu0 %v9997_v36, %s10310_s2 }
0x2451   : > { %5726 = vrot.lane.b32.xlu0 %v9993_v35, %s10310_s2 }
0x24bb   : > { %v5646_v7 = vpop.permute.xlu0 %5645 }
0x24bf   : > { %v5729_v9 = vpop.permute.xlu0 %5728 }
0x24c3   : > { %v5727_v14 = vpop.permute.xlu0 %5726 }
0x24cd   : > { %v5347_v52 = vpop.xlane.xlu1 %5346 }
0x24ce   : > { %v5348_v37 = vmul.f32 0.03125, %v5347_v52 }
0x24d0   : > { %v5349_v38 = vsub.f32 %v5340_v30, %v5348_v37 }
0x24d2   : > { %v5350_v2 = vmul.f32 %v5349_v38, %v5349_v38 }
0x24d4   : > { %v5351_v39 = vsel %vm1426_vm13, %v5350_v2, 0.0 }
0x24d5   : > { %5352 = vadd.xlane.f32.xlu1 %v5351_v39 }
0x255e   : > { %v5353_v43 = vpop.xlane.xlu1 %5352 }
0x255f   : > { %v5354_v44 = vmul.f32 0.03125, %v5353_v43 }
0x2561   : > { %v5355_v45 = vadd.f32 1e-05, %v5354_v44 }
0x2563   : > { %8331 = vrsqrt.f32 %v5355_v45 }
0x2570   : > { %v8332_v46 = vpop.eup %8331 }
0x2571   : > { %v5357_v48 = vmul.f32 %v8332_v46, %v5349_v38 }
0x2573   : > { %v5364_v51 = vmul.f32 %v7280_v47, %v5357_v48 }
0x2575   : > { %v10012_v31 = vadd.f32 %v7281_v50, %v5364_v51 }
0x2577   : > { %v5372_v53 = vadd.f32 %v9875_v12, %v10012_v31 }
0x2579   : > { %7878 = vmatmul.mubr.msk.f32.vlgmr.msra.gmra.mxu0 %vm1426_vm13, %v5372_v53 }
0x257a   : > { %7892 = vmatpush3.xpose.msk.msra.mxu0 %vm1809_vm15, %v9997_v36  ;;  %7895 = vmatprep.mubr.msk.f32.mxu0 %vm9028_vm14, %v9026_v10 }
0x257b   : > { %7893 = vmatprep.subr.mxu0 %v9026_v10 }
0x257e   : > { %7894 = vmatpush3.xpose.msk.msra.mxu0 %vm1809_vm15, %v9993_v35 }
0x257f   : > { %7912 = vmatprep.subr.mxu0 %v9026_v10 }
0x2639   : > { %v5455_v54 = vpop.f32.mrf.mxu0 }
0x263a   : > { %v5456_v0 = vadd.f32 %v7286_v1, %v5455_v54 }
0x263b   : > { %v7879_v55 = vpop.f32.mrf.mxu0 }
0x263c   : > { %v10025_v12 = vmul.f32 0.35355338, %v5456_v0 }
0x263e   : > { %5724 = vrot.lane.b32.xlu0 %v10025_v12, %s10310_s2  ;;  %7896 = vmatmul.mubr.msk.f32.vlgmr.msra.gmra.mxu0 %vm1809_vm15, %v10025_v12 }
0x263f   : > { %7916 = vmatprep.mubr.msk.f32.mxu0 %vm9028_vm14, %v9026_v10 }
0x26b0   : > { %v5725_v15 = vpop.permute.xlu0 %5724 }
0x26fe   : > { %v5630_v56 = vpop.f32.mrf.mxu0 }
0x26ff   : > { %v5634_v57 = vsel %vm1208_vm0, %v5630_v56, -inf }
0x2700   : > { %5635 = vmax.xlane.f32.xlu1 %v5634_v57  ;;  %v7897_v58 = vpop.f32.mrf.mxu0 }
0x2789   : > { %v5636_v59 = vpop.xlane.xlu1 %5635 }
0x278a   : > { %v5637_v60 = vsub.f32 %v5630_v56, %v5636_v59 }
0x278c   : > { %v5638_v61 = vmul.f32 1.442695, %v5637_v60 }
0x278e   : > { %8333 = vpow2.f32 %v5638_v61  ;;  %v5550_v61 = vld [vmem:[#allocation19 + $0x30] sm:$0xff] }
0x279b   : > { %v8334_v23 = vpop.eup %8333 }
0x279c   : > { %v5640_v3 = vsel %vm1208_vm0, %v8334_v23, 0.0 }
0x279d   : > { %5641 = vadd.xlane.f32.xlu1 %v5640_v3 }
0x27ae   : > { %5647 = vrot.lane.b32.xlu1 %v9997_v36, %s10309_s1  ;;  %s10311_s1 = smov 88  }
0x2826   : > { %v5642_v4 = vpop.xlane.xlu1 %5641 }
0x2827   : > { %8335 = vrcp.f32 %v5642_v4 }
0x282a   : > { %v5648_v6 = vpop.permute.xlu1 %5647 }
0x282b   : > { %7899 = vmatpush3.msra.mxu1 %v5648_v6 }
0x282c   : > { %7900 = vmatprep.subr.mxu1 %v9026_v10 }
0x282d   : > { %7901 = vmatpush3.msra.mxu1 %v5646_v7 }
0x282e   : > { %7905 = vmatprep.subr.mxu1 %v9026_v10 }
0x2834   : > { %v8336_v8 = vpop.eup %8335 }
0x2835   : > { %v5644_v13 = vmul.f32 %v8336_v8, %v8334_v23 }
0x2837   : > { %7903 = vmatmul.mubr.msk.f32.vlgmr.msra.gmra.mxu1 %vm1208_vm0, %v5644_v13 }
0x2838   : > { %7906 = vmatpush3.xpose.msk.msra.mxu1 %vm1809_vm15, %v5729_v9  ;;  %7909 = vmatprep.mubr.msk.f32.mxu1 %vm9028_vm14, %v9026_v10  ;;  %v5551_v9 = vld [vmem:[#allocation19 + $0x38] sm:$0xff] }
0x2839   : > { %7907 = vmatprep.subr.mxu1 %v9026_v10 }
0x283c   : > { %7908 = vmatpush3.xpose.msk.msra.mxu1 %vm1809_vm15, %v5727_v14 }
0x283d   : > { %7924 = vmatprep.subr.mxu1 %v9026_v10 }
0x283f   : > { %7910 = vmatmul.mubr.msk.f32.vlgmr.msra.gmra.mxu1 %vm1809_vm15, %v5725_v15 }
0x2840   : > { %7926 = vmatprep.mubr.msk.f32.mxu1 %vm9028_vm14, %v9026_v10  ;;  %7925 = vmatpush3.msra.mxu1 %v5548_v16 }
0x2841   : > { %7936 = vmatprep.subr.mxu1 %v9026_v10 }
0x28f7   : > { %v5720_v17 = vpop.f32.mrf.mxu1 }
0x28f8   : > { %7927 = vmatmul.mubr.msk.f32.vlgmr.msra.gmra.mxu1 %vm1809_vm15, %v5720_v17 }
0x28f9   : > { %v7904_v19 = vpop.f32.mrf.mxu1  ;;  %7940 = vmatprep.mubr.msk.f32.mxu1 %vm9028_vm14, %v9026_v10 }
0x28ff   : > { %v5802_v5 = vpop.f32.mrf.mxu1 }
0x2900   : > { %v5806_v20 = vsel %vm1208_vm0, %v5802_v5, -inf }
0x2901   : > { %5807 = vmax.xlane.f32.xlu0 %v5806_v20  ;;  %v7911_v21 = vpop.f32.mrf.mxu1 }
0x2917   : > { %5819 = vrot.lane.b32.xlu0 %v9997_v36, %s10311_s1 }
0x291b   : > { %6046 = vrot.lane.b32.xlu0 %v9997_v36, %s10306_s18 }
0x291f   : > { %6042 = vrot.lane.b32.xlu0 %v10025_v12, %s10306_s18 }
0x2923   : > { %6290 = vrot.lane.b32.xlu0 %v9993_v35, %s10308_s6 }
0x298a   : > { %v5808_v22 = vpop.xlane.xlu0 %5807 }
0x298b   : > { %v5809_v18 = vsub.f32 %v5802_v5, %v5808_v22  ;;  %v7311_v5 = vld [vmem:[#allocation20 + $0x1] ss:$0 sm:$0xff] }
0x298d   : > { %v5810_v24 = vmul.f32 1.442695, %v5809_v18 }
0x298e   : > { %v5820_v25 = vpop.permute.xlu0 %5819 }
0x298f   : > { %8337 = vpow2.f32 %v5810_v24  ;;  %7913 = vmatpush3.msra.mxu0 %v5820_v25 }
0x2990   : > { %7914 = vmatprep.subr.mxu0 %v9026_v10 }
0x2992   : > { %v6047_v11 = vpop.permute.xlu0 %6046 }
0x2996   : > { %v6043_v38 = vpop.permute.xlu0 %6042 }
0x299a   : > { %v6291_v39 = vpop.permute.xlu0 %6290 }
0x299c   : > { %v8338_v26 = vpop.eup %8337 }
0x299d   : > { %v5812_v27 = vsel %vm1208_vm0, %v8338_v26, 0.0 }
0x299e   : > { %5813 = vadd.xlane.f32.xlu1 %v5812_v27 }
0x29af   : > { %5817 = vrot.lane.b32.xlu1 %v9993_v35, %s10311_s1 }
0x29b3   : > { %6044 = vrot.lane.b32.xlu1 %v9993_v35, %s10306_s18  ;;  %s7335_s18 = sshll.u32 %s9214_s15, 7 }
0x29b7   : > { %6292 = vrot.lane.b32.xlu1 %v9997_v36, %s10308_s6 }
0x29b8   : > { %v10070_v28 = vpop.f32.mrf.mxu1 }
0x29ba   : > { %v7928_v62 = vpop.f32.mrf.mxu1 }
0x29bb   : > { %6288 = vrot.lane.b32.xlu1 %v10025_v12, %s10308_s6  ;;  %s10312_s6 = sld [smem:[#allocation69_spill]] }
0x29c1   : > { %s6824_s1 = scalar_lea.hbm %s10312_s6, %s7335_s18 }
0x2a27   : > { %v5814_v49 = vpop.xlane.xlu1 %5813 }
0x2a28   : > { %8339 = vrcp.f32 %v5814_v49 }
0x2a2b   : > { %v5818_v29 = vpop.permute.xlu1 %5817 }
0x2a2c   : > { %7915 = vmatpush3.msra.mxu0 %v5818_v29  ;;  %v7317_v29 = vld [vmem:[%s10304_s8 + $0x38] sm:$0xff] }
0x2a2d   : > { %7919 = vmatprep.subr.mxu0 %v9026_v10 }
0x2a2f   : > { %v6045_v37 = vpop.permute.xlu1 %6044 }
0x2a33   : > { %v6293_v2 = vpop.permute.xlu1 %6292 }
0x2a35   : > { %v8340_v30 = vpop.eup %8339 }
0x2a36   : > { %v5816_v32 = vmul.f32 %v8340_v30, %v8338_v26  ;;  %v7316_v30 = vld [vmem:[%s10304_s8 + $0x30] sm:$0xff] }
0x2a37   : > { %v6289_v40 = vpop.permute.xlu1 %6288 }
0x2a38   : > { %7917 = vmatmul.mubr.msk.f32.vlgmr.msra.gmra.mxu0 %vm1208_vm0, %v5816_v32  ;;  %v7314_v32 = vld [vmem:[%s10304_s8 + $0x20] sm:$0xff] }
0x2a39   : > { %7920 = vmatpush3.msra.mxu0 %v5549_v33  ;;  %7921 = vmatprep.mubr.msk.f32.mxu0 %vm9028_vm14, %v9026_v10  ;;  %v7327_v33 = vld [vmem:[%s10305_s26 + $0x78] sm:$0xff] }
0x2a3a   : > { %7929 = vmatprep.subr.mxu0 %v9026_v10 }
0x2af8   : > { %v5892_v63 = vpop.f32.mrf.mxu0 }
0x2af9   : > { %7922 = vmatmul.mubr.msk.f32.vlgmr.msra.gmra.mxu0 %vm1809_vm15, %v5892_v63  ;;  %v7326_v63 = vld [vmem:[%s10305_s26 + $0x70] sm:$0xff] }
0x2afa   : > { %7930 = vmatpush3.xpose.msk.msra.mxu0 %vm1809_vm15, %v6047_v11  ;;  %v7918_v52 = vpop.f32.mrf.mxu0  ;;  %7933 = vmatprep.mubr.msk.f32.mxu0 %vm9028_vm14, %v9026_v10  ;;  %v7325_v11 = vld [vmem:[%s10305_s26 + $0x68] sm:$0xff] }
0x2afb   : > { %7931 = vmatprep.subr.mxu0 %v9026_v10  ;;  %v7324_v52 = vld [vmem:[%s10305_s26 + $0x60] sm:$0xff] }
0x2afe   : > { %7932 = vmatpush3.xpose.msk.msra.mxu0 %vm1809_vm15, %v6045_v37  ;;  %v7323_v37 = vld [vmem:[%s10305_s26 + $0x58] sm:$0xff] }
0x2aff   : > { %7948 = vmatprep.subr.mxu0 %v9026_v10 }
0x2b01   : > { %7934 = vmatmul.mubr.msk.f32.vlgmr.msra.gmra.mxu0 %vm1809_vm15, %v6043_v38 }
0x2b02   : > { %7949 = vmatpush3.xpose.msk.msra.mxu0 %vm1809_vm15, %v6293_v2  ;;  %7952 = vmatprep.mubr.msk.f32.mxu0 %vm9028_vm14, %v9026_v10 }
0x2b03   : > { %7950 = vmatprep.subr.mxu0 %v9026_v10 }
0x2b06   : > { %7951 = vmatpush3.xpose.msk.msra.mxu0 %vm1809_vm15, %v6291_v39 }
0x2b07   : > { %7967 = vmatprep.subr.mxu0 %v9026_v10 }
0x2b09   : > { %7953 = vmatmul.mubr.msk.f32.vlgmr.msra.gmra.mxu0 %vm1809_vm15, %v6289_v40 }
0x2b0a   : > { %7975 = vmatprep.mubr.msk.f32.mxu0 %vm9028_vm14, %v9026_v10  ;;  %7968 = vmatpush3.msra.mxu0 %v7317_v29 }
0x2b0b   : > { %7969 = vmatprep.subr.mxu0 %v9026_v10 }
0x2b0c   : > { %7970 = vmatpush3.msra.mxu0 %v7316_v30 }
0x2b0d   : > { %7971 = vmatprep.subr.mxu0 %v9026_v10 }
0x2bb9   : > { %v5965_v41 = vpop.f32.mrf.mxu0 }
0x2bba   : > { %v6039_v13 = vadd.f32 %v10070_v28, %v5965_v41  ;;  %v7312_v41 = vld [vmem:[#allocation28 + $0x1] ss:$0 sm:$0xff] }
0x2bbb   : > { %v7923_v42 = vpop.f32.mrf.mxu0 }
0x2bc1   : > { %v6120_v34 = vpop.f32.mrf.mxu0 }
0x2bc2   : > { %v6124_v43 = vsel %vm1208_vm0, %v6120_v34, -inf }
0x2bc3   : > { %6125 = vmax.xlane.f32.xlu0 %v6124_v43  ;;  %v7935_v44 = vpop.f32.mrf.mxu0 }
0x2bc9   : > { %v6366_v45 = vpop.f32.mrf.mxu0 }
0x2bca   : > { %v6370_v47 = vsel %vm1208_vm0, %v6366_v45, -inf }
0x2bcb   : > { %v7954_v46 = vpop.f32.mrf.mxu0 }
0x2bcc   : > { %v7321_v46 = vld [vmem:[%s10305_s26 + $0x48] sm:$0xff] }
0x2bd9   : > { %6137 = vrot.lane.b32.xlu0 %v9997_v36, %s10307_s4 }
0x2bf8   : > { %6371 = vmax.xlane.f32.xlu0 %v6370_v47  ;;  %v7320_v47 = vld [vmem:[%s10305_s26 + $0x40] sm:$0xff] }
0x2c0e   : > { %6383 = vrot.lane.b32.xlu0 %v9997_v36, %s10303_s9 }
0x2c4c   : > { %v6126_v48 = vpop.xlane.xlu0 %6125 }
0x2c4d   : > { %v6127_v50 = vsub.f32 %v6120_v34, %v6126_v48  ;;  %v7313_v34 = vld [vmem:[#allocation29 + $0x1] ss:$0 sm:$0xff]  ;;  %v7318_v48 = vld [vmem:[#allocation22 + $0x1] ss:$0 sm:$0xff] }
0x2c4f   : > { %v6128_v51 = vmul.f32 1.442695, %v6127_v50 }
0x2c50   : > { %v6138_v53 = vpop.permute.xlu0 %6137 }
0x2c51   : > { %8341 = vpow2.f32 %v6128_v51  ;;  %7937 = vmatpush3.msra.mxu1 %v6138_v53 }
0x2c52   : > { %7938 = vmatprep.subr.mxu1 %v9026_v10 }
0x2c5e   : > { %v8342_v1 = vpop.eup %8341 }
0x2c5f   : > { %v6130_v54 = vsel %vm1208_vm0, %v8342_v1, 0.0 }
0x2c60   : > { %6131 = vadd.xlane.f32.xlu1 %v6130_v54  ;;  %v7328_v54 = vld [vmem:[#allocation23 + $0x1] ss:$0 sm:$0xff] }
0x2c71   : > { %6135 = vrot.lane.b32.xlu1 %v9993_v35, %s10307_s4  ;;  %s7154_s4 = sshll.u32 %s9460_s17, 3 }
0x2c72   : > { %s1192_s2 = scalar_lea.vmem [#allocation35], %s7154_s4 }
0x2c81   : > { %v6372_v0 = vpop.xlane.xlu0 %6371 }
0x2c82   : > { %v6373_v55 = vsub.f32 %v6366_v45, %v6372_v0  ;;  %v7322_v45 = vld [vmem:[%s10305_s26 + $0x50] sm:$0xff] }
0x2c84   : > { %v6374_v12 = vmul.f32 1.442695, %v6373_v55 }
0x2c85   : > { %v6384_v4 = vpop.permute.xlu0 %6383 }
0x2c86   : > { %8343 = vpow2.f32 %v6374_v12 }
0x2c93   : > { %v8344_v36 = vpop.eup %8343 }
0x2c94   : > { %v6376_v56 = vsel %vm1208_vm0, %v8344_v36, 0.0 }
0x2c95   : > { %6377 = vadd.xlane.f32.xlu1 %v6376_v56 }
0x2ca6   : > { %6381 = vrot.lane.b32.xlu1 %v9993_v35, %s10303_s9  ;;  %s6826_s9 = sshll.u32 %s1192_s2, 4  ;;  %s6827_s9 = int_to_ptr.vmem [resolvable:$true] %s6826_s9 }
0x2ca7   : > { %s8867_s10 = scalar_lea.vmem %s6827_s9, 128  ;;  %p8874_p4 = scmp.lt.s32.totalorder %s6827_s9, %s8872_s14 }
0x2ca8   : > { %p8868_p3 = scmp.ne.s32.totalorder %s6827_s9, %s8867_s10  ;;  %p8875_p13 = scmp.lt.s32.totalorder %s8873_s16, %s8867_s10 }
0x2caa   : > { %p8869_p8 = pnand %p8868_p3, %p10313_p9  ;;  %p8876_p7 = por %p8875_p13, %p8874_p4 }
0x2cac   : > { %p8870_p1 = pneg %p8869_p8 }
0x2cae   : > { %p8877_p11 = pnand %p8876_p7, %p8870_p1 }
0x2ce9   : > { %v6132_v57 = vpop.xlane.xlu1 %6131 }
0x2cea   : > { %8345 = vrcp.f32 %v6132_v57 }
0x2ced   : > { %v6136_v58 = vpop.permute.xlu1 %6135 }
0x2cee   : > { %7939 = vmatpush3.msra.mxu1 %v6136_v58 }
0x2cef   : > { %7943 = vmatprep.subr.mxu1 %v9026_v10 }
0x2cf7   : > { %v8346_v59 = vpop.eup %8345 }
0x2cf8   : > { %v6134_v60 = vmul.f32 %v8346_v59, %v8342_v1 }
0x2cfa   : > { %7941 = vmatmul.mubr.msk.f32.vlgmr.msra.gmra.mxu1 %vm1208_vm0, %v6134_v60 }
0x2cfb   : > { %7944 = vmatpush3.msra.mxu1 %v5550_v61  ;;  %7945 = vmatprep.mubr.msk.f32.mxu1 %vm9028_vm14, %v9026_v10 }
0x2cfc   : > { %7955 = vmatprep.subr.mxu1 %v9026_v10 }
0x2d1e   : > { %v6378_v23 = vpop.xlane.xlu1 %6377 }
0x2d1f   : > { %8347 = vrcp.f32 %v6378_v23 }
0x2d22   : > { %v6382_v7 = vpop.permute.xlu1 %6381 }
0x2d2c   : > { %v8348_v35 = vpop.eup %8347 }
0x2d2d   : > { %v6380_v8 = vmul.f32 %v8348_v35, %v8344_v36 }
0x2dba   : > { %v6210_v3 = vpop.f32.mrf.mxu1 }
0x2dbb   : > { %7946 = vmatmul.mubr.msk.f32.vlgmr.msra.gmra.mxu1 %vm1809_vm15, %v6210_v3 }
0x2dbc   : > { %7956 = vmatpush3.msra.mxu1 %v6384_v4  ;;  %v7942_v6 = vpop.f32.mrf.mxu1  ;;  %7959 = vmatprep.mubr.msk.f32.mxu1 %vm9028_vm14, %v9026_v10  ;;  %v7330_v4 = vld [vmem:[#allocation31 + $0x1] ss:$0 sm:$0xff] }
0x2dbd   : > { %7957 = vmatprep.subr.mxu1 %v9026_v10 }
0x2dbe   : > { %7958 = vmatpush3.msra.mxu1 %v6382_v7  ;;  %v7331_v7 = vld [vmem:[#allocation32 + $0x1] ss:$0 sm:$0xff] }
0x2dbf   : > { %7960 = vmatmul.mubr.msk.f32.vlgmr.msra.gmra.mxu1 %vm1208_vm0, %v6380_v8  ;;  %7962 = vmatprep.subr.mxu1 %v9026_v10 }
0x2dc0   : > { %7964 = vmatprep.mubr.msk.f32.mxu1 %vm9028_vm14, %v9026_v10  ;;  %7963 = vmatpush3.msra.mxu1 %v5551_v9 }
0x2dc1   : > { %7978 = vmatprep.subr.mxu1 %v9026_v10 }
0x2e7b   : > { %v6283_v14 = vpop.f32.mrf.mxu1 }
0x2e7c   : > { %v6287_v15 = vadd.f32 %v6283_v14, %v6039_v13 }
0x2e7d   : > { %v7947_v16 = vpop.f32.mrf.mxu1 }
0x2e7f   : > { %v6456_v17 = vpop.f32.mrf.mxu1 }
0x2e80   : > { %7965 = vmatmul.mubr.msk.f32.vlgmr.msra.gmra.mxu1 %vm1809_vm15, %v6456_v17 }
0x2e81   : > { %v7961_v19 = vpop.f32.mrf.mxu1  ;;  %7994 = vmatprep.mubr.msk.f32.mxu1 %vm9028_vm14, %v9026_v10  ;;  %7979 = vmatpush3.msra.mxu1 %v7327_v33 }
0x2e82   : > { %7980 = vmatprep.subr.mxu1 %v9026_v10 }
0x2e83   : > { %7981 = vmatpush3.msra.mxu1 %v7326_v63 }
0x2e84   : > { %7982 = vmatprep.subr.mxu1 %v9026_v10 }
0x2e85   : > { %7983 = vmatpush3.msra.mxu1 %v7325_v11 }
0x2e86   : > { %7984 = vmatprep.subr.mxu1 %v9026_v10 }
0x2e87   : > { %7985 = vmatpush3.msra.mxu1 %v7324_v52 }
0x2e88   : > { %7986 = vmatprep.subr.mxu1 %v9026_v10 }
0x2e89   : > { %7987 = vmatpush3.msra.mxu1 %v7323_v37 }
0x2e8a   : > { %7988 = vmatprep.subr.mxu1 %v9026_v10 }
0x2e8b   : > { %7989 = vmatpush3.msra.mxu1 %v7322_v45 }
0x2e8c   : > { %7990 = vmatprep.subr.mxu1 %v9026_v10 }
0x2e8d   : > { %7991 = vmatpush3.msra.mxu1 %v7321_v46 }
0x2e8e   : > { %7992 = vmatprep.subr.mxu1 %v9026_v10 }
0x2e8f   : > { %7993 = vmatpush3.msra.mxu1 %v7320_v47 }
0x2f40   : > { %v6529_v20 = vpop.f32.mrf.mxu1 }
0x2f41   : > { %v6533_v21 = vadd.f32 %v6529_v20, %v6287_v15 }
0x2f42   : > { %v7966_v22 = vpop.f32.mrf.mxu1 }
0x2f43   : > { %v6540_v18 = vadd.f32 %v7311_v5, %v6533_v21 }
0x2f45   : > { %v6541_v24 = vadd.f32 %v6540_v18, %v10012_v31  ;;  %v7315_v31 = vld [vmem:[%s10304_s8 + $0x28] sm:$0xff]  ;;  %v7332_v18 = vld [vmem:[%s9180_s23] ss:$0 sm:$0xff]  ;;  %s6813_s8 = scalar_lea.sflag [#allocation5], %s9460_s17 }
0x2f46   : > { %7972 = vmatpush3.msra.mxu0 %v7315_v31 }
0x2f47   : > { %v6546_v25 = vsel %vm1426_vm13, %v6541_v24, 0.0  ;;  %7973 = vmatprep.subr.mxu0 %v9026_v10 }
0x2f48   : > { %6547 = vadd.xlane.f32.xlu0 %v6546_v25  ;;  %7974 = vmatpush3.msra.mxu0 %v7314_v32  ;;  %v7333_v25 = vld [vmem:[#allocation34] ss:$0 sm:$0xff] }
0x2fd1   : > { %v6548_v26 = vpop.xlane.xlu0 %6547 }
0x2fd2   : > { %v6549_v27 = vmul.f32 0.03125, %v6548_v26 }
0x2fd4   : > { %v6550_v28 = vsub.f32 %v6541_v24, %v6549_v27 }
0x2fd6   : > { %v6551_v62 = vmul.f32 %v6550_v28, %v6550_v28 }
0x2fd8   : > { %v6552_v49 = vsel %vm1426_vm13, %v6551_v62, 0.0 }
0x2fd9   : > { %6553 = vadd.xlane.f32.xlu1 %v6552_v49 }
0x3062   : > { %v6554_v38 = vpop.xlane.xlu1 %6553 }
0x3063   : > { %v6555_v2 = vmul.f32 0.03125, %v6554_v38 }
0x3065   : > { %v6556_v39 = vadd.f32 1e-05, %v6555_v2 }
0x3067   : > { %8349 = vrsqrt.f32 %v6556_v39 }
0x3074   : > { %v8350_v40 = vpop.eup %8349 }
0x3075   : > { %v6558_v42 = vmul.f32 %v8350_v40, %v6550_v28 }
0x3077   : > { %v6565_v43 = vmul.f32 %v7312_v41, %v6558_v42 }
0x3079   : > { %v6572_v44 = vadd.f32 %v7313_v34, %v6565_v43 }
0x307b   : > { %7976 = vmatmul.mubr.msk.f32.vlgmr.msra.gmra.mxu0 %vm1426_vm13, %v6572_v44 }
0x313b   : > { %v6655_v50 = vpop.f32.mrf.mxu0 }
0x313c   : > { %v6656_v51 = vadd.f32 %v7318_v48, %v6655_v50 }
0x313d   : > { %v7977_v53 = vpop.f32.mrf.mxu0 }
0x313e   : > { %v6659_v1 = vmax.f32 %v6656_v51, 0.0 }
0x3140   : > { %7995 = vmatmul.mubr.msk.f32.vlgmr.msra.gmra.mxu1 %vm4096_vm1, %v6659_v1 }
0x3200   : > { %v6746_v0 = vpop.f32.mrf.mxu1 }
0x3201   : > { %v6747_v55 = vadd.f32 %v7328_v54, %v6746_v0 }
0x3202   : > { %v7996_v12 = vpop.f32.mrf.mxu1 }
0x3203   : > { %v6750_v36 = vadd.f32 %v6747_v55, %v6572_v44 }
0x3205   : > { %v6755_v56 = vsel %vm1426_vm13, %v6750_v36, 0.0 }
0x3206   : > { %6756 = vadd.xlane.f32.xlu0 %v6755_v56 }
0x328f   : > { %v6757_v57 = vpop.xlane.xlu0 %6756 }
0x3290   : > { %v6758_v58 = vmul.f32 0.03125, %v6757_v57 }
0x3292   : > { %v6759_v59 = vsub.f32 %v6750_v36, %v6758_v58 }
0x3294   : > { %v6760_v10 = vmul.f32 %v6759_v59, %v6759_v59 }
0x3296   : > { %v6761_v60 = vsel %vm1426_vm13, %v6760_v10, 0.0 }
0x3297   : > { %6762 = vadd.xlane.f32.xlu0 %v6761_v60 }
0x3320   : > { %v6763_v61 = vpop.xlane.xlu0 %6762 }
0x3321   : > { %v6764_v23 = vmul.f32 0.03125, %v6763_v61 }
0x3323   : > { %v6765_v35 = vadd.f32 1e-05, %v6764_v23 }
0x3325   : > { %8351 = vrsqrt.f32 %v6765_v35 }
0x3332   : > { %v8352_v3 = vpop.eup %8351 }
0x3333   : > { %v6767_v6 = vmul.f32 %v8352_v3, %v6759_v59 }
0x3335   : > { %v6774_v8 = vmul.f32 %v7330_v4, %v6767_v6 }
0x3337   : > { %v6781_v9 = vadd.f32 %v7331_v7, %v6774_v8 }
0x3339   : > { %v6784_v13 = vsel %vm1426_vm13, %v6781_v9, 0.0 }
0x333a   : > { %6785 = vadd.xlane.f32.xlu1 %v6784_v13 }
0x33c3   : > { %v6786_v14 = vpop.xlane.xlu1 %6785 }
0x33c4   : > { %v6787_v15 = vmul.f32 0.03125, %v6786_v14 }
0x33c6   : > { %v6788_v16 = vsub.f32 %v6781_v9, %v6787_v15 }
0x33c8   : > { %v6789_v17 = vmul.f32 %v6788_v16, %v6788_v16 }
0x33ca   : > { %v6790_v19 = vsel %vm1426_vm13, %v6789_v17, 0.0 }
0x33cb   : > { %6791 = vadd.xlane.f32.xlu0 %v6790_v19 }
0x3454   : > { %v6792_v5 = vpop.xlane.xlu0 %6791 }
0x3455   : > { %v6793_v20 = vmul.f32 0.03125, %v6792_v5 }
0x3457   : > { %v6794_v21 = vadd.f32 1e-05, %v6793_v20 }
0x3459   : > { %8353 = vrsqrt.f32 %v6794_v21 }
0x3466   : > { %v8354_v22 = vpop.eup %8353 }
0x3467   : > { %v6796_v24 = vmul.f32 %v8354_v22, %v6788_v16 }
0x3469   : > { %v6803_v26 = vmul.f32 %v7332_v18, %v6796_v24 }
0x346b   : > { %v6810_v27 = vadd.f32 %v7333_v25, %v6803_v26 }
0x346d   : > { %6811 = vst.msk [vmem:[%s1192_s2] sm:$0xff] %vm1426_vm13, %v6810_v27 }
0x346e   : > { %8880 = shalt.err (!%p8877_p11)
}
0x346f   : > { %s8881_s15 = scalar_lea.hbm %s6824_s1, 128  ;;  %s8885_s17 = scalar_lea.hbm %s10312_s6, 256 }
0x3470   : > { %p8882_p6 = scmp.ne.s32.totalorder %s6824_s1, %s8881_s15  ;;  %p8886_p0 = scmp.lt.s32.totalorder %s6824_s1, %s10312_s6 }
0x3471   : > { %p8887_p2 = scmp.lt.s32.totalorder %s8885_s17, %s8881_s15 }
0x3472   : > { %p8883_p10 = pnand %p8882_p6, %p10313_p9 }
0x3473   : > { %p8888_p5 = por %p8887_p2, %p8886_p0 }
0x3474   : > { %p8884_p12 = pneg %p8883_p10 }
0x3476   : > { %p8889_p3 = pnand %p8888_p5, %p8884_p12 }
0x3478   : > { %8892 = shalt.err (!%p8889_p3)
}
0x3479   : > { %8075 = dma.vmem_to_hbm [thread:$0]  (%p10313_p9), %s6827_s9, 128, %s6824_s1, %s6813_s8  }
0x347a PF: > { %s6838_s14 = sand.u32 1, %s8959_s5   ;;  %p10314_p8 = scmp.ne.s32.totalorder %s10273_s3, 0 }
0x347b   : > { %p10315_p1 = scmp.ge.s32.totalorder %s8971_s13, 2  ;;  %s6839_s16 = scalar_lea.sflag [#allocation5], %s6838_s14 }
0x347d   : > { %p8140_p4 = pnand %p10315_p1, %p10314_p8 }
0x347f   : > { %p8141_p13 = pneg %p8140_p4 }
0x3481   : > { %8954 = dma.done.wait (%p8141_p13), %s6839_s16, 128  }
0x3482   : > { %8956 = vsyncadd (%p8141_p13), %s6839_s16, 4294967168  ;;  %p83_p7 = scmp.ge.s32.totalorder %s9397_s22, 4   ;;  %s10316_s5 = smov %s8963_s7 }
0x3483   : > { %s10317_s7 = smov %s8967_s0  ;;  %s10318_s0 = smov %s9409_s11 }
0x3484   : > { %s10319_s13 = smov %s9397_s22  ;;  %85 = sbr.rel (!%p83_p7) target bundleno = 73 (0x49), region = 309 }
0x3489   :  { %6844 = vsyncpa [#allocation4], 1 }
0x348a   :  { %6846 = vsyncpa [#allocation4 + $0x1], 1 }
0x348b   :  { %6847 = vsyncpa [#allocation9], 1 }
0x348c   :  { %6848 = vsyncpa [#allocation12], 1 }
0x348d   :  { %6849 = vsyncpa [#allocation15], 1 }
0x348e   :  { %6850 = vsyncpa [#allocation18], 1 }
0x348f   :  { %6851 = vsyncpa [#allocation21], 1 }
0x3490   :  { %6852 = vsyncpa [#allocation24], 1 }
0x3491   :  { %6853 = vsyncpa [#allocation27], 1 }
0x3492   :  { %6854 = vsyncpa [#allocation30], 1 }
0x3493   :  { %6855 = vsyncpa [#allocation33], 1 }
0x3494   :  { %6856 = vsyncpa [#allocation5], 1 }
0x3495   :  { %6858 = vsyncpa [#allocation5 + $0x1], 1 }
0x3496   :  { %6859 = vsyncpa [#allocation6], 1 }
0x3497   :  { %6861 = vsyncpa [#allocation6 + $0x1], 1 }

</bundles_post_ra>
